<compile_context>
chip_gen: v6e
topology: v6e:2x2x1
jax: 0.10.0
libtpu: 0.0.40
codegen_flags: <defaults>
</compile_context>

<pallas_src>
import math
import functools

import jax
import jax.numpy as jnp
from jax import lax
from jax.experimental import pallas as pl
from jax.experimental.pallas import tpu as pltpu


def _round_up(x, m):
    return ((x + m - 1) // m) * m


def _const_index_map(ndim):
    return lambda c: (0,) * ndim


# -----------------------------------------------------------------------------
# Recurrent kernel: one grid step == `chunk` timesteps of the whole layer stack.
# -----------------------------------------------------------------------------
def _deep_rnn_kernel(*refs, num_layers, chunk, seq_len, is_relu_activ,
                     fuse_layer_matmuls, compute_dtype, mask_steps):
    if num_layers > 1:
        (x_ref, wx0_ref, wh0_ref, wcat_ref, bh_ref, wo_ref, bo_ref,
         out_ref, h_ref, proj_ref) = refs
    else:
        (x_ref, wx0_ref, wh0_ref, bh_ref, wo_ref, bo_ref,
         out_ref, h_ref, proj_ref) = refs
        wcat_ref = None

    c = pl.program_id(0)
    T, Bp, Ip = x_ref.shape
    Hp = wh0_ref.shape[-1]
    cdt = compute_dtype

    @pl.when(c == 0)
    def _():
        h_ref[...] = jnp.zeros_like(h_ref)

    # Fused per-chunk layer-0 input projection (one big MXU matmul per chunk),
    # with bh[0] folded in so the per-step critical path is dot -> add -> tanh.
    # Bp % 8 == 0 and Ip % 128 == 0 guarantee the reshape is layout-free.
    x2 = x_ref[...].reshape(T * Bp, Ip).astype(cdt)
    proj = jnp.dot(x2, wx0_ref[...].astype(cdt),
                   preferred_element_type=jnp.float32) + bh_ref[0]
    proj_ref[...] = proj.reshape(T, Bp, Hp)

    # Hidden states live in registers across the whole chunk.
    hs = tuple(h_ref[i] for i in range(num_layers))

    # Hoist weight / bias loads out of the timestep loop.
    wh0 = wh0_ref[...].astype(cdt)
    bhs = tuple(bh_ref[i] for i in range(1, num_layers))        # bh[0] folded above
    wcats, wxs, whs = (), (), ()
    if num_layers > 1:
        full = tuple(wcat_ref[i].astype(cdt) for i in range(num_layers - 1))
        if fuse_layer_matmuls:
            wcats = full
        else:
            # v5e path: two K=Hp dots cost the same MXU passes; skip the concat.
            wxs = tuple(w[:Hp] for w in full)
            whs = tuple(w[Hp:] for w in full)

    def act(v):
        v = jnp.tanh(v)
        if is_relu_activ:
            v = jnp.maximum(v, 0.0)
        return v

    def step(t, hs):
        h0 = act(proj_ref[t] + jnp.dot(hs[0].astype(cdt), wh0,
                                       preferred_element_type=jnp.float32))
        new_hs = [h0]
        for i in range(1, num_layers):
            if fuse_layer_matmuls:
                # [h_{i-1}(t), h_i(t-1)] @ [Wx_i ; Wh_i]: K = 2*Hp fills one pass
                # on the 256-deep v6e/v7x MXU.
                cat = jnp.concatenate([new_hs[i - 1], hs[i]], axis=-1).astype(cdt)
                pre = jnp.dot(cat, wcats[i - 1], preferred_element_type=jnp.float32)
            else:
                pre = (jnp.dot(new_hs[i - 1].astype(cdt), wxs[i - 1],
                               preferred_element_type=jnp.float32)
                       + jnp.dot(hs[i].astype(cdt), whs[i - 1],
                                 preferred_element_type=jnp.float32))
            new_hs.append(act(pre + bhs[i - 1]))
        if mask_steps:
            # Remainder chunk: padded global steps must be exact no-ops (the bias
            # inside tanh means they are NOT no-ops without the gate).
            valid = (c * chunk + t) < seq_len
            new_hs = [jnp.where(valid, hn, ho) for hn, ho in zip(new_hs, hs)]
        return tuple(new_hs)

    unroll = 8 if (chunk > 8 and chunk % 8 == 0) else True
    hs = lax.fori_loop(0, chunk, step, hs, unroll=unroll)

    # Single scratch write-back per chunk.
    for i in range(num_layers):
        h_ref[i] = hs[i]

    # Classifier projection on the final chunk only (lane-dense padded output).
    @pl.when(c == pl.num_programs(0) - 1)
    def _():
        out_ref[...] = (jnp.dot(hs[num_layers - 1].astype(cdt),
                                wo_ref[...].astype(cdt),
                                preferred_element_type=jnp.float32)
                        + bo_ref[...])


def _vmem_bytes_estimate(L, T, Bp, Ip, Hp, Cp):
    f = 4  # f32 bytes
    x_blocks = 2 * T * Bp * Ip * f                                 # double-buffered x chunk
    weights = 2 * f * (Ip * Hp + Hp * Hp + max(L - 1, 0) * 2 * Hp * Hp
                       + L * 8 * Hp + Hp * Cp + 8 * Cp)            # worst case: 2 buffers
    out_block = 2 * Bp * Cp * f
    scratch = (L + T) * Bp * Hp * f
    return x_blocks + weights + out_block + scratch


# -----------------------------------------------------------------------------
# Wrapper: padding, weight fusion, single recurrent pallas_call.
# -----------------------------------------------------------------------------
def deep_rnn_forward(x, params, *, num_layers, is_relu_activ=False,
                     max_chunk=32, fuse_layer_matmuls=True,
                     compute_dtype=jnp.float32):
    """x: (batch, seq, input_size) float32. Returns (batch, num_classes)."""
    wx0, wx_rest, wh, bh, wo, bo = params
    B, S, I = x.shape
    H = wh.shape[-1]
    C = wo.shape[-1]
    L = num_layers
    f32 = jnp.float32

    Hp = _round_up(H, 128)                    # lane-aligned hidden dim
    Cp = _round_up(C, 128)                    # lane-dense output
    Ip = _round_up(I, 128)                    # unmasked x loads / layout-free reshape
    Bp = _round_up(B, 8)                      # sublane-aligned batch
    T = max(1, min(S, max_chunk))             # timesteps per grid step
    num_chunks = pl.cdiv(S, T)
    Sp = num_chunks * T

    # (seq, batch, input) zero-padded to (Sp, Bp, Ip). Padded timesteps are masked
    # in-kernel, padded batch rows are sliced off at the end, and padded input lanes
    # only hit zero rows of Wx0 -- numerics are exact.
    x_sbi = jnp.transpose(x.astype(f32), (1, 0, 2))
    x_sbi = jnp.pad(x_sbi, ((0, Sp - S), (0, Bp - B), (0, Ip - I)))

    wx0_p = jnp.pad(wx0, ((0, Ip - I), (0, Hp - H)))                  # (Ip, Hp)
    wh_p = jnp.pad(wh, ((0, 0), (0, Hp - H), (0, Hp - H)))            # (L, Hp, Hp)
    bh_p = jnp.pad(bh, ((0, 0), (0, Hp - H))).reshape(L, 1, Hp)       # (L, 1, Hp)
    wo_p = jnp.pad(wo, ((0, Hp - H), (0, Cp - C)))                    # (Hp, Cp)
    bo_p = jnp.pad(bo, ((0, Cp - C),)).reshape(1, Cp)                 # (1, Cp)

    inputs = [x_sbi, wx0_p, wh_p[0]]
    if L > 1:
        wx_rest_p = jnp.pad(wx_rest, ((0, 0), (0, Hp - H), (0, Hp - H)))
        wcat = jnp.concatenate([wx_rest_p, wh_p[1:]], axis=1)         # (L-1, 2*Hp, Hp)
        inputs.append(wcat)
    inputs += [bh_p, wo_p, bo_p]

    vmem_limit = min(max(int(1.5 * _vmem_bytes_estimate(L, T, Bp, Ip, Hp, Cp))
                         + (8 << 20), 32 << 20), 112 << 20)

    kernel = functools.partial(
        _deep_rnn_kernel, num_layers=L, chunk=T, seq_len=S,
        is_relu_activ=is_relu_activ, fuse_layer_matmuls=fuse_layer_matmuls,
        compute_dtype=compute_dtype, mask_steps=(Sp != S))

    def build(single_buffer_weights):
        def const_spec(shape):
            index_map = _const_index_map(len(shape))
            if single_buffer_weights:
                # Constant-index weight blocks are DMA'd once; one buffer suffices.
                return pl.BlockSpec(shape, index_map, pipeline_mode=pl.Buffered(1))
            return pl.BlockSpec(shape, index_map)

        in_specs = [pl.BlockSpec((T, Bp, Ip), lambda c: (c, 0, 0)),   # x chunk
                    const_spec((Ip, Hp)),                             # Wx layer 0
                    const_spec((Hp, Hp))]                             # Wh layer 0
        if L > 1:
            in_specs.append(const_spec((L - 1, 2 * Hp, Hp)))          # [Wx_i ; Wh_i]
        in_specs += [const_spec((L, 1, Hp)),                          # bh (stacked)
                     const_spec((Hp, Cp)),                            # Wo
                     const_spec((1, Cp))]                             # bo

        return pl.pallas_call(
            kernel,
            out_shape=jax.ShapeDtypeStruct((Bp, Cp), f32),
            grid_spec=pltpu.PrefetchScalarGridSpec(
                num_scalar_prefetch=0,
                grid=(num_chunks,),
                in_specs=in_specs,
                out_specs=pl.BlockSpec((Bp, Cp), lambda c: (0, 0)),
                scratch_shapes=[pltpu.VMEM((L, Bp, Hp), f32),         # hidden carry
                                pltpu.VMEM((T, Bp, Hp), f32)]),       # chunk projection
            compiler_params=pltpu.CompilerParams(
                dimension_semantics=("arbitrary",),                   # sequential carry
                vmem_limit_bytes=vmem_limit))

    try:
        out_p = build(single_buffer_weights=True)(*inputs)
    except Exception:
        # Fallback if this Pallas build rejects pl.Buffered(1) single buffering.
        out_p = build(single_buffer_weights=False)(*inputs)

    return out_p[:B, :C]


# -----------------------------------------------------------------------------
# Deterministic parameter init, mirroring reset_parameters(): U(-stdv, stdv).
# -----------------------------------------------------------------------------
def init_deep_rnn_params(key, input_size, hidden_size, num_layers, num_classes):
    stdv = 1.0 / math.sqrt(hidden_size)
    keys = jax.random.split(key, 6)

    def u(k, shape):
        return jax.random.uniform(k, shape, jnp.float32, minval=-stdv, maxval=stdv)

    wx0 = u(keys[0], (input_size, hidden_size))
    wx_rest = u(keys[1], (max(num_layers - 1, 0), hidden_size, hidden_size))
    wh = u(keys[2], (num_layers, hidden_size, hidden_size))
    bh = u(keys[3], (num_layers, hidden_size))
    wo = u(keys[4], (hidden_size, num_classes))
    bo = u(keys[5], (num_classes,))
    return wx0, wx_rest, wh, bh, wo, bo


# -----------------------------------------------------------------------------
# Pure-JAX reference (direct transliteration of the PyTorch forward).
# -----------------------------------------------------------------------------
def deep_rnn_reference(x, params, *, num_layers, is_relu_activ=False):
    wx0, wx_rest, wh, bh, wo, bo = params
    B, S, _ = x.shape
    H = wh.shape[-1]
    x_sbi = jnp.transpose(x, (1, 0, 2))
    h = [jnp.zeros((B, H), jnp.float32) for _ in range(num_layers)]
    for t in range(S):
        x_step = x_sbi[t]
        for i in range(num_layers):
            wxx = x_step @ wx0 if i == 0 else h[i - 1] @ wx_rest[i - 1]
            h_new = jnp.tanh(wxx + h[i] @ wh[i] + bh[i])
            if is_relu_activ:
                h_new = jnp.maximum(h_new, 0.0)
            h[i] = h_new
    return h[-1] @ wo + bo


if __name__ == "__main__":
    def run_case(name, *, batch, seq, input_size, hidden_size, num_layers,
                 num_classes, is_relu_activ, max_chunk=32,
                 fuse_layer_matmuls=True, compute_dtype=jnp.float32,
                 atol=1e-4, rtol=1e-4, seed=0):
        key = jax.random.PRNGKey(seed)
        kx, kp = jax.random.split(key)
        x = jax.random.normal(kx, (batch, seq, input_size), jnp.float32)
        params = init_deep_rnn_params(kp, input_size, hidden_size, num_layers,
                                      num_classes)
        out = deep_rnn_forward(x, params, num_layers=num_layers,
                               is_relu_activ=is_relu_activ, max_chunk=max_chunk,
                               fuse_layer_matmuls=fuse_layer_matmuls,
                               compute_dtype=compute_dtype)
        out = jax.block_until_ready(out)
        ref = deep_rnn_reference(x, params, num_layers=num_layers,
                                 is_relu_activ=is_relu_activ)
        assert out.shape == (batch, num_classes), name
        err = float(jnp.max(jnp.abs(out - ref)))
        assert jnp.allclose(out, ref, atol=atol, rtol=rtol), \
            f"{name}: mismatch vs JAX reference (max abs err {err})"

    # Primary: small shapes consistent with the module (x is (batch, seq, input)).
    run_case("l2_tanh", batch=8, seq=8, input_size=16, hidden_size=32,
             num_layers=2, num_classes=10, is_relu_activ=False)
    # Single-layer path.
    run_case("l1_tanh", batch=8, seq=8, input_size=16, hidden_size=32,
             num_layers=1, num_classes=10, is_relu_activ=False)
    # Remainder chunk (seq % chunk != 0), odd batch / input / class sizes, relu(tanh).
    run_case("l3_relu_remainder", batch=5, seq=13, input_size=20, hidden_size=48,
             num_layers=3, num_classes=7, is_relu_activ=True, max_chunk=4)
    # Unfused per-layer matmuls (preferred on v5e's 128-deep MXU).
    run_case("l2_tanh_unfused", batch=8, seq=8, input_size=16, hidden_size=32,
             num_layers=2, num_classes=10, is_relu_activ=False,
             fuse_layer_matmuls=False)
    # bf16 MXU inputs with f32 accumulation (looser tolerance).
    run_case("l2_tanh_bf16", batch=8, seq=8, input_size=16, hidden_size=32,
             num_layers=2, num_classes=10, is_relu_activ=False,
             compute_dtype=jnp.bfloat16, atol=0.1, rtol=0.1)

    print("KERNEL_OK")
</pallas_src>

<mosaic_0001>
module attributes {stable_mosaic.version = 11 : i64} {
  func.func @_deep_rnn_kernel(%arg0: i32, %arg1: memref<8x8x128xf32, #tpu.memory_space<vmem>>, %arg2: memref<128x128xf32, #tpu.memory_space<vmem>>, %arg3: memref<128x128xf32, #tpu.memory_space<vmem>>, %arg4: memref<1x256x128xf32, #tpu.memory_space<vmem>>, %arg5: memref<2x1x128xf32, #tpu.memory_space<vmem>>, %arg6: memref<128x128xf32, #tpu.memory_space<vmem>>, %arg7: memref<1x128xf32, #tpu.memory_space<vmem>>, %arg8: memref<8x128xf32, #tpu.memory_space<vmem>>, %arg9: memref<2x8x128xf32, #tpu.memory_space<vmem>>, %arg10: memref<8x8x128xf32, #tpu.memory_space<vmem>>) attributes {dimension_semantics = [#tpu.dimension_semantics<arbitrary>], iteration_bounds = array<i64: 1>, scalar_prefetch = 0 : i64, scratch_operands = 2 : i64, tpu.core_type = #tpu.core_type<tc>, window_params = [{transform_indices = @transform_0, window_bounds = array<i64: 8, 8, 128>}, {pipeline_mode = #tpu.pipeline_mode<synchronous>, transform_indices = @transform_1, window_bounds = array<i64: 128, 128>}, {pipeline_mode = #tpu.pipeline_mode<synchronous>, transform_indices = @transform_2, window_bounds = array<i64: 128, 128>}, {pipeline_mode = #tpu.pipeline_mode<synchronous>, transform_indices = @transform_3, window_bounds = array<i64: 1, 256, 128>}, {pipeline_mode = #tpu.pipeline_mode<synchronous>, transform_indices = @transform_4, window_bounds = array<i64: 2, 1, 128>}, {pipeline_mode = #tpu.pipeline_mode<synchronous>, transform_indices = @transform_5, window_bounds = array<i64: 128, 128>}, {pipeline_mode = #tpu.pipeline_mode<synchronous>, transform_indices = @transform_6, window_bounds = array<i64: 1, 128>}, {pipeline_mode = #tpu.pipeline_mode<synchronous>, transform_indices = @transform_7, window_bounds = array<i64: 8, 128>}]} {
    %c0_i32 = arith.constant 0 : i32
    %0 = arith.cmpi eq, %arg0, %c0_i32 : i32
    %1 = arith.extui %0 : i1 to i32
    %c0_i32_0 = arith.constant 0 : i32
    %2 = arith.cmpi ne, %1, %c0_i32_0 : i32
    scf.if %2 {
      %cst_65 = arith.constant 0.000000e+00 : f32
      %119 = vector.broadcast %cst_65 : f32 to vector<2x8x128xf32>
      %c0_66 = arith.constant 0 : index
      %c0_67 = arith.constant 0 : index
      %c0_68 = arith.constant 0 : index
      %120 = vector.load %arg9[%c0_66, %c0_67, %c0_68] : memref<2x8x128xf32, #tpu.memory_space<vmem>>, vector<2x8x128xf32>
      tpu.vector_store %arg9[%c0_66, %c0_67, %c0_68], %119 {strides = array<i32>} : memref<2x8x128xf32, #tpu.memory_space<vmem>>, vector<2x8x128xf32>,
    } else {
    }
    %c0 = arith.constant 0 : index
    %c0_1 = arith.constant 0 : index
    %c0_2 = arith.constant 0 : index
    %3 = vector.load %arg1[%c0, %c0_1, %c0_2] : memref<8x8x128xf32, #tpu.memory_space<vmem>>, vector<8x8x128xf32>
    %4 = vector.shape_cast %3 : vector<8x8x128xf32> to vector<64x128xf32>
    %c0_3 = arith.constant 0 : index
    %c0_4 = arith.constant 0 : index
    %5 = vector.load %arg2[%c0_3, %c0_4] : memref<128x128xf32, #tpu.memory_space<vmem>>, vector<128x128xf32>
    %cst = arith.constant dense<0.000000e+00> : vector<64x128xf32>
    %6 = tpu.matmul %4, %5, %cst {dimension_numbers = #tpu.dot_dimension_numbers<[1], [0], [0], [1], [0, 0, 1, 1], [], []>} : vector<64x128xf32>, vector<128x128xf32>, vector<64x128xf32> -> vector<64x128xf32>
    %c0_5 = arith.constant 0 : index
    %c0_6 = arith.constant 0 : index
    %c0_7 = arith.constant 0 : index
    %7 = vector.load %arg5[%c0_5, %c0_6, %c0_7] : memref<2x1x128xf32, #tpu.memory_space<vmem>>, vector<1x1x128xf32>
    %8 = vector.shape_cast %7 : vector<1x1x128xf32> to vector<1x128xf32>
    %9 = vector.broadcast %8 : vector<1x128xf32> to vector<64x128xf32>
    %10 = arith.addf %6, %9 : vector<64x128xf32>
    %11 = vector.shape_cast %10 : vector<64x128xf32> to vector<8x8x128xf32>
    %c0_8 = arith.constant 0 : index
    %c0_9 = arith.constant 0 : index
    %c0_10 = arith.constant 0 : index
    %12 = vector.load %arg10[%c0_8, %c0_9, %c0_10] : memref<8x8x128xf32, #tpu.memory_space<vmem>>, vector<8x8x128xf32>
    tpu.vector_store %arg10[%c0_8, %c0_9, %c0_10], %11 {strides = array<i32>} : memref<8x8x128xf32, #tpu.memory_space<vmem>>, vector<8x8x128xf32>,
    %c0_11 = arith.constant 0 : index
    %c0_12 = arith.constant 0 : index
    %c0_13 = arith.constant 0 : index
    %13 = vector.load %arg9[%c0_11, %c0_12, %c0_13] : memref<2x8x128xf32, #tpu.memory_space<vmem>>, vector<1x8x128xf32>
    %14 = vector.shape_cast %13 : vector<1x8x128xf32> to vector<8x128xf32>
    %c1 = arith.constant 1 : index
    %c0_14 = arith.constant 0 : index
    %c0_15 = arith.constant 0 : index
    %15 = vector.load %arg9[%c1, %c0_14, %c0_15] : memref<2x8x128xf32, #tpu.memory_space<vmem>>, vector<1x8x128xf32>
    %16 = vector.shape_cast %15 : vector<1x8x128xf32> to vector<8x128xf32>
    %c0_16 = arith.constant 0 : index
    %c0_17 = arith.constant 0 : index
    %17 = vector.load %arg3[%c0_16, %c0_17] : memref<128x128xf32, #tpu.memory_space<vmem>>, vector<128x128xf32>
    %c1_18 = arith.constant 1 : index
    %c0_19 = arith.constant 0 : index
    %c0_20 = arith.constant 0 : index
    %18 = vector.load %arg5[%c1_18, %c0_19, %c0_20] : memref<2x1x128xf32, #tpu.memory_space<vmem>>, vector<1x1x128xf32>
    %19 = vector.shape_cast %18 : vector<1x1x128xf32> to vector<1x128xf32>
    %c0_21 = arith.constant 0 : index
    %c0_22 = arith.constant 0 : index
    %c0_23 = arith.constant 0 : index
    %20 = vector.load %arg4[%c0_21, %c0_22, %c0_23] : memref<1x256x128xf32, #tpu.memory_space<vmem>>, vector<1x256x128xf32>
    %21 = vector.shape_cast %20 : vector<1x256x128xf32> to vector<256x128xf32>
    %c0_i32_24 = arith.constant 0 : i32
    %22 = arith.index_cast %c0_i32_24 : i32 to index
    %c0_25 = arith.constant 0 : index
    %c0_26 = arith.constant 0 : index
    %23 = vector.load %arg10[%22, %c0_25, %c0_26] : memref<8x8x128xf32, #tpu.memory_space<vmem>>, vector<1x8x128xf32>
    %24 = vector.shape_cast %23 : vector<1x8x128xf32> to vector<8x128xf32>
    %cst_27 = arith.constant dense<0.000000e+00> : vector<8x128xf32>
    %25 = tpu.matmul %14, %17, %cst_27 {dimension_numbers = #tpu.dot_dimension_numbers<[1], [0], [0], [1], [0, 0, 1, 1], [], []>} : vector<8x128xf32>, vector<128x128xf32>, vector<8x128xf32> -> vector<8x128xf32>
    %26 = arith.addf %24, %25 : vector<8x128xf32>
    %27 = math.tanh %26 : vector<8x128xf32>
    %28 = tpu.concatenate %27, %16 in 1 : vector<8x128xf32>, vector<8x128xf32> -> vector<8x256xf32>
    %cst_28 = arith.constant dense<0.000000e+00> : vector<8x128xf32>
    %29 = tpu.matmul %28, %21, %cst_28 {dimension_numbers = #tpu.dot_dimension_numbers<[1], [0], [0], [1], [0, 0, 1, 1], [], []>} : vector<8x256xf32>, vector<256x128xf32>, vector<8x128xf32> -> vector<8x128xf32>
    %30 = vector.broadcast %19 : vector<1x128xf32> to vector<8x128xf32>
    %31 = arith.addf %29, %30 : vector<8x128xf32>
    %32 = math.tanh %31 : vector<8x128xf32>
    %c1_i32 = arith.constant 1 : i32
    %33 = arith.index_cast %c1_i32 : i32 to index
    %c0_29 = arith.constant 0 : index
    %c0_30 = arith.constant 0 : index
    %34 = vector.load %arg10[%33, %c0_29, %c0_30] : memref<8x8x128xf32, #tpu.memory_space<vmem>>, vector<1x8x128xf32>
    %35 = vector.shape_cast %34 : vector<1x8x128xf32> to vector<8x128xf32>
    %cst_31 = arith.constant dense<0.000000e+00> : vector<8x128xf32>
    %36 = tpu.matmul %27, %17, %cst_31 {dimension_numbers = #tpu.dot_dimension_numbers<[1], [0], [0], [1], [0, 0, 1, 1], [], []>} : vector<8x128xf32>, vector<128x128xf32>, vector<8x128xf32> -> vector<8x128xf32>
    %37 = arith.addf %35, %36 : vector<8x128xf32>
    %38 = math.tanh %37 : vector<8x128xf32>
    %39 = tpu.concatenate %38, %32 in 1 : vector<8x128xf32>, vector<8x128xf32> -> vector<8x256xf32>
    %cst_32 = arith.constant dense<0.000000e+00> : vector<8x128xf32>
    %40 = tpu.matmul %39, %21, %cst_32 {dimension_numbers = #tpu.dot_dimension_numbers<[1], [0], [0], [1], [0, 0, 1, 1], [], []>} : vector<8x256xf32>, vector<256x128xf32>, vector<8x128xf32> -> vector<8x128xf32>
    %41 = vector.broadcast %19 : vector<1x128xf32> to vector<8x128xf32>
    %42 = arith.addf %40, %41 : vector<8x128xf32>
    %43 = math.tanh %42 : vector<8x128xf32>
    %c2_i32 = arith.constant 2 : i32
    %44 = arith.index_cast %c2_i32 : i32 to index
    %c0_33 = arith.constant 0 : index
    %c0_34 = arith.constant 0 : index
    %45 = vector.load %arg10[%44, %c0_33, %c0_34] : memref<8x8x128xf32, #tpu.memory_space<vmem>>, vector<1x8x128xf32>
    %46 = vector.shape_cast %45 : vector<1x8x128xf32> to vector<8x128xf32>
    %cst_35 = arith.constant dense<0.000000e+00> : vector<8x128xf32>
    %47 = tpu.matmul %38, %17, %cst_35 {dimension_numbers = #tpu.dot_dimension_numbers<[1], [0], [0], [1], [0, 0, 1, 1], [], []>} : vector<8x128xf32>, vector<128x128xf32>, vector<8x128xf32> -> vector<8x128xf32>
    %48 = arith.addf %46, %47 : vector<8x128xf32>
    %49 = math.tanh %48 : vector<8x128xf32>
    %50 = tpu.concatenate %49, %43 in 1 : vector<8x128xf32>, vector<8x128xf32> -> vector<8x256xf32>
    %cst_36 = arith.constant dense<0.000000e+00> : vector<8x128xf32>
    %51 = tpu.matmul %50, %21, %cst_36 {dimension_numbers = #tpu.dot_dimension_numbers<[1], [0], [0], [1], [0, 0, 1, 1], [], []>} : vector<8x256xf32>, vector<256x128xf32>, vector<8x128xf32> -> vector<8x128xf32>
    %52 = vector.broadcast %19 : vector<1x128xf32> to vector<8x128xf32>
    %53 = arith.addf %51, %52 : vector<8x128xf32>
    %54 = math.tanh %53 : vector<8x128xf32>
    %c3_i32 = arith.constant 3 : i32
    %55 = arith.index_cast %c3_i32 : i32 to index
    %c0_37 = arith.constant 0 : index
    %c0_38 = arith.constant 0 : index
    %56 = vector.load %arg10[%55, %c0_37, %c0_38] : memref<8x8x128xf32, #tpu.memory_space<vmem>>, vector<1x8x128xf32>
    %57 = vector.shape_cast %56 : vector<1x8x128xf32> to vector<8x128xf32>
    %cst_39 = arith.constant dense<0.000000e+00> : vector<8x128xf32>
    %58 = tpu.matmul %49, %17, %cst_39 {dimension_numbers = #tpu.dot_dimension_numbers<[1], [0], [0], [1], [0, 0, 1, 1], [], []>} : vector<8x128xf32>, vector<128x128xf32>, vector<8x128xf32> -> vector<8x128xf32>
    %59 = arith.addf %57, %58 : vector<8x128xf32>
    %60 = math.tanh %59 : vector<8x128xf32>
    %61 = tpu.concatenate %60, %54 in 1 : vector<8x128xf32>, vector<8x128xf32> -> vector<8x256xf32>
    %cst_40 = arith.constant dense<0.000000e+00> : vector<8x128xf32>
    %62 = tpu.matmul %61, %21, %cst_40 {dimension_numbers = #tpu.dot_dimension_numbers<[1], [0], [0], [1], [0, 0, 1, 1], [], []>} : vector<8x256xf32>, vector<256x128xf32>, vector<8x128xf32> -> vector<8x128xf32>
    %63 = vector.broadcast %19 : vector<1x128xf32> to vector<8x128xf32>
    %64 = arith.addf %62, %63 : vector<8x128xf32>
    %65 = math.tanh %64 : vector<8x128xf32>
    %c4_i32 = arith.constant 4 : i32
    %66 = arith.index_cast %c4_i32 : i32 to index
    %c0_41 = arith.constant 0 : index
    %c0_42 = arith.constant 0 : index
    %67 = vector.load %arg10[%66, %c0_41, %c0_42] : memref<8x8x128xf32, #tpu.memory_space<vmem>>, vector<1x8x128xf32>
    %68 = vector.shape_cast %67 : vector<1x8x128xf32> to vector<8x128xf32>
    %cst_43 = arith.constant dense<0.000000e+00> : vector<8x128xf32>
    %69 = tpu.matmul %60, %17, %cst_43 {dimension_numbers = #tpu.dot_dimension_numbers<[1], [0], [0], [1], [0, 0, 1, 1], [], []>} : vector<8x128xf32>, vector<128x128xf32>, vector<8x128xf32> -> vector<8x128xf32>
    %70 = arith.addf %68, %69 : vector<8x128xf32>
    %71 = math.tanh %70 : vector<8x128xf32>
    %72 = tpu.concatenate %71, %65 in 1 : vector<8x128xf32>, vector<8x128xf32> -> vector<8x256xf32>
    %cst_44 = arith.constant dense<0.000000e+00> : vector<8x128xf32>
    %73 = tpu.matmul %72, %21, %cst_44 {dimension_numbers = #tpu.dot_dimension_numbers<[1], [0], [0], [1], [0, 0, 1, 1], [], []>} : vector<8x256xf32>, vector<256x128xf32>, vector<8x128xf32> -> vector<8x128xf32>
    %74 = vector.broadcast %19 : vector<1x128xf32> to vector<8x128xf32>
    %75 = arith.addf %73, %74 : vector<8x128xf32>
    %76 = math.tanh %75 : vector<8x128xf32>
    %c5_i32 = arith.constant 5 : i32
    %77 = arith.index_cast %c5_i32 : i32 to index
    %c0_45 = arith.constant 0 : index
    %c0_46 = arith.constant 0 : index
    %78 = vector.load %arg10[%77, %c0_45, %c0_46] : memref<8x8x128xf32, #tpu.memory_space<vmem>>, vector<1x8x128xf32>
    %79 = vector.shape_cast %78 : vector<1x8x128xf32> to vector<8x128xf32>
    %cst_47 = arith.constant dense<0.000000e+00> : vector<8x128xf32>
    %80 = tpu.matmul %71, %17, %cst_47 {dimension_numbers = #tpu.dot_dimension_numbers<[1], [0], [0], [1], [0, 0, 1, 1], [], []>} : vector<8x128xf32>, vector<128x128xf32>, vector<8x128xf32> -> vector<8x128xf32>
    %81 = arith.addf %79, %80 : vector<8x128xf32>
    %82 = math.tanh %81 : vector<8x128xf32>
    %83 = tpu.concatenate %82, %76 in 1 : vector<8x128xf32>, vector<8x128xf32> -> vector<8x256xf32>
    %cst_48 = arith.constant dense<0.000000e+00> : vector<8x128xf32>
    %84 = tpu.matmul %83, %21, %cst_48 {dimension_numbers = #tpu.dot_dimension_numbers<[1], [0], [0], [1], [0, 0, 1, 1], [], []>} : vector<8x256xf32>, vector<256x128xf32>, vector<8x128xf32> -> vector<8x128xf32>
    %85 = vector.broadcast %19 : vector<1x128xf32> to vector<8x128xf32>
    %86 = arith.addf %84, %85 : vector<8x128xf32>
    %87 = math.tanh %86 : vector<8x128xf32>
    %c6_i32 = arith.constant 6 : i32
    %88 = arith.index_cast %c6_i32 : i32 to index
    %c0_49 = arith.constant 0 : index
    %c0_50 = arith.constant 0 : index
    %89 = vector.load %arg10[%88, %c0_49, %c0_50] : memref<8x8x128xf32, #tpu.memory_space<vmem>>, vector<1x8x128xf32>
    %90 = vector.shape_cast %89 : vector<1x8x128xf32> to vector<8x128xf32>
    %cst_51 = arith.constant dense<0.000000e+00> : vector<8x128xf32>
    %91 = tpu.matmul %82, %17, %cst_51 {dimension_numbers = #tpu.dot_dimension_numbers<[1], [0], [0], [1], [0, 0, 1, 1], [], []>} : vector<8x128xf32>, vector<128x128xf32>, vector<8x128xf32> -> vector<8x128xf32>
    %92 = arith.addf %90, %91 : vector<8x128xf32>
    %93 = math.tanh %92 : vector<8x128xf32>
    %94 = tpu.concatenate %93, %87 in 1 : vector<8x128xf32>, vector<8x128xf32> -> vector<8x256xf32>
    %cst_52 = arith.constant dense<0.000000e+00> : vector<8x128xf32>
    %95 = tpu.matmul %94, %21, %cst_52 {dimension_numbers = #tpu.dot_dimension_numbers<[1], [0], [0], [1], [0, 0, 1, 1], [], []>} : vector<8x256xf32>, vector<256x128xf32>, vector<8x128xf32> -> vector<8x128xf32>
    %96 = vector.broadcast %19 : vector<1x128xf32> to vector<8x128xf32>
    %97 = arith.addf %95, %96 : vector<8x128xf32>
    %98 = math.tanh %97 : vector<8x128xf32>
    %c7_i32 = arith.constant 7 : i32
    %99 = arith.index_cast %c7_i32 : i32 to index
    %c0_53 = arith.constant 0 : index
    %c0_54 = arith.constant 0 : index
    %100 = vector.load %arg10[%99, %c0_53, %c0_54] : memref<8x8x128xf32, #tpu.memory_space<vmem>>, vector<1x8x128xf32>
    %101 = vector.shape_cast %100 : vector<1x8x128xf32> to vector<8x128xf32>
    %cst_55 = arith.constant dense<0.000000e+00> : vector<8x128xf32>
    %102 = tpu.matmul %93, %17, %cst_55 {dimension_numbers = #tpu.dot_dimension_numbers<[1], [0], [0], [1], [0, 0, 1, 1], [], []>} : vector<8x128xf32>, vector<128x128xf32>, vector<8x128xf32> -> vector<8x128xf32>
    %103 = arith.addf %101, %102 : vector<8x128xf32>
    %104 = math.tanh %103 : vector<8x128xf32>
    %105 = tpu.concatenate %104, %98 in 1 : vector<8x128xf32>, vector<8x128xf32> -> vector<8x256xf32>
    %cst_56 = arith.constant dense<0.000000e+00> : vector<8x128xf32>
    %106 = tpu.matmul %105, %21, %cst_56 {dimension_numbers = #tpu.dot_dimension_numbers<[1], [0], [0], [1], [0, 0, 1, 1], [], []>} : vector<8x256xf32>, vector<256x128xf32>, vector<8x128xf32> -> vector<8x128xf32>
    %107 = vector.broadcast %19 : vector<1x128xf32> to vector<8x128xf32>
    %108 = arith.addf %106, %107 : vector<8x128xf32>
    %109 = math.tanh %108 : vector<8x128xf32>
    %c8_i32 = arith.constant 8 : i32
    %c0_57 = arith.constant 0 : index
    %c0_58 = arith.constant 0 : index
    %c0_59 = arith.constant 0 : index
    %110 = vector.load %arg9[%c0_57, %c0_58, %c0_59] : memref<2x8x128xf32, #tpu.memory_space<vmem>>, vector<1x8x128xf32>
    %111 = vector.shape_cast %110 : vector<1x8x128xf32> to vector<8x128xf32>
    %112 = vector.shape_cast %104 : vector<8x128xf32> to vector<1x8x128xf32>
    tpu.vector_store %arg9[%c0_57, %c0_58, %c0_59], %112 {strides = array<i32>} : memref<2x8x128xf32, #tpu.memory_space<vmem>>, vector<1x8x128xf32>,
    %c1_60 = arith.constant 1 : index
    %c0_61 = arith.constant 0 : index
    %c0_62 = arith.constant 0 : index
    %113 = vector.load %arg9[%c1_60, %c0_61, %c0_62] : memref<2x8x128xf32, #tpu.memory_space<vmem>>, vector<1x8x128xf32>
    %114 = vector.shape_cast %113 : vector<1x8x128xf32> to vector<8x128xf32>
    %115 = vector.shape_cast %109 : vector<8x128xf32> to vector<1x8x128xf32>
    tpu.vector_store %arg9[%c1_60, %c0_61, %c0_62], %115 {strides = array<i32>} : memref<2x8x128xf32, #tpu.memory_space<vmem>>, vector<1x8x128xf32>,
    %c0_i32_63 = arith.constant 0 : i32
    %116 = arith.cmpi eq, %arg0, %c0_i32_63 : i32
    %117 = arith.extui %116 : i1 to i32
    %c0_i32_64 = arith.constant 0 : i32
    %118 = arith.cmpi ne, %117, %c0_i32_64 : i32
    scf.if %118 {
      %c0_65 = arith.constant 0 : index
      %c0_66 = arith.constant 0 : index
      %119 = vector.load %arg6[%c0_65, %c0_66] : memref<128x128xf32, #tpu.memory_space<vmem>>, vector<128x128xf32>
      %cst_67 = arith.constant dense<0.000000e+00> : vector<8x128xf32>
      %120 = tpu.matmul %109, %119, %cst_67 {dimension_numbers = #tpu.dot_dimension_numbers<[1], [0], [0], [1], [0, 0, 1, 1], [], []>} : vector<8x128xf32>, vector<128x128xf32>, vector<8x128xf32> -> vector<8x128xf32>
      %c0_68 = arith.constant 0 : index
      %c0_69 = arith.constant 0 : index
      %121 = vector.load %arg7[%c0_68, %c0_69] : memref<1x128xf32, #tpu.memory_space<vmem>>, vector<1x128xf32>
      %122 = vector.broadcast %121 : vector<1x128xf32> to vector<8x128xf32>
      %123 = arith.addf %120, %122 : vector<8x128xf32>
      %c0_70 = arith.constant 0 : index
      %c0_71 = arith.constant 0 : index
      %124 = vector.load %arg8[%c0_70, %c0_71] : memref<8x128xf32, #tpu.memory_space<vmem>>, vector<8x128xf32>
      tpu.vector_store %arg8[%c0_70, %c0_71], %123 {strides = array<i32>} : memref<8x128xf32, #tpu.memory_space<vmem>>, vector<8x128xf32>,
    } else {
    }
    return
  }
  func.func @transform_0(%arg0: i32) -> (i32, i32, i32) {
    %c0_i32 = arith.constant 0 : i32
    %c0_i32_0 = arith.constant 0 : i32
    %c0_i32_1 = arith.constant 0 : i32
    return %arg0, %c0_i32, %c0_i32_0 : i32, i32, i32
  }
  func.func @transform_1(%arg0: i32) -> (i32, i32) {
    %c0_i32 = arith.constant 0 : i32
    %c0_i32_0 = arith.constant 0 : i32
    %c0_i32_1 = arith.constant 0 : i32
    return %c0_i32, %c0_i32_0 : i32, i32
  }
  func.func @transform_2(%arg0: i32) -> (i32, i32) {
    %c0_i32 = arith.constant 0 : i32
    %c0_i32_0 = arith.constant 0 : i32
    %c0_i32_1 = arith.constant 0 : i32
    return %c0_i32, %c0_i32_0 : i32, i32
  }
  func.func @transform_3(%arg0: i32) -> (i32, i32, i32) {
    %c0_i32 = arith.constant 0 : i32
    %c0_i32_0 = arith.constant 0 : i32
    %c0_i32_1 = arith.constant 0 : i32
    %c0_i32_2 = arith.constant 0 : i32
    return %c0_i32, %c0_i32_0, %c0_i32_1 : i32, i32, i32
  }
  func.func @transform_4(%arg0: i32) -> (i32, i32, i32) {
    %c0_i32 = arith.constant 0 : i32
    %c0_i32_0 = arith.constant 0 : i32
    %c0_i32_1 = arith.constant 0 : i32
    %c0_i32_2 = arith.constant 0 : i32
    return %c0_i32, %c0_i32_0, %c0_i32_1 : i32, i32, i32
  }
  func.func @transform_5(%arg0: i32) -> (i32, i32) {
    %c0_i32 = arith.constant 0 : i32
    %c0_i32_0 = arith.constant 0 : i32
    %c0_i32_1 = arith.constant 0 : i32
    return %c0_i32, %c0_i32_0 : i32, i32
  }
  func.func @transform_6(%arg0: i32) -> (i32, i32) {
    %c0_i32 = arith.constant 0 : i32
    %c0_i32_0 = arith.constant 0 : i32
    %c0_i32_1 = arith.constant 0 : i32
    return %c0_i32, %c0_i32_0 : i32, i32
  }
  func.func @transform_7(%arg0: i32) -> (i32, i32) {
    %c0_i32 = arith.constant 0 : i32
    %c0_i32_0 = arith.constant 0 : i32
    %c0_i32_1 = arith.constant 0 : i32
    return %c0_i32, %c0_i32_0 : i32, i32
  }
}

module attributes {stable_mosaic.version = 11 : i64} {
  func.func @_deep_rnn_kernel(%arg0: i32, %arg1: memref<8x8x128xf32, #tpu.memory_space<vmem>>, %arg2: memref<128x128xf32, #tpu.memory_space<vmem>>, %arg3: memref<128x128xf32, #tpu.memory_space<vmem>>, %arg4: memref<1x256x128xf32, #tpu.memory_space<vmem>>, %arg5: memref<2x1x128xf32, #tpu.memory_space<vmem>>, %arg6: memref<128x128xf32, #tpu.memory_space<vmem>>, %arg7: memref<1x128xf32, #tpu.memory_space<vmem>>, %arg8: memref<8x128xf32, #tpu.memory_space<vmem>>, %arg9: memref<2x8x128xf32, #tpu.memory_space<vmem>>, %arg10: memref<8x8x128xf32, #tpu.memory_space<vmem>>) attributes {dimension_semantics = [#tpu.dimension_semantics<arbitrary>], iteration_bounds = array<i64: 1>, scalar_prefetch = 0 : i64, scratch_operands = 2 : i64, tpu.core_type = #tpu.core_type<tc>, window_params = [{transform_indices = @transform_0, window_bounds = array<i64: 8, 8, 128>}, {pipeline_mode = #tpu.pipeline_mode<synchronous>, transform_indices = @transform_1, window_bounds = array<i64: 128, 128>}, {pipeline_mode = #tpu.pipeline_mode<synchronous>, transform_indices = @transform_2, window_bounds = array<i64: 128, 128>}, {pipeline_mode = #tpu.pipeline_mode<synchronous>, transform_indices = @transform_3, window_bounds = array<i64: 1, 256, 128>}, {pipeline_mode = #tpu.pipeline_mode<synchronous>, transform_indices = @transform_4, window_bounds = array<i64: 2, 1, 128>}, {pipeline_mode = #tpu.pipeline_mode<synchronous>, transform_indices = @transform_5, window_bounds = array<i64: 128, 128>}, {pipeline_mode = #tpu.pipeline_mode<synchronous>, transform_indices = @transform_6, window_bounds = array<i64: 1, 128>}, {pipeline_mode = #tpu.pipeline_mode<synchronous>, transform_indices = @transform_7, window_bounds = array<i64: 8, 128>}]} {
    %c0_i32 = arith.constant 0 : i32
    %0 = arith.cmpi eq, %arg0, %c0_i32 : i32
    %1 = arith.extui %0 : i1 to i32
    %c0_i32_0 = arith.constant 0 : i32
    %2 = arith.cmpi ne, %1, %c0_i32_0 : i32
    scf.if %2 {
      %cst_65 = arith.constant 0.000000e+00 : f32
      %119 = vector.broadcast %cst_65 : f32 to vector<2x8x128xf32>
      %c0_66 = arith.constant 0 : index
      %c0_67 = arith.constant 0 : index
      %c0_68 = arith.constant 0 : index
      %120 = vector.load %arg9[%c0_66, %c0_67, %c0_68] : memref<2x8x128xf32, #tpu.memory_space<vmem>>, vector<2x8x128xf32>
      tpu.vector_store %arg9[%c0_66, %c0_67, %c0_68], %119 {strides = array<i32>} : memref<2x8x128xf32, #tpu.memory_space<vmem>>, vector<2x8x128xf32>,
    } else {
    }
    %c0 = arith.constant 0 : index
    %c0_1 = arith.constant 0 : index
    %c0_2 = arith.constant 0 : index
    %3 = vector.load %arg1[%c0, %c0_1, %c0_2] : memref<8x8x128xf32, #tpu.memory_space<vmem>>, vector<8x8x128xf32>
    %4 = vector.shape_cast %3 : vector<8x8x128xf32> to vector<64x128xf32>
    %c0_3 = arith.constant 0 : index
    %c0_4 = arith.constant 0 : index
    %5 = vector.load %arg2[%c0_3, %c0_4] : memref<128x128xf32, #tpu.memory_space<vmem>>, vector<128x128xf32>
    %cst = arith.constant dense<0.000000e+00> : vector<64x128xf32>
    %6 = tpu.matmul %4, %5, %cst {dimension_numbers = #tpu.dot_dimension_numbers<[1], [0], [0], [1], [0, 0, 1, 1], [], []>} : vector<64x128xf32>, vector<128x128xf32>, vector<64x128xf32> -> vector<64x128xf32>
    %c0_5 = arith.constant 0 : index
    %c0_6 = arith.constant 0 : index
    %c0_7 = arith.constant 0 : index
    %7 = vector.load %arg5[%c0_5, %c0_6, %c0_7] : memref<2x1x128xf32, #tpu.memory_space<vmem>>, vector<1x1x128xf32>
    %8 = vector.shape_cast %7 : vector<1x1x128xf32> to vector<1x128xf32>
    %9 = vector.broadcast %8 : vector<1x128xf32> to vector<64x128xf32>
    %10 = arith.addf %6, %9 : vector<64x128xf32>
    %11 = vector.shape_cast %10 : vector<64x128xf32> to vector<8x8x128xf32>
    %c0_8 = arith.constant 0 : index
    %c0_9 = arith.constant 0 : index
    %c0_10 = arith.constant 0 : index
    %12 = vector.load %arg10[%c0_8, %c0_9, %c0_10] : memref<8x8x128xf32, #tpu.memory_space<vmem>>, vector<8x8x128xf32>
    tpu.vector_store %arg10[%c0_8, %c0_9, %c0_10], %11 {strides = array<i32>} : memref<8x8x128xf32, #tpu.memory_space<vmem>>, vector<8x8x128xf32>,
    %c0_11 = arith.constant 0 : index
    %c0_12 = arith.constant 0 : index
    %c0_13 = arith.constant 0 : index
    %13 = vector.load %arg9[%c0_11, %c0_12, %c0_13] : memref<2x8x128xf32, #tpu.memory_space<vmem>>, vector<1x8x128xf32>
    %14 = vector.shape_cast %13 : vector<1x8x128xf32> to vector<8x128xf32>
    %c1 = arith.constant 1 : index
    %c0_14 = arith.constant 0 : index
    %c0_15 = arith.constant 0 : index
    %15 = vector.load %arg9[%c1, %c0_14, %c0_15] : memref<2x8x128xf32, #tpu.memory_space<vmem>>, vector<1x8x128xf32>
    %16 = vector.shape_cast %15 : vector<1x8x128xf32> to vector<8x128xf32>
    %c0_16 = arith.constant 0 : index
    %c0_17 = arith.constant 0 : index
    %17 = vector.load %arg3[%c0_16, %c0_17] : memref<128x128xf32, #tpu.memory_space<vmem>>, vector<128x128xf32>
    %c1_18 = arith.constant 1 : index
    %c0_19 = arith.constant 0 : index
    %c0_20 = arith.constant 0 : index
    %18 = vector.load %arg5[%c1_18, %c0_19, %c0_20] : memref<2x1x128xf32, #tpu.memory_space<vmem>>, vector<1x1x128xf32>
    %19 = vector.shape_cast %18 : vector<1x1x128xf32> to vector<1x128xf32>
    %c0_21 = arith.constant 0 : index
    %c0_22 = arith.constant 0 : index
    %c0_23 = arith.constant 0 : index
    %20 = vector.load %arg4[%c0_21, %c0_22, %c0_23] : memref<1x256x128xf32, #tpu.memory_space<vmem>>, vector<1x256x128xf32>
    %21 = vector.shape_cast %20 : vector<1x256x128xf32> to vector<256x128xf32>
    %c0_i32_24 = arith.constant 0 : i32
    %22 = arith.index_cast %c0_i32_24 : i32 to index
    %c0_25 = arith.constant 0 : index
    %c0_26 = arith.constant 0 : index
    %23 = vector.load %arg10[%22, %c0_25, %c0_26] : memref<8x8x128xf32, #tpu.memory_space<vmem>>, vector<1x8x128xf32>
    %24 = vector.shape_cast %23 : vector<1x8x128xf32> to vector<8x128xf32>
    %cst_27 = arith.constant dense<0.000000e+00> : vector<8x128xf32>
    %25 = tpu.matmul %14, %17, %cst_27 {dimension_numbers = #tpu.dot_dimension_numbers<[1], [0], [0], [1], [0, 0, 1, 1], [], []>} : vector<8x128xf32>, vector<128x128xf32>, vector<8x128xf32> -> vector<8x128xf32>
    %26 = arith.addf %24, %25 : vector<8x128xf32>
    %27 = math.tanh %26 : vector<8x128xf32>
    %28 = tpu.concatenate %27, %16 in 1 : vector<8x128xf32>, vector<8x128xf32> -> vector<8x256xf32>
    %cst_28 = arith.constant dense<0.000000e+00> : vector<8x128xf32>
    %29 = tpu.matmul %28, %21, %cst_28 {dimension_numbers = #tpu.dot_dimension_numbers<[1], [0], [0], [1], [0, 0, 1, 1], [], []>} : vector<8x256xf32>, vector<256x128xf32>, vector<8x128xf32> -> vector<8x128xf32>
    %30 = vector.broadcast %19 : vector<1x128xf32> to vector<8x128xf32>
    %31 = arith.addf %29, %30 : vector<8x128xf32>
    %32 = math.tanh %31 : vector<8x128xf32>
    %c1_i32 = arith.constant 1 : i32
    %33 = arith.index_cast %c1_i32 : i32 to index
    %c0_29 = arith.constant 0 : index
    %c0_30 = arith.constant 0 : index
    %34 = vector.load %arg10[%33, %c0_29, %c0_30] : memref<8x8x128xf32, #tpu.memory_space<vmem>>, vector<1x8x128xf32>
    %35 = vector.shape_cast %34 : vector<1x8x128xf32> to vector<8x128xf32>
    %cst_31 = arith.constant dense<0.000000e+00> : vector<8x128xf32>
    %36 = tpu.matmul %27, %17, %cst_31 {dimension_numbers = #tpu.dot_dimension_numbers<[1], [0], [0], [1], [0, 0, 1, 1], [], []>} : vector<8x128xf32>, vector<128x128xf32>, vector<8x128xf32> -> vector<8x128xf32>
    %37 = arith.addf %35, %36 : vector<8x128xf32>
    %38 = math.tanh %37 : vector<8x128xf32>
    %39 = tpu.concatenate %38, %32 in 1 : vector<8x128xf32>, vector<8x128xf32> -> vector<8x256xf32>
    %cst_32 = arith.constant dense<0.000000e+00> : vector<8x128xf32>
    %40 = tpu.matmul %39, %21, %cst_32 {dimension_numbers = #tpu.dot_dimension_numbers<[1], [0], [0], [1], [0, 0, 1, 1], [], []>} : vector<8x256xf32>, vector<256x128xf32>, vector<8x128xf32> -> vector<8x128xf32>
    %41 = vector.broadcast %19 : vector<1x128xf32> to vector<8x128xf32>
    %42 = arith.addf %40, %41 : vector<8x128xf32>
    %43 = math.tanh %42 : vector<8x128xf32>
    %c2_i32 = arith.constant 2 : i32
    %44 = arith.index_cast %c2_i32 : i32 to index
    %c0_33 = arith.constant 0 : index
    %c0_34 = arith.constant 0 : index
    %45 = vector.load %arg10[%44, %c0_33, %c0_34] : memref<8x8x128xf32, #tpu.memory_space<vmem>>, vector<1x8x128xf32>
    %46 = vector.shape_cast %45 : vector<1x8x128xf32> to vector<8x128xf32>
    %cst_35 = arith.constant dense<0.000000e+00> : vector<8x128xf32>
    %47 = tpu.matmul %38, %17, %cst_35 {dimension_numbers = #tpu.dot_dimension_numbers<[1], [0], [0], [1], [0, 0, 1, 1], [], []>} : vector<8x128xf32>, vector<128x128xf32>, vector<8x128xf32> -> vector<8x128xf32>
    %48 = arith.addf %46, %47 : vector<8x128xf32>
    %49 = math.tanh %48 : vector<8x128xf32>
    %50 = tpu.concatenate %49, %43 in 1 : vector<8x128xf32>, vector<8x128xf32> -> vector<8x256xf32>
    %cst_36 = arith.constant dense<0.000000e+00> : vector<8x128xf32>
    %51 = tpu.matmul %50, %21, %cst_36 {dimension_numbers = #tpu.dot_dimension_numbers<[1], [0], [0], [1], [0, 0, 1, 1], [], []>} : vector<8x256xf32>, vector<256x128xf32>, vector<8x128xf32> -> vector<8x128xf32>
    %52 = vector.broadcast %19 : vector<1x128xf32> to vector<8x128xf32>
    %53 = arith.addf %51, %52 : vector<8x128xf32>
    %54 = math.tanh %53 : vector<8x128xf32>
    %c3_i32 = arith.constant 3 : i32
    %55 = arith.index_cast %c3_i32 : i32 to index
    %c0_37 = arith.constant 0 : index
    %c0_38 = arith.constant 0 : index
    %56 = vector.load %arg10[%55, %c0_37, %c0_38] : memref<8x8x128xf32, #tpu.memory_space<vmem>>, vector<1x8x128xf32>
    %57 = vector.shape_cast %56 : vector<1x8x128xf32> to vector<8x128xf32>
    %cst_39 = arith.constant dense<0.000000e+00> : vector<8x128xf32>
    %58 = tpu.matmul %49, %17, %cst_39 {dimension_numbers = #tpu.dot_dimension_numbers<[1], [0], [0], [1], [0, 0, 1, 1], [], []>} : vector<8x128xf32>, vector<128x128xf32>, vector<8x128xf32> -> vector<8x128xf32>
    %59 = arith.addf %57, %58 : vector<8x128xf32>
    %60 = math.tanh %59 : vector<8x128xf32>
    %61 = tpu.concatenate %60, %54 in 1 : vector<8x128xf32>, vector<8x128xf32> -> vector<8x256xf32>
    %cst_40 = arith.constant dense<0.000000e+00> : vector<8x128xf32>
    %62 = tpu.matmul %61, %21, %cst_40 {dimension_numbers = #tpu.dot_dimension_numbers<[1], [0], [0], [1], [0, 0, 1, 1], [], []>} : vector<8x256xf32>, vector<256x128xf32>, vector<8x128xf32> -> vector<8x128xf32>
    %63 = vector.broadcast %19 : vector<1x128xf32> to vector<8x128xf32>
    %64 = arith.addf %62, %63 : vector<8x128xf32>
    %65 = math.tanh %64 : vector<8x128xf32>
    %c4_i32 = arith.constant 4 : i32
    %66 = arith.index_cast %c4_i32 : i32 to index
    %c0_41 = arith.constant 0 : index
    %c0_42 = arith.constant 0 : index
    %67 = vector.load %arg10[%66, %c0_41, %c0_42] : memref<8x8x128xf32, #tpu.memory_space<vmem>>, vector<1x8x128xf32>
    %68 = vector.shape_cast %67 : vector<1x8x128xf32> to vector<8x128xf32>
    %cst_43 = arith.constant dense<0.000000e+00> : vector<8x128xf32>
    %69 = tpu.matmul %60, %17, %cst_43 {dimension_numbers = #tpu.dot_dimension_numbers<[1], [0], [0], [1], [0, 0, 1, 1], [], []>} : vector<8x128xf32>, vector<128x128xf32>, vector<8x128xf32> -> vector<8x128xf32>
    %70 = arith.addf %68, %69 : vector<8x128xf32>
    %71 = math.tanh %70 : vector<8x128xf32>
    %72 = tpu.concatenate %71, %65 in 1 : vector<8x128xf32>, vector<8x128xf32> -> vector<8x256xf32>
    %cst_44 = arith.constant dense<0.000000e+00> : vector<8x128xf32>
    %73 = tpu.matmul %72, %21, %cst_44 {dimension_numbers = #tpu.dot_dimension_numbers<[1], [0], [0], [1], [0, 0, 1, 1], [], []>} : vector<8x256xf32>, vector<256x128xf32>, vector<8x128xf32> -> vector<8x128xf32>
    %74 = vector.broadcast %19 : vector<1x128xf32> to vector<8x128xf32>
    %75 = arith.addf %73, %74 : vector<8x128xf32>
    %76 = math.tanh %75 : vector<8x128xf32>
    %c5_i32 = arith.constant 5 : i32
    %77 = arith.index_cast %c5_i32 : i32 to index
    %c0_45 = arith.constant 0 : index
    %c0_46 = arith.constant 0 : index
    %78 = vector.load %arg10[%77, %c0_45, %c0_46] : memref<8x8x128xf32, #tpu.memory_space<vmem>>, vector<1x8x128xf32>
    %79 = vector.shape_cast %78 : vector<1x8x128xf32> to vector<8x128xf32>
    %cst_47 = arith.constant dense<0.000000e+00> : vector<8x128xf32>
    %80 = tpu.matmul %71, %17, %cst_47 {dimension_numbers = #tpu.dot_dimension_numbers<[1], [0], [0], [1], [0, 0, 1, 1], [], []>} : vector<8x128xf32>, vector<128x128xf32>, vector<8x128xf32> -> vector<8x128xf32>
    %81 = arith.addf %79, %80 : vector<8x128xf32>
    %82 = math.tanh %81 : vector<8x128xf32>
    %83 = tpu.concatenate %82, %76 in 1 : vector<8x128xf32>, vector<8x128xf32> -> vector<8x256xf32>
    %cst_48 = arith.constant dense<0.000000e+00> : vector<8x128xf32>
    %84 = tpu.matmul %83, %21, %cst_48 {dimension_numbers = #tpu.dot_dimension_numbers<[1], [0], [0], [1], [0, 0, 1, 1], [], []>} : vector<8x256xf32>, vector<256x128xf32>, vector<8x128xf32> -> vector<8x128xf32>
    %85 = vector.broadcast %19 : vector<1x128xf32> to vector<8x128xf32>
    %86 = arith.addf %84, %85 : vector<8x128xf32>
    %87 = math.tanh %86 : vector<8x128xf32>
    %c6_i32 = arith.constant 6 : i32
    %88 = arith.index_cast %c6_i32 : i32 to index
    %c0_49 = arith.constant 0 : index
    %c0_50 = arith.constant 0 : index
    %89 = vector.load %arg10[%88, %c0_49, %c0_50] : memref<8x8x128xf32, #tpu.memory_space<vmem>>, vector<1x8x128xf32>
    %90 = vector.shape_cast %89 : vector<1x8x128xf32> to vector<8x128xf32>
    %cst_51 = arith.constant dense<0.000000e+00> : vector<8x128xf32>
    %91 = tpu.matmul %82, %17, %cst_51 {dimension_numbers = #tpu.dot_dimension_numbers<[1], [0], [0], [1], [0, 0, 1, 1], [], []>} : vector<8x128xf32>, vector<128x128xf32>, vector<8x128xf32> -> vector<8x128xf32>
    %92 = arith.addf %90, %91 : vector<8x128xf32>
    %93 = math.tanh %92 : vector<8x128xf32>
    %94 = tpu.concatenate %93, %87 in 1 : vector<8x128xf32>, vector<8x128xf32> -> vector<8x256xf32>
    %cst_52 = arith.constant dense<0.000000e+00> : vector<8x128xf32>
    %95 = tpu.matmul %94, %21, %cst_52 {dimension_numbers = #tpu.dot_dimension_numbers<[1], [0], [0], [1], [0, 0, 1, 1], [], []>} : vector<8x256xf32>, vector<256x128xf32>, vector<8x128xf32> -> vector<8x128xf32>
    %96 = vector.broadcast %19 : vector<1x128xf32> to vector<8x128xf32>
    %97 = arith.addf %95, %96 : vector<8x128xf32>
    %98 = math.tanh %97 : vector<8x128xf32>
    %c7_i32 = arith.constant 7 : i32
    %99 = arith.index_cast %c7_i32 : i32 to index
    %c0_53 = arith.constant 0 : index
    %c0_54 = arith.constant 0 : index
    %100 = vector.load %arg10[%99, %c0_53, %c0_54] : memref<8x8x128xf32, #tpu.memory_space<vmem>>, vector<1x8x128xf32>
    %101 = vector.shape_cast %100 : vector<1x8x128xf32> to vector<8x128xf32>
    %cst_55 = arith.constant dense<0.000000e+00> : vector<8x128xf32>
    %102 = tpu.matmul %93, %17, %cst_55 {dimension_numbers = #tpu.dot_dimension_numbers<[1], [0], [0], [1], [0, 0, 1, 1], [], []>} : vector<8x128xf32>, vector<128x128xf32>, vector<8x128xf32> -> vector<8x128xf32>
    %103 = arith.addf %101, %102 : vector<8x128xf32>
    %104 = math.tanh %103 : vector<8x128xf32>
    %105 = tpu.concatenate %104, %98 in 1 : vector<8x128xf32>, vector<8x128xf32> -> vector<8x256xf32>
    %cst_56 = arith.constant dense<0.000000e+00> : vector<8x128xf32>
    %106 = tpu.matmul %105, %21, %cst_56 {dimension_numbers = #tpu.dot_dimension_numbers<[1], [0], [0], [1], [0, 0, 1, 1], [], []>} : vector<8x256xf32>, vector<256x128xf32>, vector<8x128xf32> -> vector<8x128xf32>
    %107 = vector.broadcast %19 : vector<1x128xf32> to vector<8x128xf32>
    %108 = arith.addf %106, %107 : vector<8x128xf32>
    %109 = math.tanh %108 : vector<8x128xf32>
    %c8_i32 = arith.constant 8 : i32
    %c0_57 = arith.constant 0 : index
    %c0_58 = arith.constant 0 : index
    %c0_59 = arith.constant 0 : index
    %110 = vector.load %arg9[%c0_57, %c0_58, %c0_59] : memref<2x8x128xf32, #tpu.memory_space<vmem>>, vector<1x8x128xf32>
    %111 = vector.shape_cast %110 : vector<1x8x128xf32> to vector<8x128xf32>
    %112 = vector.shape_cast %104 : vector<8x128xf32> to vector<1x8x128xf32>
    tpu.vector_store %arg9[%c0_57, %c0_58, %c0_59], %112 {strides = array<i32>} : memref<2x8x128xf32, #tpu.memory_space<vmem>>, vector<1x8x128xf32>,
    %c1_60 = arith.constant 1 : index
    %c0_61 = arith.constant 0 : index
    %c0_62 = arith.constant 0 : index
    %113 = vector.load %arg9[%c1_60, %c0_61, %c0_62] : memref<2x8x128xf32, #tpu.memory_space<vmem>>, vector<1x8x128xf32>
    %114 = vector.shape_cast %113 : vector<1x8x128xf32> to vector<8x128xf32>
    %115 = vector.shape_cast %109 : vector<8x128xf32> to vector<1x8x128xf32>
    tpu.vector_store %arg9[%c1_60, %c0_61, %c0_62], %115 {strides = array<i32>} : memref<2x8x128xf32, #tpu.memory_space<vmem>>, vector<1x8x128xf32>,
    %c0_i32_63 = arith.constant 0 : i32
    %116 = arith.cmpi eq, %arg0, %c0_i32_63 : i32
    %117 = arith.extui %116 : i1 to i32
    %c0_i32_64 = arith.constant 0 : i32
    %118 = arith.cmpi ne, %117, %c0_i32_64 : i32
    scf.if %118 {
      %c0_65 = arith.constant 0 : index
      %c0_66 = arith.constant 0 : index
      %119 = vector.load %arg6[%c0_65, %c0_66] : memref<128x128xf32, #tpu.memory_space<vmem>>, vector<128x128xf32>
      %cst_67 = arith.constant dense<0.000000e+00> : vector<8x128xf32>
      %120 = tpu.matmul %109, %119, %cst_67 {dimension_numbers = #tpu.dot_dimension_numbers<[1], [0], [0], [1], [0, 0, 1, 1], [], []>} : vector<8x128xf32>, vector<128x128xf32>, vector<8x128xf32> -> vector<8x128xf32>
      %c0_68 = arith.constant 0 : index
      %c0_69 = arith.constant 0 : index
      %121 = vector.load %arg7[%c0_68, %c0_69] : memref<1x128xf32, #tpu.memory_space<vmem>>, vector<1x128xf32>
      %122 = vector.broadcast %121 : vector<1x128xf32> to vector<8x128xf32>
      %123 = arith.addf %120, %122 : vector<8x128xf32>
      %c0_70 = arith.constant 0 : index
      %c0_71 = arith.constant 0 : index
      %124 = vector.load %arg8[%c0_70, %c0_71] : memref<8x128xf32, #tpu.memory_space<vmem>>, vector<8x128xf32>
      tpu.vector_store %arg8[%c0_70, %c0_71], %123 {strides = array<i32>} : memref<8x128xf32, #tpu.memory_space<vmem>>, vector<8x128xf32>,
    } else {
    }
    return
  }
  func.func @transform_0(%arg0: i32) -> (i32, i32, i32) {
    %c0_i32 = arith.constant 0 : i32
    %c0_i32_0 = arith.constant 0 : i32
    %c0_i32_1 = arith.constant 0 : i32
    return %arg0, %c0_i32, %c0_i32_0 : i32, i32, i32
  }
  func.func @transform_1(%arg0: i32) -> (i32, i32) {
    %c0_i32 = arith.constant 0 : i32
    %c0_i32_0 = arith.constant 0 : i32
    %c0_i32_1 = arith.constant 0 : i32
    return %c0_i32, %c0_i32_0 : i32, i32
  }
  func.func @transform_2(%arg0: i32) -> (i32, i32) {
    %c0_i32 = arith.constant 0 : i32
    %c0_i32_0 = arith.constant 0 : i32
    %c0_i32_1 = arith.constant 0 : i32
    return %c0_i32, %c0_i32_0 : i32, i32
  }
  func.func @transform_3(%arg0: i32) -> (i32, i32, i32) {
    %c0_i32 = arith.constant 0 : i32
    %c0_i32_0 = arith.constant 0 : i32
    %c0_i32_1 = arith.constant 0 : i32
    %c0_i32_2 = arith.constant 0 : i32
    return %c0_i32, %c0_i32_0, %c0_i32_1 : i32, i32, i32
  }
  func.func @transform_4(%arg0: i32) -> (i32, i32, i32) {
    %c0_i32 = arith.constant 0 : i32
    %c0_i32_0 = arith.constant 0 : i32
    %c0_i32_1 = arith.constant 0 : i32
    %c0_i32_2 = arith.constant 0 : i32
    return %c0_i32, %c0_i32_0, %c0_i32_1 : i32, i32, i32
  }
  func.func @transform_5(%arg0: i32) -> (i32, i32) {
    %c0_i32 = arith.constant 0 : i32
    %c0_i32_0 = arith.constant 0 : i32
    %c0_i32_1 = arith.constant 0 : i32
    return %c0_i32, %c0_i32_0 : i32, i32
  }
  func.func @transform_6(%arg0: i32) -> (i32, i32) {
    %c0_i32 = arith.constant 0 : i32
    %c0_i32_0 = arith.constant 0 : i32
    %c0_i32_1 = arith.constant 0 : i32
    return %c0_i32, %c0_i32_0 : i32, i32
  }
  func.func @transform_7(%arg0: i32) -> (i32, i32) {
    %c0_i32 = arith.constant 0 : i32
    %c0_i32_0 = arith.constant 0 : i32
    %c0_i32_1 = arith.constant 0 : i32
    return %c0_i32, %c0_i32_0 : i32, i32
  }
}

</mosaic_0001>

<bundles_post_ra>
// kernel: tpu_custom_call.1
= control target key start
LH: loop header
LB: loop body
LE: loop exit
PB: predicated region body
PF: predicated region fallthrough
CT: control target
= control target key end

     0   :  { %12 = vsyncpa [#allocation5], 0  ;;  %s3388_s0 = inlined_call_operand.hbm [shape: f32[8,8,128], index: 0, kind: input, shape index: {}]   ;;  %s3389_s1 = inlined_call_operand.hbm [shape: f32[128,128], index: 1, kind: input, shape index: {}]   ;;  %s3390_s2 = inlined_call_operand.hbm [shape: f32[128,128], index: 2, kind: input, shape index: {}]   ;;  %s3391_s3 = inlined_call_operand.hbm [shape: f32[1,256,128], index: 3, kind: input, shape index: {}]   ;;  %s3392_s4 = inlined_call_operand.vmem [shape: f32[2,1,128], index: 4, kind: input, shape index: {}]   ;;  %s3393_s5 = inlined_call_operand.hbm [shape: f32[128,128], index: 5, kind: input, shape index: {}]   ;;  %s3394_s6 = inlined_call_operand.vmem [shape: f32[1,128], index: 6, kind: input, shape index: {}]   ;;  %s3395_s7 = inlined_call_operand.hbm [shape: f32[8,128], index: 7, kind: output, shape index: {}]  }
   0x1   :  { %13 = vsyncpa [#allocation8], 0 }
   0x2   :  { %14 = vsyncpa [#allocation11], 0 }
   0x3   :  { %15 = vsyncpa [#allocation6], 0  ;;  %s2618_s24 = smov [#allocation7]   ;;  %s2619_s26 = smov [#allocation10]  }
   0x4   :  { %s33_s25 = sshll.u32 %s2618_s24, 4  ;;  %s57_s27 = sshll.u32 %s2619_s26, 4  ;;  %s34_s25 = int_to_ptr.vmem [resolvable:$true] %s33_s25  ;;  %s58_s27 = int_to_ptr.vmem [resolvable:$true] %s57_s27 }
   0x5   :  { %s2498_s28 = scalar_lea.vmem %s34_s25, 2048  ;;  %p2503_p1 = scmp.lt.s32.totalorder %s34_s25, %s34_s25 }
   0x6   :  { %p2499_p0 = scmp.ne.s32.totalorder %s34_s25, %s2498_s28  ;;  %p2504_p2 = scmp.lt.s32.totalorder %s2498_s28, %s2498_s28 }
   0x8   :  { %p2505_p3 = por %p2504_p2, %p2503_p1 }
   0xa   :  { %p2506_p4 = pnand %p2505_p3, %p2499_p0 }
   0xc   :  { %2509 = shalt.err (!%p2506_p4)
}
   0xd   :  { %s2620_s29 = smov 128   ;;  %s2621_s30 = smov 8  }
   0xe   :  { %39 = dma.hbm_to_vmem [thread:$0]  %s3389_s1, 2048, %s34_s25, [#allocation8], %s2620_s29, %s2620_s29, %s2621_s30  }
   0xf   :  { %s2518_s10 = scalar_lea.vmem %s58_s27, 4096  ;;  %p2523_p6 = scmp.lt.s32.totalorder %s58_s27, %s58_s27 }
  0x10   :  { %p2519_p5 = scmp.ne.s32.totalorder %s58_s27, %s2518_s10  ;;  %p2524_p7 = scmp.lt.s32.totalorder %s2518_s10, %s2518_s10 }
  0x12   :  { %p2525_p8 = por %p2524_p7, %p2523_p6 }
  0x14   :  { %p2526_p9 = pnand %p2525_p8, %p2519_p5 }
  0x16   :  { %2529 = shalt.err (!%p2526_p9)
}
  0x17   :  { %63 = dma.hbm_to_vmem [thread:$0]  %s3391_s3, 4096, %s58_s27, [#allocation11], %s2620_s29, %s2620_s29, %s2621_s30  }
  0x18   :  { %s2622_s13 = smov [#allocation4]   ;;  %s2623_s15 = smov [#allocation9]  }
  0x19   :  { %s21_s14 = sshll.u32 %s2622_s13, 4  ;;  %s45_s16 = sshll.u32 %s2623_s15, 4  ;;  %s22_s14 = int_to_ptr.vmem [resolvable:$true] %s21_s14  ;;  %s46_s16 = int_to_ptr.vmem [resolvable:$true] %s45_s16 }
  0x1a   :  { %s2538_s1 = scalar_lea.vmem %s22_s14, 1024  ;;  %p2543_p11 = scmp.lt.s32.totalorder %s22_s14, %s22_s14 }
  0x1b   :  { %p2539_p10 = scmp.ne.s32.totalorder %s22_s14, %s2538_s1  ;;  %p2544_p12 = scmp.lt.s32.totalorder %s2538_s1, %s2538_s1 }
  0x1d   :  { %p2545_p13 = por %p2544_p12, %p2543_p11 }
  0x1f   :  { %p2546_p0 = pnand %p2545_p13, %p2539_p10 }
  0x21   :  { %2549 = shalt.err (!%p2546_p0)
}
  0x22   :  { %27 = dma.hbm_to_vmem [thread:$0]  %s3388_s0, 1024, %s22_s14, [#allocation5], %s2620_s29, %s2620_s29, %s2621_s30  }
  0x23   :  { %s2558_s3 = scalar_lea.vmem %s46_s16, 2048  ;;  %p2563_p2 = scmp.lt.s32.totalorder %s46_s16, %s46_s16 }
  0x24   :  { %p2559_p1 = scmp.ne.s32.totalorder %s46_s16, %s2558_s3  ;;  %p2564_p3 = scmp.lt.s32.totalorder %s2558_s3, %s2558_s3 }
  0x26   :  { %p2565_p4 = por %p2564_p3, %p2563_p2 }
  0x28   :  { %p2566_p5 = pnand %p2565_p4, %p2559_p1 }
  0x2a   :  { %2569 = shalt.err (!%p2566_p5)
}
  0x2b   :  { %51 = dma.hbm_to_vmem [thread:$0]  %s3390_s2, 2048, %s46_s16, [#allocation8], %s2620_s29, %s2620_s29, %s2621_s30  }
  0x2c   :  { %s2624_s21 = smov [#allocation12]  }
  0x2d   :  { %s71_s22 = sshll.u32 %s2624_s21, 4  ;;  %s72_s22 = int_to_ptr.vmem [resolvable:$true] %s71_s22 }
  0x2e   :  { %s2578_s23 = scalar_lea.vmem %s72_s22, 2048  ;;  %p2583_p7 = scmp.lt.s32.totalorder %s72_s22, %s72_s22 }
  0x2f   :  { %p2579_p6 = scmp.ne.s32.totalorder %s72_s22, %s2578_s23  ;;  %p2584_p8 = scmp.lt.s32.totalorder %s2578_s23, %s2578_s23 }
  0x31   :  { %p2585_p9 = por %p2584_p8, %p2583_p7 }
  0x33   :  { %p2586_p10 = pnand %p2585_p9, %p2579_p6 }
  0x35   :  { %2589 = shalt.err (!%p2586_p10)
}
  0x36   :  { %77 = dma.hbm_to_vmem [thread:$0]  %s3393_s5, 2048, %s72_s22, [#allocation11], %s2620_s29, %s2620_s29, %s2621_s30  }
  0x37   :  { %2610 = dma.done.wait [#allocation5], 1024  }
  0x38   :  { %2611 = vsyncadd [#allocation5], 4294966272 }
  0x39   :  { %2612 = dma.done.wait [#allocation8], 4096  }
  0x3a   :  { %2613 = vsyncadd [#allocation8], 4294963200 }
  0x3b   :  { %2614 = dma.done.wait [#allocation11], 6144  }
  0x3c   :  { %2615 = vsyncadd [#allocation11], 4294961152  ;;  %v3396_v0 = vmov 0.0   ;;  %vm2626_vm0 = vmmov 0   ;;  %v124_v1 = vld [vmem:[#allocation7 + $0x78] sm:$0xff]  ;;  %v123_v2 = vld [vmem:[#allocation7 + $0x70] sm:$0xff] }
  0x3d   :  { %2084 = vmatprep.subr.mxu1 %v3396_v0  ;;  %2116 = vmatprep.mubr.msk.f32.mxu1 %vm2626_vm0, %v3396_v0  ;;  %v2701_v3 = vld [vmem:[#allocation9 + $0x78] sm:$0xff]  ;;  %v2704_v4 = vld [vmem:[#allocation9 + $0x70] sm:$0xff]  ;;  %v122_v5 = vld [vmem:[#allocation7 + $0x68] sm:$0xff]  ;;  %s2627_s30 = smov [#allocation13]  }
  0x3e   :  { %2040 = vmatprep.subr.mxu0 %v124_v1  ;;  %2085 = vmatpush3.msra.mxu1 %v2701_v3  ;;  %v2707_v6 = vld [vmem:[#allocation9 + $0x68] sm:$0xff]  ;;  %v121_v7 = vld [vmem:[#allocation7 + $0x60] sm:$0xff]  ;;  %v120_v9 = vld [vmem:[#allocation7 + $0x58] sm:$0xff]  ;;  %s1568_s8 = sshll.u32 %s2627_s30, 4  ;;  %s1569_s8 = int_to_ptr.vmem [resolvable:$true] %s1568_s8 }
  0x3f   :  { %2041 = vmatpush3.msra.mxu0 %v124_v1  ;;  %2086 = vmatprep.subr.mxu1 %v3396_v0  ;;  %v2711_v8 = vld [vmem:[#allocation9 + $0x60] sm:$0xff]  ;;  %v2715_v10 = vld [vmem:[#allocation9 + $0x58] sm:$0xff]  ;;  %v119_v11 = vld [vmem:[#allocation7 + $0x50] sm:$0xff]  ;;  %s2590_s9 = scalar_lea.vmem %s1569_s8, 128  ;;  %p2595_p12 = scmp.lt.s32.totalorder %s1569_s8, %s1569_s8 }
  0x40   :  { %2042 = vmatprep.subr.mxu0 %v123_v2  ;;  %2087 = vmatpush3.msra.mxu1 %v2704_v4  ;;  %v2719_v12 = vld [vmem:[#allocation9 + $0x50] sm:$0xff]  ;;  %v118_v13 = vld [vmem:[#allocation7 + $0x48] sm:$0xff]  ;;  %v117_v15 = vld [vmem:[#allocation7 + $0x40] sm:$0xff]  ;;  %p2591_p11 = scmp.ne.s32.totalorder %s1569_s8, %s2590_s9  ;;  %p2596_p13 = scmp.lt.s32.totalorder %s2590_s9, %s2590_s9 }
  0x41   :  { %2043 = vmatpush3.msra.mxu0 %v123_v2  ;;  %2088 = vmatprep.subr.mxu1 %v3396_v0  ;;  %v2723_v14 = vld [vmem:[#allocation9 + $0x48] sm:$0xff]  ;;  %v2727_v16 = vld [vmem:[#allocation9 + $0x40] sm:$0xff]  ;;  %v116_v17 = vld [vmem:[#allocation7 + $0x38] sm:$0xff] }
  0x42   :  { %2044 = vmatprep.subr.mxu0 %v122_v5  ;;  %2089 = vmatpush3.msra.mxu1 %v2707_v6  ;;  %v2731_v18 = vld [vmem:[#allocation9 + $0x38] sm:$0xff]  ;;  %v115_v19 = vld [vmem:[#allocation7 + $0x30] sm:$0xff]  ;;  %v114_v21 = vld [vmem:[#allocation7 + $0x28] sm:$0xff]  ;;  %p2597_p0 = por %p2596_p13, %p2595_p12 }
  0x43   :  { %2045 = vmatpush3.msra.mxu0 %v122_v5  ;;  %2090 = vmatprep.subr.mxu1 %v3396_v0  ;;  %v2735_v20 = vld [vmem:[#allocation9 + $0x30] sm:$0xff]  ;;  %v2739_v22 = vld [vmem:[#allocation9 + $0x28] sm:$0xff]  ;;  %v113_v23 = vld [vmem:[#allocation7 + $0x20] sm:$0xff] }
  0x44   :  { %2046 = vmatprep.subr.mxu0 %v121_v7  ;;  %2091 = vmatpush3.msra.mxu1 %v2711_v8  ;;  %v2743_v24 = vld [vmem:[#allocation9 + $0x20] sm:$0xff]  ;;  %v112_v25 = vld [vmem:[#allocation7 + $0x18] sm:$0xff]  ;;  %v111_v27 = vld [vmem:[#allocation7 + $0x10] sm:$0xff]  ;;  %p2598_p1 = pnand %p2597_p0, %p2591_p11 }
  0x45   :  { %2047 = vmatpush3.msra.mxu0 %v121_v7  ;;  %2092 = vmatprep.subr.mxu1 %v3396_v0  ;;  %v2747_v26 = vld [vmem:[#allocation9 + $0x18] sm:$0xff]  ;;  %v2751_v28 = vld [vmem:[#allocation9 + $0x10] sm:$0xff]  ;;  %v110_v29 = vld [vmem:[#allocation7 + $0x8] sm:$0xff] }
  0x46   :  { %2048 = vmatprep.subr.mxu0 %v120_v9  ;;  %2093 = vmatpush3.msra.mxu1 %v2715_v10  ;;  %v101_v30 = vld [vmem:[#allocation4] sm:$0xff]  ;;  %v2756_v31 = vld [vmem:[#allocation9 + $0x8] sm:$0xff]  ;;  %v2763_v35 = vld [vmem:[#allocation10 + $0xf8] sm:$0xff] }
  0x47   :  { %2049 = vmatpush3.msra.mxu0 %v120_v9  ;;  %2094 = vmatprep.subr.mxu1 %v3396_v0  ;;  %v109_v32 = vld [vmem:[#allocation7] sm:$0xff]  ;;  %v102_v34 = vld [vmem:[#allocation4 + $0x8] sm:$0xff]  ;;  %v2766_v36 = vld [vmem:[#allocation10 + $0x78] sm:$0xff] }
  0x48   :  { %2050 = vmatprep.subr.mxu0 %v119_v11  ;;  %2095 = vmatpush3.msra.mxu1 %v2719_v12  ;;  %v2759_v33 = vld [vmem:[#allocation9] sm:$0xff]  ;;  %v2769_v37 = vld [vmem:[#allocation10 + $0xf0] sm:$0xff]  ;;  %v2777_v39 = vld [vmem:[#allocation10 + $0xe8] sm:$0xff] }
  0x49   :  { %2051 = vmatpush3.msra.mxu0 %v119_v11  ;;  %2096 = vmatprep.subr.mxu1 %v3396_v0  ;;  %v2773_v38 = vld [vmem:[#allocation10 + $0x70] sm:$0xff]  ;;  %v2781_v40 = vld [vmem:[#allocation10 + $0x68] sm:$0xff]  ;;  %v2785_v41 = vld [vmem:[#allocation10 + $0xe0] sm:$0xff] }
  0x4a   :  { %2052 = vmatprep.subr.mxu0 %v118_v13  ;;  %2097 = vmatpush3.msra.mxu1 %v2723_v14  ;;  %v2789_v42 = vld [vmem:[#allocation10 + $0x60] sm:$0xff]  ;;  %v2793_v43 = vld [vmem:[#allocation10 + $0xd8] sm:$0xff]  ;;  %v2801_v45 = vld [vmem:[#allocation10 + $0xd0] sm:$0xff] }
  0x4b   :  { %2053 = vmatpush3.msra.mxu0 %v118_v13  ;;  %2098 = vmatprep.subr.mxu1 %v3396_v0  ;;  %v2797_v44 = vld [vmem:[#allocation10 + $0x58] sm:$0xff]  ;;  %v2833_v46 = vld [vmem:[#allocation10 + $0x50] sm:$0xff]  ;;  %v2836_v47 = vld [vmem:[#allocation10 + $0xc8] sm:$0xff] }
  0x4c   :  { %2054 = vmatprep.subr.mxu0 %v117_v15  ;;  %2099 = vmatpush3.msra.mxu1 %v2727_v16  ;;  %v2839_v48 = vld [vmem:[#allocation10 + $0x48] sm:$0xff]  ;;  %v2842_v49 = vld [vmem:[#allocation10 + $0xc0] sm:$0xff]  ;;  %v2848_v51 = vld [vmem:[#allocation10 + $0xb8] sm:$0xff] }
  0x4d   :  { %2055 = vmatpush3.msra.mxu0 %v117_v15  ;;  %2100 = vmatprep.subr.mxu1 %v3396_v0  ;;  %v2845_v50 = vld [vmem:[#allocation10 + $0x40] sm:$0xff]  ;;  %v103_v52 = vld [vmem:[#allocation4 + $0x10] sm:$0xff]  ;;  %v2851_v53 = vld [vmem:[#allocation10 + $0x38] sm:$0xff] }
  0x4e   :  { %2056 = vmatprep.subr.mxu0 %v116_v17  ;;  %2101 = vmatpush3.msra.mxu1 %v2731_v18  ;;  %v104_v54 = vld [vmem:[#allocation4 + $0x18] sm:$0xff]  ;;  %v2854_v55 = vld [vmem:[#allocation10 + $0xb0] sm:$0xff]  ;;  %v2859_v57 = vld [vmem:[#allocation10 + $0xa8] sm:$0xff] }
  0x4f   :  { %2057 = vmatpush3.msra.mxu0 %v116_v17  ;;  %2102 = vmatprep.subr.mxu1 %v3396_v0  ;;  %v2857_v56 = vld [vmem:[#allocation10 + $0x30] sm:$0xff]  ;;  %v105_v58 = vld [vmem:[#allocation4 + $0x20] sm:$0xff]  ;;  %v2862_v59 = vld [vmem:[#allocation10 + $0x28] sm:$0xff] }
  0x50   :  { %2058 = vmatprep.subr.mxu0 %v115_v19  ;;  %2103 = vmatpush3.msra.mxu1 %v2735_v20  ;;  %v106_v60 = vld [vmem:[#allocation4 + $0x28] sm:$0xff]  ;;  %v2864_v61 = vld [vmem:[#allocation10 + $0xa0] sm:$0xff]  ;;  %v107_v63 = vld [vmem:[#allocation4 + $0x30] sm:$0xff] }
  0x51   :  { %2059 = vmatpush3.msra.mxu0 %v115_v19  ;;  %2104 = vmatprep.subr.mxu1 %v3396_v0  ;;  %v2867_v62 = vld [vmem:[#allocation10 + $0x20] sm:$0xff]  ;;  %v2870_v1 = vld [vmem:[#allocation10 + $0x98] sm:$0xff]  ;;  %v2876_v7 = vld [vmem:[#allocation10 + $0x90] sm:$0xff] }
  0x52   :  { %2060 = vmatprep.subr.mxu0 %v114_v21  ;;  %2105 = vmatpush3.msra.mxu1 %v2739_v22  ;;  %v2873_v2 = vld [vmem:[#allocation10 + $0x18] sm:$0xff]  ;;  %v2879_v9 = vld [vmem:[#allocation10 + $0x10] sm:$0xff]  ;;  %v2882_v11 = vld [vmem:[#allocation10 + $0x88] sm:$0xff] }
  0x53   :  { %2061 = vmatpush3.msra.mxu0 %v114_v21  ;;  %2106 = vmatprep.subr.mxu1 %v3396_v0  ;;  %v108_v5 = vld [vmem:[#allocation4 + $0x38] sm:$0xff]  ;;  %v2885_v13 = vld [vmem:[#allocation10 + $0x8] sm:$0xff]  ;;  %v2888_v15 = vld [vmem:[#allocation10 + $0x80] sm:$0xff] }
  0x54   :  { %2062 = vmatprep.subr.mxu0 %v113_v23  ;;  %2107 = vmatpush3.msra.mxu1 %v2743_v24  ;;  %v2892_v17 = vld [vmem:[#allocation10] sm:$0xff] }
  0x55   :  { %2063 = vmatpush3.msra.mxu0 %v113_v23  ;;  %2108 = vmatprep.subr.mxu1 %v3396_v0  ;;  %v2903_v23 = vld [vmem:[%s3392_s4] ss:$0 sm:$0xff] }
  0x56   :  { %2064 = vmatprep.subr.mxu0 %v112_v25  ;;  %2109 = vmatpush3.msra.mxu1 %v2747_v26 }
  0x57   :  { %2065 = vmatpush3.msra.mxu0 %v112_v25  ;;  %2110 = vmatprep.subr.mxu1 %v3396_v0 }
  0x58   :  { %2066 = vmatprep.subr.mxu0 %v111_v27  ;;  %2111 = vmatpush3.msra.mxu1 %v2751_v28 }
  0x59   :  { %2067 = vmatpush3.msra.mxu0 %v111_v27  ;;  %2112 = vmatprep.subr.mxu1 %v3396_v0 }
  0x5a   :  { %2068 = vmatprep.subr.mxu0 %v110_v29  ;;  %2072 = vmatprep.mubr.f32.mxu0 %v101_v30 }
  0x5b   :  { %2069 = vmatpush3.msra.mxu0 %v110_v29  ;;  %2113 = vmatpush3.msra.mxu1 %v2756_v31 }
  0x5c   :  { %2070 = vmatprep.subr.mxu0 %v109_v32  ;;  %2114 = vmatprep.subr.mxu1 %v3396_v0 }
  0x5d   :  { %2071 = vmatpush3.msra.mxu0 %v109_v32  ;;  %2115 = vmatpush3.msra.mxu1 %v2759_v33 }
  0x5e   :  { %2073 = vmatmul.mubr.f32.vlgmr.msra.gmra.mxu0 %v102_v34  ;;  %2117 = vmatmul.mubr.f32.vlgmr.msra.gmra.mxu1 %v3396_v0 }
  0x5f   :  { %1624 = vmatprep.subr.mxu0 %v2763_v35  ;;  %2119 = vmatprep.subr.mxu1 %v3396_v0 }
  0x60   :  { %1625 = vmatpush3.msra.mxu0 %v2766_v36  ;;  %2120 = vmatpush3.msra.mxu1 %v2701_v3 }
  0x61   :  { %1626 = vmatprep.subr.mxu0 %v2769_v37  ;;  %2121 = vmatprep.subr.mxu1 %v3396_v0 }
  0x62   :  { %1627 = vmatpush3.msra.mxu0 %v2773_v38  ;;  %2122 = vmatpush3.msra.mxu1 %v2704_v4 }
  0x63   :  { %1628 = vmatprep.subr.mxu0 %v2777_v39  ;;  %2123 = vmatprep.subr.mxu1 %v3396_v0 }
  0x64   :  { %1629 = vmatpush3.msra.mxu0 %v2781_v40  ;;  %2124 = vmatpush3.msra.mxu1 %v2707_v6 }
  0x65   :  { %1630 = vmatprep.subr.mxu0 %v2785_v41  ;;  %2125 = vmatprep.subr.mxu1 %v3396_v0 }
  0x66   :  { %1631 = vmatpush3.msra.mxu0 %v2789_v42  ;;  %2126 = vmatpush3.msra.mxu1 %v2711_v8 }
  0x67   :  { %1632 = vmatprep.subr.mxu0 %v2793_v43  ;;  %2127 = vmatprep.subr.mxu1 %v3396_v0 }
  0x68   :  { %1633 = vmatpush3.msra.mxu0 %v2797_v44  ;;  %2128 = vmatpush3.msra.mxu1 %v2715_v10 }
  0x69   :  { %1634 = vmatprep.subr.mxu0 %v2801_v45  ;;  %2129 = vmatprep.subr.mxu1 %v3396_v0 }
  0x6a   :  { %2130 = vmatpush3.msra.mxu1 %v2719_v12  ;;  %2151 = vmatprep.mubr.msk.f32.mxu1 %vm2626_vm0, %v3396_v0 }
  0x6b   :  { %2131 = vmatprep.subr.mxu1 %v3396_v0  ;;  %1635 = vmatpush3.msra.mxu0 %v2833_v46 }
  0x6c   :  { %2132 = vmatpush3.msra.mxu1 %v2723_v14  ;;  %1636 = vmatprep.subr.mxu0 %v2836_v47 }
  0x6d   :  { %2133 = vmatprep.subr.mxu1 %v3396_v0  ;;  %1637 = vmatpush3.msra.mxu0 %v2839_v48 }
  0x6e   :  { %2134 = vmatpush3.msra.mxu1 %v2727_v16  ;;  %1638 = vmatprep.subr.mxu0 %v2842_v49 }
  0x6f   :  { %2135 = vmatprep.subr.mxu1 %v3396_v0  ;;  %1639 = vmatpush3.msra.mxu0 %v2845_v50 }
  0x70   :  { %2136 = vmatpush3.msra.mxu1 %v2731_v18  ;;  %1640 = vmatprep.subr.mxu0 %v2848_v51 }
  0x71   :  { %2137 = vmatprep.subr.mxu1 %v3396_v0  ;;  %2075 = vmatprep.mubr.f32.mxu0 %v103_v52 }
  0x72   :  { %2138 = vmatpush3.msra.mxu1 %v2735_v20  ;;  %1641 = vmatpush3.msra.mxu0 %v2851_v53 }
  0x73   :  { %2139 = vmatprep.subr.mxu1 %v3396_v0  ;;  %2076 = vmatmul.mubr.f32.gmra.mxu0 %v104_v54 }
  0x74   :  { %2140 = vmatpush3.msra.mxu1 %v2739_v22  ;;  %1642 = vmatprep.subr.mxu0 %v2854_v55 }
  0x75   :  { %2141 = vmatprep.subr.mxu1 %v3396_v0  ;;  %1643 = vmatpush3.msra.mxu0 %v2857_v56 }
  0x76   :  { %2142 = vmatpush3.msra.mxu1 %v2743_v24  ;;  %2078 = vmatprep.mubr.f32.mxu0 %v105_v58 }
  0x77   :  { %2143 = vmatprep.subr.mxu1 %v3396_v0  ;;  %1644 = vmatprep.subr.mxu0 %v2859_v57 }
  0x78   :  { %2144 = vmatpush3.msra.mxu1 %v2747_v26  ;;  %1645 = vmatpush3.msra.mxu0 %v2862_v59 }
  0x79   :  { %2145 = vmatprep.subr.mxu1 %v3396_v0  ;;  %2079 = vmatmul.mubr.f32.gmra.mxu0 %v106_v60 }
  0x7a   :  { %2146 = vmatpush3.msra.mxu1 %v2751_v28  ;;  %1646 = vmatprep.subr.mxu0 %v2864_v61 }
  0x7b   :  { %2147 = vmatprep.subr.mxu1 %v3396_v0  ;;  %1647 = vmatpush3.msra.mxu0 %v2867_v62 }
  0x7c   :  { %2148 = vmatpush3.msra.mxu1 %v2756_v31  ;;  %2081 = vmatprep.mubr.f32.mxu0 %v107_v63 }
  0x7d   :  { %2149 = vmatprep.subr.mxu1 %v3396_v0  ;;  %1648 = vmatprep.subr.mxu0 %v2870_v1 }
  0x7e   :  { %2150 = vmatpush3.msra.mxu1 %v2759_v33  ;;  %1649 = vmatpush3.msra.mxu0 %v2873_v2 }
  0x7f   :  { %2154 = vmatprep.subr.mxu1 %v3396_v0  ;;  %2082 = vmatmul.mubr.f32.gmra.mxu0 %v108_v5 }
  0x80   :  { %1650 = vmatprep.subr.mxu0 %v2876_v7  ;;  %441 = vmatprep.mubr.f32.mxu0 %v3396_v0 }
  0x81   :  { %1651 = vmatpush3.msra.mxu0 %v2879_v9 }
  0x82   :  { %1652 = vmatprep.subr.mxu0 %v2882_v11 }
  0x83   :  { %1653 = vmatpush3.msra.mxu0 %v2885_v13 }
  0x84   :  { %1654 = vmatprep.subr.mxu0 %v2888_v15 }
  0x85   :  { %1655 = vmatpush3.msra.mxu0 %v2892_v17 }
  0x86   :  { %1676 = vmatprep.subr.mxu0 %v2763_v35 }
 0x11e   :  { %v2898_v19 = vpop.f32.mrf.mxu0  ;;  %v365_v21 = vpop.f32.mrf.mxu1 }
 0x11f   :  { %v204_v5 = vadd.f32 %v2898_v19, %v2903_v23  ;;  %v3400_v19 = vmov 0.0  }
 0x120   :  { %v198_v25 = vpop.f32.mrf.mxu0  ;;  %v2118_v27 = vpop.f32.mrf.mxu1 }
 0x121   :  { %v199_v29 = vadd.f32 %v2903_v23, %v198_v25 }
 0x123   :  { %v369_v30 = vadd.f32 %v365_v21, %v199_v29  ;;  %v2989_v29 = vld [vmem:[%s3392_s4 + $0x1] ss:$0 sm:$0xff] }
 0x125   :  { %2409 = vtanh.f32 %v369_v30 }
 0x132   :  { %v2410_v32 = vpop.eup %2409 }
 0x133   :  { %442 = vmatmul.mubr.f32.vlgmr.msra.gmra.mxu0 %v2410_v32  ;;  %2152 = vmatmul.mubr.f32.vlgmr.msra.gmra.mxu1 %v2410_v32  ;;  %v2972_v34 = vpop.f32.mrf.mxu0 }
 0x134   :  { %2155 = vmatpush3.msra.mxu1 %v2701_v3  ;;  %1677 = vmatpush3.msra.mxu0 %v2766_v36 }
 0x135   :  { %2156 = vmatprep.subr.mxu1 %v3396_v0  ;;  %1678 = vmatprep.subr.mxu0 %v2769_v37  ;;  %v2974_v52 = vpop.f32.mrf.mxu0 }
 0x136   :  { %2157 = vmatpush3.msra.mxu1 %v2704_v4  ;;  %1679 = vmatpush3.msra.mxu0 %v2773_v38 }
 0x137   :  { %2158 = vmatprep.subr.mxu1 %v3396_v0  ;;  %1680 = vmatprep.subr.mxu0 %v2777_v39 }
 0x138   :  { %2159 = vmatpush3.msra.mxu1 %v2707_v6  ;;  %1681 = vmatpush3.msra.mxu0 %v2781_v40 }
 0x139   :  { %2160 = vmatprep.subr.mxu1 %v3396_v0  ;;  %1682 = vmatprep.subr.mxu0 %v2785_v41  ;;  %v2976_v54 = vpop.f32.mrf.mxu0 }
 0x13a   :  { %2161 = vmatpush3.msra.mxu1 %v2711_v8  ;;  %1683 = vmatpush3.msra.mxu0 %v2789_v42  ;;  %3398 = vst [vmem:[#allocation18_spill] sm:$0xff] %v2976_v54 }
 0x13b   :  { %2162 = vmatprep.subr.mxu1 %v3396_v0  ;;  %1684 = vmatprep.subr.mxu0 %v2793_v43  ;;  %v2978_v58 = vpop.f32.mrf.mxu0 }
 0x13c   :  { %2163 = vmatpush3.msra.mxu1 %v2715_v10  ;;  %1685 = vmatpush3.msra.mxu0 %v2797_v44 }
 0x13d   :  { %2164 = vmatprep.subr.mxu1 %v3396_v0  ;;  %1686 = vmatprep.subr.mxu0 %v2801_v45 }
 0x13e   :  { %2165 = vmatpush3.msra.mxu1 %v2719_v12  ;;  %1687 = vmatpush3.msra.mxu0 %v2833_v46 }
 0x13f   :  { %2166 = vmatprep.subr.mxu1 %v3396_v0  ;;  %1688 = vmatprep.subr.mxu0 %v2836_v47  ;;  %v2980_v60 = vpop.f32.mrf.mxu0 }
 0x140   :  { %2167 = vmatpush3.msra.mxu1 %v2723_v14  ;;  %1689 = vmatpush3.msra.mxu0 %v2839_v48  ;;  %3399 = vst [vmem:[#allocation19_spill] sm:$0xff] %v2980_v60 }
 0x141   :  { %2168 = vmatprep.subr.mxu1 %v3396_v0  ;;  %1690 = vmatprep.subr.mxu0 %v2842_v49  ;;  %v2982_v63 = vpop.f32.mrf.mxu0 }
 0x142   :  { %2169 = vmatpush3.msra.mxu1 %v2727_v16  ;;  %1691 = vmatpush3.msra.mxu0 %v2845_v50 }
 0x143   :  { %2170 = vmatprep.subr.mxu1 %v3396_v0  ;;  %1692 = vmatprep.subr.mxu0 %v2848_v51 }
 0x144   :  { %2171 = vmatpush3.msra.mxu1 %v2731_v18  ;;  %1693 = vmatpush3.msra.mxu0 %v2851_v53 }
 0x145   :  { %2172 = vmatprep.subr.mxu1 %v3396_v0  ;;  %1694 = vmatprep.subr.mxu0 %v2854_v55 }
 0x146   :  { %2173 = vmatpush3.msra.mxu1 %v2735_v20  ;;  %1695 = vmatpush3.msra.mxu0 %v2857_v56 }
 0x147   :  { %2174 = vmatprep.subr.mxu1 %v3396_v0  ;;  %1696 = vmatprep.subr.mxu0 %v2859_v57 }
 0x148   :  { %2175 = vmatpush3.msra.mxu1 %v2739_v22  ;;  %1697 = vmatpush3.msra.mxu0 %v2862_v59 }
 0x149   :  { %2176 = vmatprep.subr.mxu1 %v3396_v0  ;;  %1698 = vmatprep.subr.mxu0 %v2864_v61 }
 0x14a   :  { %2177 = vmatpush3.msra.mxu1 %v2743_v24  ;;  %1699 = vmatpush3.msra.mxu0 %v2867_v62 }
 0x14b   :  { %2178 = vmatprep.subr.mxu1 %v3396_v0  ;;  %1700 = vmatprep.subr.mxu0 %v2870_v1 }
 0x14c   :  { %2179 = vmatpush3.msra.mxu1 %v2747_v26  ;;  %1701 = vmatpush3.msra.mxu0 %v2873_v2 }
 0x14d   :  { %2180 = vmatprep.subr.mxu1 %v3396_v0  ;;  %1702 = vmatprep.subr.mxu0 %v2876_v7 }
 0x14e   :  { %2181 = vmatpush3.msra.mxu1 %v2751_v28  ;;  %2186 = vmatprep.mubr.msk.f32.mxu1 %vm2626_vm0, %v3396_v0 }
 0x14f   :  { %2182 = vmatprep.subr.mxu1 %v3396_v0  ;;  %1703 = vmatpush3.msra.mxu0 %v2879_v9 }
 0x150   :  { %2183 = vmatpush3.msra.mxu1 %v2756_v31  ;;  %1704 = vmatprep.subr.mxu0 %v2882_v11 }
 0x151   :  { %2184 = vmatprep.subr.mxu1 %v3396_v0  ;;  %1705 = vmatpush3.msra.mxu0 %v2885_v13 }
 0x152   :  { %2185 = vmatpush3.msra.mxu1 %v2759_v33  ;;  %1706 = vmatprep.subr.mxu0 %v2888_v15 }
 0x153   :  { %1707 = vmatpush3.msra.mxu0 %v2892_v17  ;;  %2189 = vmatprep.subr.mxu1 %v3396_v0 }
 0x154   :  { %1728 = vmatprep.subr.mxu0 %v2763_v35 }
 0x1f3   :  { %v1656_v21 = vpop.f32.mrf.mxu0  ;;  %v516_v25 = vpop.f32.mrf.mxu1 }
 0x1f4   :  { %v520_v27 = vadd.f32 %v516_v25, %v204_v5 }
 0x1f5   :  { %v1657_v30 = vpop.f32.mrf.mxu0  ;;  %v2153_v32 = vpop.f32.mrf.mxu1 }
 0x1f6   :  { %2411 = vtanh.f32 %v520_v27  ;;  %v1658_v0 = vadd.f32 %v1657_v30, %v1656_v21 }
 0x1f8   :  { %v444_v54 = vadd.f32 %v1658_v0, %v2989_v29  ;;  %v209_v0 = vadd.f32 %v2903_v23, %v2974_v52 }
 0x1fa   :  { %2413 = vtanh.f32 %v444_v54 }
 0x203   :  { %v2412_v60 = vpop.eup %2411 }
 0x204   :  { %2187 = vmatmul.mubr.f32.vlgmr.msra.gmra.mxu1 %v2412_v60 }
 0x205   :  { %2190 = vmatpush3.msra.mxu1 %v2701_v3  ;;  %2221 = vmatprep.mubr.msk.f32.mxu1 %vm2626_vm0, %v3400_v19 }
 0x206   :  { %2191 = vmatprep.subr.mxu1 %v3400_v19 }
 0x207   :  { %v2414_v5 = vpop.eup %2413  ;;  %2192 = vmatpush3.msra.mxu1 %v2704_v4 }
 0x208   :  { %586 = vmatprep.mubr.f32.mxu0 %v2414_v5  ;;  %2193 = vmatprep.subr.mxu1 %v3400_v19 }
 0x209   :  { %587 = vmatmul.mubr.f32.vlgmr.msra.gmra.mxu0 %v2412_v60  ;;  %2194 = vmatpush3.msra.mxu1 %v2707_v6 }
 0x20a   :  { %2195 = vmatprep.subr.mxu1 %v3400_v19  ;;  %1729 = vmatpush3.msra.mxu0 %v2766_v36 }
 0x20b   :  { %2196 = vmatpush3.msra.mxu1 %v2711_v8  ;;  %1730 = vmatprep.subr.mxu0 %v2769_v37 }
 0x20c   :  { %2197 = vmatprep.subr.mxu1 %v3400_v19  ;;  %1731 = vmatpush3.msra.mxu0 %v2773_v38 }
 0x20d   :  { %2198 = vmatpush3.msra.mxu1 %v2715_v10  ;;  %1732 = vmatprep.subr.mxu0 %v2777_v39 }
 0x20e   :  { %2199 = vmatprep.subr.mxu1 %v3400_v19  ;;  %1733 = vmatpush3.msra.mxu0 %v2781_v40 }
 0x20f   :  { %2200 = vmatpush3.msra.mxu1 %v2719_v12  ;;  %1734 = vmatprep.subr.mxu0 %v2785_v41 }
 0x210   :  { %2201 = vmatprep.subr.mxu1 %v3400_v19  ;;  %1735 = vmatpush3.msra.mxu0 %v2789_v42 }
 0x211   :  { %2202 = vmatpush3.msra.mxu1 %v2723_v14  ;;  %1736 = vmatprep.subr.mxu0 %v2793_v43 }
 0x212   :  { %2203 = vmatprep.subr.mxu1 %v3400_v19  ;;  %1737 = vmatpush3.msra.mxu0 %v2797_v44 }
 0x213   :  { %2204 = vmatpush3.msra.mxu1 %v2727_v16  ;;  %1738 = vmatprep.subr.mxu0 %v2801_v45 }
 0x214   :  { %2205 = vmatprep.subr.mxu1 %v3400_v19  ;;  %1739 = vmatpush3.msra.mxu0 %v2833_v46 }
 0x215   :  { %2206 = vmatpush3.msra.mxu1 %v2731_v18  ;;  %1740 = vmatprep.subr.mxu0 %v2836_v47 }
 0x216   :  { %2207 = vmatprep.subr.mxu1 %v3400_v19  ;;  %1741 = vmatpush3.msra.mxu0 %v2839_v48 }
 0x217   :  { %2208 = vmatpush3.msra.mxu1 %v2735_v20  ;;  %1742 = vmatprep.subr.mxu0 %v2842_v49 }
 0x218   :  { %2209 = vmatprep.subr.mxu1 %v3400_v19  ;;  %1743 = vmatpush3.msra.mxu0 %v2845_v50 }
 0x219   :  { %2210 = vmatpush3.msra.mxu1 %v2739_v22  ;;  %1744 = vmatprep.subr.mxu0 %v2848_v51 }
 0x21a   :  { %2211 = vmatprep.subr.mxu1 %v3400_v19  ;;  %1745 = vmatpush3.msra.mxu0 %v2851_v53 }
 0x21b   :  { %2212 = vmatpush3.msra.mxu1 %v2743_v24  ;;  %1746 = vmatprep.subr.mxu0 %v2854_v55 }
 0x21c   :  { %2213 = vmatprep.subr.mxu1 %v3400_v19  ;;  %1747 = vmatpush3.msra.mxu0 %v2857_v56 }
 0x21d   :  { %2214 = vmatpush3.msra.mxu1 %v2747_v26  ;;  %1748 = vmatprep.subr.mxu0 %v2859_v57 }
 0x21e   :  { %2215 = vmatprep.subr.mxu1 %v3400_v19  ;;  %1749 = vmatpush3.msra.mxu0 %v2862_v59 }
 0x21f   :  { %2216 = vmatpush3.msra.mxu1 %v2751_v28  ;;  %1750 = vmatprep.subr.mxu0 %v2864_v61 }
 0x220   :  { %2217 = vmatprep.subr.mxu1 %v3400_v19  ;;  %1751 = vmatpush3.msra.mxu0 %v2867_v62 }
 0x221   :  { %2218 = vmatpush3.msra.mxu1 %v2756_v31  ;;  %1752 = vmatprep.subr.mxu0 %v2870_v1 }
 0x222   :  { %2219 = vmatprep.subr.mxu1 %v3400_v19  ;;  %1753 = vmatpush3.msra.mxu0 %v2873_v2 }
 0x223   :  { %2220 = vmatpush3.msra.mxu1 %v2759_v33  ;;  %1754 = vmatprep.subr.mxu0 %v2876_v7 }
 0x224   :  { %1755 = vmatpush3.msra.mxu0 %v2879_v9  ;;  %2224 = vmatprep.subr.mxu1 %v3400_v19 }
 0x225   :  { %1756 = vmatprep.subr.mxu0 %v2882_v11 }
 0x226   :  { %1757 = vmatpush3.msra.mxu0 %v2885_v13 }
 0x227   :  { %1758 = vmatprep.subr.mxu0 %v2888_v15 }
 0x228   :  { %1759 = vmatpush3.msra.mxu0 %v2892_v17 }
 0x229   :  { %1780 = vmatprep.subr.mxu0 %v2763_v35 }
 0x2c4   :  { %v661_v54 = vpop.f32.mrf.mxu1 }
 0x2c5   :  { %v665_v60 = vadd.f32 %v661_v54, %v209_v0  ;;  %v214_v0 = vadd.f32 %v2972_v34, %v2903_v23  ;;  %v3213_v34 = vld [vmem:[#allocation9 + $0x60] sm:$0xff] }
 0x2c6   :  { %v2188_v21 = vpop.f32.mrf.mxu1 }
 0x2c7   :  { %2415 = vtanh.f32 %v665_v60 }
 0x2c9   :  { %v1708_v25 = vpop.f32.mrf.mxu0 }
 0x2cb   :  { %v1709_v27 = vpop.f32.mrf.mxu0 }
 0x2cc   :  { %v1710_v30 = vadd.f32 %v1709_v27, %v1708_v25 }
 0x2ce   :  { %v589_v32 = vadd.f32 %v1710_v30, %v2989_v29 }
 0x2d0   :  { %2417 = vtanh.f32 %v589_v32 }
 0x2d4   :  { %v2416_v5 = vpop.eup %2415 }
 0x2d5   :  { %2222 = vmatmul.mubr.f32.vlgmr.msra.gmra.mxu1 %v2416_v5 }
 0x2d6   :  { %2225 = vmatpush3.msra.mxu1 %v2701_v3  ;;  %2256 = vmatprep.mubr.msk.f32.mxu1 %vm2626_vm0, %v3400_v19 }
 0x2d7   :  { %2226 = vmatprep.subr.mxu1 %v3400_v19 }
 0x2d8   :  { %2227 = vmatpush3.msra.mxu1 %v2704_v4 }
 0x2d9   :  { %2228 = vmatprep.subr.mxu1 %v3400_v19 }
 0x2da   :  { %2229 = vmatpush3.msra.mxu1 %v2707_v6 }
 0x2db   :  { %2230 = vmatprep.subr.mxu1 %v3400_v19 }
 0x2dc   :  { %2231 = vmatpush3.msra.mxu1 %v2711_v8 }
 0x2dd   :  { %v2418_v52 = vpop.eup %2417  ;;  %2232 = vmatprep.subr.mxu1 %v3400_v19 }
 0x2de   :  { %731 = vmatprep.mubr.f32.mxu0 %v2418_v52  ;;  %2233 = vmatpush3.msra.mxu1 %v2715_v10  ;;  %v3221_v52 = vld [vmem:[#allocation9 + $0x50] sm:$0xff] }
 0x2df   :  { %732 = vmatmul.mubr.f32.vlgmr.msra.gmra.mxu0 %v2416_v5  ;;  %2234 = vmatprep.subr.mxu1 %v3400_v19 }
 0x2e0   :  { %2235 = vmatpush3.msra.mxu1 %v2719_v12  ;;  %1781 = vmatpush3.msra.mxu0 %v2766_v36 }
 0x2e1   :  { %2236 = vmatprep.subr.mxu1 %v3400_v19  ;;  %1782 = vmatprep.subr.mxu0 %v2769_v37 }
 0x2e2   :  { %2237 = vmatpush3.msra.mxu1 %v2723_v14  ;;  %1783 = vmatpush3.msra.mxu0 %v2773_v38 }
 0x2e3   :  { %2238 = vmatprep.subr.mxu1 %v3400_v19  ;;  %1784 = vmatprep.subr.mxu0 %v2777_v39 }
 0x2e4   :  { %2239 = vmatpush3.msra.mxu1 %v2727_v16  ;;  %1785 = vmatpush3.msra.mxu0 %v2781_v40 }
 0x2e5   :  { %2240 = vmatprep.subr.mxu1 %v3400_v19  ;;  %1786 = vmatprep.subr.mxu0 %v2785_v41 }
 0x2e6   :  { %2241 = vmatpush3.msra.mxu1 %v2731_v18  ;;  %1787 = vmatpush3.msra.mxu0 %v2789_v42 }
 0x2e7   :  { %2242 = vmatprep.subr.mxu1 %v3400_v19  ;;  %1788 = vmatprep.subr.mxu0 %v2793_v43 }
 0x2e8   :  { %2243 = vmatpush3.msra.mxu1 %v2735_v20  ;;  %1789 = vmatpush3.msra.mxu0 %v2797_v44 }
 0x2e9   :  { %2244 = vmatprep.subr.mxu1 %v3400_v19  ;;  %1790 = vmatprep.subr.mxu0 %v2801_v45 }
 0x2ea   :  { %2245 = vmatpush3.msra.mxu1 %v2739_v22  ;;  %1791 = vmatpush3.msra.mxu0 %v2833_v46 }
 0x2eb   :  { %2246 = vmatprep.subr.mxu1 %v3400_v19  ;;  %1792 = vmatprep.subr.mxu0 %v2836_v47 }
 0x2ec   :  { %2247 = vmatpush3.msra.mxu1 %v2743_v24  ;;  %1793 = vmatpush3.msra.mxu0 %v2839_v48 }
 0x2ed   :  { %2248 = vmatprep.subr.mxu1 %v3400_v19  ;;  %1794 = vmatprep.subr.mxu0 %v2842_v49 }
 0x2ee   :  { %2249 = vmatpush3.msra.mxu1 %v2747_v26  ;;  %1795 = vmatpush3.msra.mxu0 %v2845_v50 }
 0x2ef   :  { %2250 = vmatprep.subr.mxu1 %v3400_v19  ;;  %1796 = vmatprep.subr.mxu0 %v2848_v51 }
 0x2f0   :  { %2251 = vmatpush3.msra.mxu1 %v2751_v28  ;;  %1797 = vmatpush3.msra.mxu0 %v2851_v53 }
 0x2f1   :  { %2252 = vmatprep.subr.mxu1 %v3400_v19  ;;  %1798 = vmatprep.subr.mxu0 %v2854_v55 }
 0x2f2   :  { %2253 = vmatpush3.msra.mxu1 %v2756_v31  ;;  %1799 = vmatpush3.msra.mxu0 %v2857_v56 }
 0x2f3   :  { %2254 = vmatprep.subr.mxu1 %v3400_v19  ;;  %1800 = vmatprep.subr.mxu0 %v2859_v57 }
 0x2f4   :  { %2255 = vmatpush3.msra.mxu1 %v2759_v33  ;;  %1801 = vmatpush3.msra.mxu0 %v2862_v59 }
 0x2f5   :  { %1802 = vmatprep.subr.mxu0 %v2864_v61  ;;  %2259 = vmatprep.subr.mxu1 %v3400_v19 }
 0x2f6   :  { %1803 = vmatpush3.msra.mxu0 %v2867_v62 }
 0x2f7   :  { %1804 = vmatprep.subr.mxu0 %v2870_v1 }
 0x2f8   :  { %1805 = vmatpush3.msra.mxu0 %v2873_v2 }
 0x2f9   :  { %1806 = vmatprep.subr.mxu0 %v2876_v7 }
 0x2fa   :  { %1807 = vmatpush3.msra.mxu0 %v2879_v9 }
 0x2fb   :  { %1808 = vmatprep.subr.mxu0 %v2882_v11 }
 0x2fc   :  { %1809 = vmatpush3.msra.mxu0 %v2885_v13 }
 0x2fd   :  { %1810 = vmatprep.subr.mxu0 %v2888_v15 }
 0x2fe   :  { %1811 = vmatpush3.msra.mxu0 %v2892_v17 }
 0x2ff   :  { %1832 = vmatprep.subr.mxu0 %v2763_v35 }
 0x395   :  { %v806_v54 = vpop.f32.mrf.mxu1 }
 0x396   :  { %v810_v60 = vadd.f32 %v806_v54, %v214_v0  ;;  %v3225_v0 = vld [vmem:[#allocation9 + $0x48] sm:$0xff]  ;;  %v3229_v54 = vld [vmem:[#allocation9 + $0x40] sm:$0xff] }
 0x397   :  { %v2223_v21 = vpop.f32.mrf.mxu1 }
 0x398   :  { %2419 = vtanh.f32 %v810_v60  ;;  %v3233_v60 = vld [vmem:[#allocation9 + $0x38] sm:$0xff] }
 0x39f   :  { %v1760_v25 = vpop.f32.mrf.mxu0 }
 0x3a1   :  { %v1761_v27 = vpop.f32.mrf.mxu0 }
 0x3a2   :  { %v1762_v30 = vadd.f32 %v1761_v27, %v1760_v25  ;;  %v3237_v25 = vld [vmem:[#allocation9 + $0x30] sm:$0xff]  ;;  %v3241_v27 = vld [vmem:[#allocation9 + $0x28] sm:$0xff] }
 0x3a4   :  { %v734_v32 = vadd.f32 %v1762_v30, %v2989_v29  ;;  %v3247_v30 = vld [vmem:[#allocation9 + $0x20] sm:$0xff] }
 0x3a5   :  { %v2420_v5 = vpop.eup %2419 }
 0x3a6   :  { %2421 = vtanh.f32 %v734_v32  ;;  %2257 = vmatmul.mubr.f32.vlgmr.msra.gmra.mxu1 %v2420_v5  ;;  %v2462_v32 = vld [vmem:[#allocation9] sm:$0xff] }
 0x3a7   :  { %2260 = vmatpush3.msra.mxu1 %v2701_v3  ;;  %2291 = vmatprep.mubr.msk.f32.mxu1 %vm2626_vm0, %v3400_v19 }
 0x3a8   :  { %2261 = vmatprep.subr.mxu1 %v3400_v19 }
 0x3a9   :  { %2262 = vmatpush3.msra.mxu1 %v2704_v4  ;;  %v219_v4 = vadd.f32 %v2903_v23, %v2978_v58  ;;  %v3217_v58 = vld [vmem:[#allocation9 + $0x58] sm:$0xff] }
 0x3aa   :  { %2263 = vmatprep.subr.mxu1 %v3400_v19 }
 0x3ab   :  { %2264 = vmatpush3.msra.mxu1 %v2707_v6 }
 0x3ac   :  { %2265 = vmatprep.subr.mxu1 %v3400_v19 }
 0x3ad   :  { %2266 = vmatpush3.msra.mxu1 %v2711_v8 }
 0x3ae   :  { %2267 = vmatprep.subr.mxu1 %v3400_v19 }
 0x3af   :  { %2268 = vmatpush3.msra.mxu1 %v2715_v10 }
 0x3b0   :  { %2269 = vmatprep.subr.mxu1 %v3400_v19 }
 0x3b1   :  { %2270 = vmatpush3.msra.mxu1 %v2719_v12 }
 0x3b2   :  { %2271 = vmatprep.subr.mxu1 %v3400_v19 }
 0x3b3   :  { %v2422_v3 = vpop.eup %2421  ;;  %2272 = vmatpush3.msra.mxu1 %v2723_v14 }
 0x3b4   :  { %876 = vmatprep.mubr.f32.mxu0 %v2422_v3  ;;  %2273 = vmatprep.subr.mxu1 %v3400_v19  ;;  %v2464_v3 = vld [vmem:[#allocation10 + $0x60] sm:$0xff] }
 0x3b5   :  { %877 = vmatmul.mubr.f32.vlgmr.msra.gmra.mxu0 %v2420_v5  ;;  %2274 = vmatpush3.msra.mxu1 %v2727_v16  ;;  %v2463_v5 = vld [vmem:[#allocation10 + $0xe0] sm:$0xff] }
 0x3b6   :  { %2275 = vmatprep.subr.mxu1 %v3400_v19  ;;  %1833 = vmatpush3.msra.mxu0 %v2766_v36 }
 0x3b7   :  { %2276 = vmatpush3.msra.mxu1 %v2731_v18  ;;  %1834 = vmatprep.subr.mxu0 %v2769_v37 }
 0x3b8   :  { %2277 = vmatprep.subr.mxu1 %v3400_v19  ;;  %1835 = vmatpush3.msra.mxu0 %v2773_v38 }
 0x3b9   :  { %2278 = vmatpush3.msra.mxu1 %v2735_v20  ;;  %1836 = vmatprep.subr.mxu0 %v2777_v39  ;;  %v3198_v20 = vld [vmem:[#allocation9 + $0x78] sm:$0xff] }
 0x3ba   :  { %2279 = vmatprep.subr.mxu1 %v3400_v19  ;;  %1837 = vmatpush3.msra.mxu0 %v2781_v40 }
 0x3bb   :  { %2280 = vmatpush3.msra.mxu1 %v2739_v22  ;;  %1838 = vmatprep.subr.mxu0 %v2785_v41 }
 0x3bc   :  { %2281 = vmatprep.subr.mxu1 %v3400_v19  ;;  %1839 = vmatpush3.msra.mxu0 %v2789_v42 }
 0x3bd   :  { %2282 = vmatpush3.msra.mxu1 %v2743_v24  ;;  %1840 = vmatprep.subr.mxu0 %v2793_v43  ;;  %v3205_v24 = vld [vmem:[#allocation9 + $0x70] sm:$0xff] }
 0x3be   :  { %2283 = vmatprep.subr.mxu1 %v3400_v19  ;;  %1841 = vmatpush3.msra.mxu0 %v2797_v44 }
 0x3bf   :  { %2284 = vmatpush3.msra.mxu1 %v2747_v26  ;;  %1842 = vmatprep.subr.mxu0 %v2801_v45 }
 0x3c0   :  { %2285 = vmatprep.subr.mxu1 %v3400_v19  ;;  %1843 = vmatpush3.msra.mxu0 %v2833_v46 }
 0x3c1   :  { %2286 = vmatpush3.msra.mxu1 %v2751_v28  ;;  %1844 = vmatprep.subr.mxu0 %v2836_v47 }
 0x3c2   :  { %2287 = vmatprep.subr.mxu1 %v3400_v19  ;;  %1845 = vmatpush3.msra.mxu0 %v2839_v48 }
 0x3c3   :  { %2288 = vmatpush3.msra.mxu1 %v2756_v31  ;;  %1846 = vmatprep.subr.mxu0 %v2842_v49 }
 0x3c4   :  { %2289 = vmatprep.subr.mxu1 %v3400_v19  ;;  %1847 = vmatpush3.msra.mxu0 %v2845_v50 }
 0x3c5   :  { %2290 = vmatpush3.msra.mxu1 %v2759_v33  ;;  %1848 = vmatprep.subr.mxu0 %v2848_v51 }
 0x3c6   :  { %1849 = vmatpush3.msra.mxu0 %v2851_v53  ;;  %2294 = vmatprep.subr.mxu1 %v3400_v19 }
 0x3c7   :  { %1850 = vmatprep.subr.mxu0 %v2854_v55 }
 0x3c8   :  { %1851 = vmatpush3.msra.mxu0 %v2857_v56 }
 0x3c9   :  { %1852 = vmatprep.subr.mxu0 %v2859_v57 }
 0x3ca   :  { %1853 = vmatpush3.msra.mxu0 %v2862_v59 }
 0x3cb   :  { %1854 = vmatprep.subr.mxu0 %v2864_v61 }
 0x3cc   :  { %1855 = vmatpush3.msra.mxu0 %v2867_v62 }
 0x3cd   :  { %1856 = vmatprep.subr.mxu0 %v2870_v1 }
 0x3ce   :  { %1857 = vmatpush3.msra.mxu0 %v2873_v2 }
 0x3cf   :  { %1858 = vmatprep.subr.mxu0 %v2876_v7 }
 0x3d0   :  { %1859 = vmatpush3.msra.mxu0 %v2879_v9 }
 0x3d1   :  { %1860 = vmatprep.subr.mxu0 %v2882_v11 }
 0x3d2   :  { %1861 = vmatpush3.msra.mxu0 %v2885_v13 }
 0x3d3   :  { %1862 = vmatprep.subr.mxu0 %v2888_v15 }
 0x3d4   :  { %1863 = vmatpush3.msra.mxu0 %v2892_v17 }
 0x3d5   :  { %1884 = vmatprep.subr.mxu0 %v2763_v35  ;;  %v3209_v35 = vld [vmem:[#allocation9 + $0x68] sm:$0xff] }
 0x466   :  { %v951_v6 = vpop.f32.mrf.mxu1 }
 0x467   :  { %v955_v8 = vadd.f32 %v951_v6, %v219_v4  ;;  %v2465_v4 = vld [vmem:[#allocation10 + $0xd8] sm:$0xff] }
 0x468   :  { %v2258_v10 = vpop.f32.mrf.mxu1  ;;  %v2466_v6 = vld [vmem:[#allocation10 + $0x58] sm:$0xff] }
 0x469   :  { %2423 = vtanh.f32 %v955_v8  ;;  %v2467_v8 = vld [vmem:[#allocation10 + $0xd0] sm:$0xff] }
 0x46a   :  { %v2468_v10 = vld [vmem:[#allocation10 + $0x50] sm:$0xff] }
 0x475   :  { %v1812_v12 = vpop.f32.mrf.mxu0 }
 0x476   :  { %v2424_v14 = vpop.eup %2423 }
 0x477   :  { %v1813_v16 = vpop.f32.mrf.mxu0  ;;  %2292 = vmatmul.mubr.f32.vlgmr.msra.gmra.mxu1 %v2424_v14 }
 0x478   :  { %v1814_v18 = vadd.f32 %v1813_v16, %v1812_v12  ;;  %2295 = vmatpush3.msra.mxu1 %v3198_v20  ;;  %2326 = vmatprep.mubr.msk.f32.mxu1 %vm2626_vm0, %v3400_v19  ;;  %v2469_v12 = vld [vmem:[#allocation10 + $0xc8] sm:$0xff]  ;;  %v2471_v16 = vld [vmem:[#allocation10 + $0xc0] sm:$0xff] }
 0x479   :  { %2296 = vmatprep.subr.mxu1 %v3400_v19 }
 0x47a   :  { %v879_v22 = vadd.f32 %v1814_v18, %v2989_v29  ;;  %2297 = vmatpush3.msra.mxu1 %v3205_v24  ;;  %v2472_v18 = vld [vmem:[#allocation10 + $0x40] sm:$0xff] }
 0x47b   :  { %2298 = vmatprep.subr.mxu1 %v3400_v19 }
 0x47c   :  { %2425 = vtanh.f32 %v879_v22  ;;  %2299 = vmatpush3.msra.mxu1 %v3209_v35  ;;  %v2481_v22 = vld [vmem:[#allocation10 + $0x98] sm:$0xff] }
 0x47d   :  { %2300 = vmatprep.subr.mxu1 %v3400_v19 }
 0x47e   :  { %2301 = vmatpush3.msra.mxu1 %v3213_v34 }
 0x47f   :  { %2302 = vmatprep.subr.mxu1 %v3400_v19 }
 0x480   :  { %2303 = vmatpush3.msra.mxu1 %v3217_v58 }
 0x481   :  { %2304 = vmatprep.subr.mxu1 %v3400_v19 }
 0x482   :  { %2305 = vmatpush3.msra.mxu1 %v3221_v52 }
 0x483   :  { %2306 = vmatprep.subr.mxu1 %v3400_v19 }
 0x484   :  { %2307 = vmatpush3.msra.mxu1 %v3225_v0 }
 0x485   :  { %2308 = vmatprep.subr.mxu1 %v3400_v19 }
 0x486   :  { %2309 = vmatpush3.msra.mxu1 %v3229_v54 }
 0x487   :  { %2310 = vmatprep.subr.mxu1 %v3400_v19 }
 0x488   :  { %2311 = vmatpush3.msra.mxu1 %v3233_v60 }
 0x489   :  { %v2426_v21 = vpop.eup %2425  ;;  %2312 = vmatprep.subr.mxu1 %v3400_v19 }
 0x48a   :  { %1021 = vmatprep.mubr.f32.mxu0 %v2426_v21  ;;  %2313 = vmatpush3.msra.mxu1 %v3237_v25  ;;  %v1482_v21 = vld [vmem:[#allocation12 + $0x70] sm:$0xff] }
 0x48b   :  { %1022 = vmatmul.mubr.f32.vlgmr.msra.gmra.mxu0 %v2424_v14  ;;  %2314 = vmatprep.subr.mxu1 %v3400_v19  ;;  %v2470_v14 = vld [vmem:[#allocation10 + $0x48] sm:$0xff] }
 0x48c   :  { %2315 = vmatpush3.msra.mxu1 %v3241_v27  ;;  %1885 = vmatpush3.msra.mxu0 %v2766_v36 }
 0x48d   :  { %2316 = vmatprep.subr.mxu1 %v3400_v19  ;;  %1886 = vmatprep.subr.mxu0 %v2769_v37 }
 0x48e   :  { %2317 = vmatpush3.msra.mxu1 %v3247_v30  ;;  %1887 = vmatpush3.msra.mxu0 %v2773_v38 }
 0x48f   :  { %2318 = vmatprep.subr.mxu1 %v3400_v19  ;;  %1888 = vmatprep.subr.mxu0 %v2777_v39 }
 0x490   :  { %2319 = vmatpush3.msra.mxu1 %v2747_v26  ;;  %1889 = vmatpush3.msra.mxu0 %v2781_v40  ;;  %v3288_v26 = vld [vmem:[#allocation10 + $0xf8] sm:$0xff] }
 0x491   :  { %2320 = vmatprep.subr.mxu1 %v3400_v19  ;;  %1890 = vmatprep.subr.mxu0 %v2785_v41 }
 0x492   :  { %2321 = vmatpush3.msra.mxu1 %v2751_v28  ;;  %1891 = vmatpush3.msra.mxu0 %v2789_v42  ;;  %v3401_v28 = vld [vmem:[#allocation18_spill] sm:$0xff] }
 0x493   :  { %2322 = vmatprep.subr.mxu1 %v3400_v19  ;;  %1892 = vmatprep.subr.mxu0 %v2793_v43 }
 0x494   :  { %2323 = vmatpush3.msra.mxu1 %v2756_v31  ;;  %1893 = vmatpush3.msra.mxu0 %v2797_v44  ;;  %v224_v31 = vadd.f32 %v3401_v28, %v2903_v23  ;;  %v2454_v44 = vld [vmem:[#allocation9 + $0x18] sm:$0xff] }
 0x495   :  { %2324 = vmatprep.subr.mxu1 %v3400_v19  ;;  %1894 = vmatprep.subr.mxu0 %v2801_v45  ;;  %v3321_v45 = vld [vmem:[#allocation10 + $0x78] sm:$0xff] }
 0x496   :  { %2325 = vmatpush3.msra.mxu1 %v2759_v33  ;;  %1895 = vmatpush3.msra.mxu0 %v2833_v46  ;;  %v2456_v46 = vld [vmem:[#allocation9 + $0x10] sm:$0xff] }
 0x497   :  { %1896 = vmatprep.subr.mxu0 %v2836_v47  ;;  %2329 = vmatprep.subr.mxu1 %v3400_v19  ;;  %v3324_v47 = vld [vmem:[#allocation10 + $0xf0] sm:$0xff] }
 0x498   :  { %1897 = vmatpush3.msra.mxu0 %v2839_v48  ;;  %v3328_v48 = vld [vmem:[#allocation10 + $0x70] sm:$0xff] }
 0x499   :  { %1898 = vmatprep.subr.mxu0 %v2842_v49  ;;  %v2459_v49 = vld [vmem:[#allocation9 + $0x8] sm:$0xff] }
 0x49a   :  { %1899 = vmatpush3.msra.mxu0 %v2845_v50  ;;  %v3331_v50 = vld [vmem:[#allocation10 + $0xe8] sm:$0xff] }
 0x49b   :  { %1900 = vmatprep.subr.mxu0 %v2848_v51  ;;  %v2461_v51 = vld [vmem:[#allocation10 + $0x68] sm:$0xff] }
 0x49c   :  { %1901 = vmatpush3.msra.mxu0 %v2851_v53 }
 0x49d   :  { %1902 = vmatprep.subr.mxu0 %v2854_v55 }
 0x49e   :  { %1903 = vmatpush3.msra.mxu0 %v2857_v56 }
 0x49f   :  { %1904 = vmatprep.subr.mxu0 %v2859_v57 }
 0x4a0   :  { %1905 = vmatpush3.msra.mxu0 %v2862_v59 }
 0x4a1   :  { %1906 = vmatprep.subr.mxu0 %v2864_v61 }
 0x4a2   :  { %1907 = vmatpush3.msra.mxu0 %v2867_v62 }
 0x4a3   :  { %1908 = vmatprep.subr.mxu0 %v2870_v1 }
 0x4a4   :  { %1909 = vmatpush3.msra.mxu0 %v2873_v2 }
 0x4a5   :  { %1910 = vmatprep.subr.mxu0 %v2876_v7 }
 0x4a6   :  { %1911 = vmatpush3.msra.mxu0 %v2879_v9 }
 0x4a7   :  { %1912 = vmatprep.subr.mxu0 %v2882_v11 }
 0x4a8   :  { %1913 = vmatpush3.msra.mxu0 %v2885_v13 }
 0x4a9   :  { %1914 = vmatprep.subr.mxu0 %v2888_v15 }
 0x4aa   :  { %1915 = vmatpush3.msra.mxu0 %v2892_v17 }
 0x4ab   :  { %1936 = vmatprep.subr.mxu0 %v3288_v26 }
 0x537   :  { %v1096_v33 = vpop.f32.mrf.mxu1 }
 0x538   :  { %v1100_v36 = vadd.f32 %v1096_v33, %v224_v31  ;;  %v2489_v33 = vld [vmem:[%s3392_s4] ss:$0 sm:$0xff] }
 0x539   :  { %v2293_v37 = vpop.f32.mrf.mxu1 }
 0x53a   :  { %2427 = vtanh.f32 %v1100_v36  ;;  %v3402_v36 = vld [vmem:[#allocation19_spill] sm:$0xff] }
 0x53b   :  { %v234_v37 = vadd.f32 %v2489_v33, %v3402_v36 }
 0x547   :  { %v2428_v38 = vpop.eup %2427 }
 0x548   :  { %2327 = vmatmul.mubr.f32.vlgmr.msra.gmra.mxu1 %v2428_v38 }
 0x549   :  { %2330 = vmatpush3.msra.mxu1 %v3198_v20  ;;  %2361 = vmatprep.mubr.msk.f32.mxu1 %vm2626_vm0, %v3400_v19  ;;  %v2473_v20 = vld [vmem:[#allocation10 + $0xb8] sm:$0xff] }
 0x54a   :  { %2331 = vmatprep.subr.mxu1 %v3400_v19 }
 0x54b   :  { %v1864_v39 = vpop.f32.mrf.mxu0  ;;  %2332 = vmatpush3.msra.mxu1 %v3205_v24  ;;  %v2482_v24 = vld [vmem:[#allocation10 + $0x18] sm:$0xff] }
 0x54c   :  { %2333 = vmatprep.subr.mxu1 %v3400_v19 }
 0x54d   :  { %v1865_v40 = vpop.f32.mrf.mxu0  ;;  %2334 = vmatpush3.msra.mxu1 %v3209_v35  ;;  %v2483_v35 = vld [vmem:[#allocation10 + $0x90] sm:$0xff] }
 0x54e   :  { %v1866_v41 = vadd.f32 %v1865_v40, %v1864_v39  ;;  %2335 = vmatprep.subr.mxu1 %v3400_v19 }
 0x54f   :  { %2336 = vmatpush3.msra.mxu1 %v3213_v34  ;;  %v2484_v34 = vld [vmem:[#allocation10 + $0x10] sm:$0xff] }
 0x550   :  { %v1024_v42 = vadd.f32 %v1866_v41, %v2989_v29  ;;  %2337 = vmatprep.subr.mxu1 %v3400_v19 }
 0x551   :  { %2338 = vmatpush3.msra.mxu1 %v3217_v58  ;;  %v2485_v58 = vld [vmem:[#allocation10 + $0x88] sm:$0xff] }
 0x552   :  { %2429 = vtanh.f32 %v1024_v42  ;;  %2339 = vmatprep.subr.mxu1 %v3400_v19 }
 0x553   :  { %2340 = vmatpush3.msra.mxu1 %v3221_v52  ;;  %v2486_v52 = vld [vmem:[#allocation10 + $0x8] sm:$0xff] }
 0x554   :  { %2341 = vmatprep.subr.mxu1 %v3400_v19 }
 0x555   :  { %2342 = vmatpush3.msra.mxu1 %v3225_v0  ;;  %v2487_v0 = vld [vmem:[#allocation10 + $0x80] sm:$0xff] }
 0x556   :  { %2343 = vmatprep.subr.mxu1 %v3400_v19 }
 0x557   :  { %2344 = vmatpush3.msra.mxu1 %v3229_v54  ;;  %v2488_v54 = vld [vmem:[#allocation10] sm:$0xff] }
 0x558   :  { %2345 = vmatprep.subr.mxu1 %v3400_v19 }
 0x559   :  { %2346 = vmatpush3.msra.mxu1 %v3233_v60  ;;  %v1483_v60 = vld [vmem:[#allocation12 + $0x78] sm:$0xff] }
 0x55a   :  { %2347 = vmatprep.subr.mxu1 %v3400_v19 }
 0x55b   :  { %2348 = vmatpush3.msra.mxu1 %v3237_v25  ;;  %v1481_v25 = vld [vmem:[#allocation12 + $0x68] sm:$0xff] }
 0x55c   :  { %2349 = vmatprep.subr.mxu1 %v3400_v19 }
 0x55d   :  { %2350 = vmatpush3.msra.mxu1 %v3241_v27  ;;  %v1480_v27 = vld [vmem:[#allocation12 + $0x60] sm:$0xff] }
 0x55e   :  { %2351 = vmatprep.subr.mxu1 %v3400_v19 }
 0x55f   :  { %v2430_v43 = vpop.eup %2429  ;;  %2352 = vmatpush3.msra.mxu1 %v3247_v30  ;;  %v1479_v30 = vld [vmem:[#allocation12 + $0x58] sm:$0xff] }
 0x560   :  { %1166 = vmatprep.mubr.f32.mxu0 %v2430_v43  ;;  %2353 = vmatprep.subr.mxu1 %v3400_v19 }
 0x561   :  { %1167 = vmatmul.mubr.f32.vlgmr.msra.gmra.mxu0 %v2428_v38  ;;  %2354 = vmatpush3.msra.mxu1 %v2454_v44  ;;  %v1478_v44 = vld [vmem:[#allocation12 + $0x50] sm:$0xff] }
 0x562   :  { %2355 = vmatprep.subr.mxu1 %v3400_v19  ;;  %1937 = vmatpush3.msra.mxu0 %v3321_v45 }
 0x563   :  { %2356 = vmatpush3.msra.mxu1 %v2456_v46  ;;  %1938 = vmatprep.subr.mxu0 %v3324_v47  ;;  %v1476_v46 = vld [vmem:[#allocation12 + $0x40] sm:$0xff] }
 0x564   :  { %2357 = vmatprep.subr.mxu1 %v3400_v19  ;;  %1939 = vmatpush3.msra.mxu0 %v3328_v48 }
 0x565   :  { %2358 = vmatpush3.msra.mxu1 %v2459_v49  ;;  %1940 = vmatprep.subr.mxu0 %v3331_v50  ;;  %v1473_v49 = vld [vmem:[#allocation12 + $0x28] sm:$0xff] }
 0x566   :  { %2359 = vmatprep.subr.mxu1 %v3400_v19  ;;  %1941 = vmatpush3.msra.mxu0 %v2461_v51 }
 0x567   :  { %2360 = vmatpush3.msra.mxu1 %v2462_v32  ;;  %1942 = vmatprep.subr.mxu0 %v2463_v5  ;;  %v1470_v32 = vld [vmem:[#allocation12 + $0x10] sm:$0xff] }
 0x568   :  { %1943 = vmatpush3.msra.mxu0 %v2464_v3  ;;  %2364 = vmatprep.subr.mxu1 %v3400_v19 }
 0x569   :  { %1944 = vmatprep.subr.mxu0 %v2465_v4 }
 0x56a   :  { %1945 = vmatpush3.msra.mxu0 %v2466_v6 }
 0x56b   :  { %1946 = vmatprep.subr.mxu0 %v2467_v8 }
 0x56c   :  { %1947 = vmatpush3.msra.mxu0 %v2468_v10 }
 0x56d   :  { %1948 = vmatprep.subr.mxu0 %v2469_v12 }
 0x56e   :  { %1949 = vmatpush3.msra.mxu0 %v2470_v14 }
 0x56f   :  { %1950 = vmatprep.subr.mxu0 %v2471_v16 }
 0x570   :  { %1951 = vmatpush3.msra.mxu0 %v2472_v18 }
 0x571   :  { %1952 = vmatprep.subr.mxu0 %v2473_v20 }
 0x572   :  { %1953 = vmatpush3.msra.mxu0 %v2851_v53  ;;  %v229_v53 = vadd.f32 %v2903_v23, %v2982_v63  ;;  %v2479_v23 = vld [vmem:[#allocation10 + $0xa0] sm:$0xff] }
 0x573   :  { %1954 = vmatprep.subr.mxu0 %v2854_v55  ;;  %v2480_v63 = vld [vmem:[#allocation10 + $0x20] sm:$0xff] }
 0x574   :  { %1955 = vmatpush3.msra.mxu0 %v2857_v56 }
 0x575   :  { %1956 = vmatprep.subr.mxu0 %v2859_v57 }
 0x576   :  { %1957 = vmatpush3.msra.mxu0 %v2862_v59 }
 0x577   :  { %1958 = vmatprep.subr.mxu0 %v2864_v61 }
 0x578   :  { %1959 = vmatpush3.msra.mxu0 %v2867_v62 }
 0x579   :  { %1960 = vmatprep.subr.mxu0 %v2870_v1 }
 0x57a   :  { %1961 = vmatpush3.msra.mxu0 %v2873_v2 }
 0x57b   :  { %1962 = vmatprep.subr.mxu0 %v2876_v7 }
 0x57c   :  { %1963 = vmatpush3.msra.mxu0 %v2879_v9  ;;  %v2474_v9 = vld [vmem:[#allocation10 + $0x38] sm:$0xff] }
 0x57d   :  { %1964 = vmatprep.subr.mxu0 %v2882_v11  ;;  %v2475_v11 = vld [vmem:[#allocation10 + $0xb0] sm:$0xff] }
 0x57e   :  { %1965 = vmatpush3.msra.mxu0 %v2885_v13  ;;  %v2476_v13 = vld [vmem:[#allocation10 + $0x30] sm:$0xff] }
 0x57f   :  { %1966 = vmatprep.subr.mxu0 %v2888_v15  ;;  %v2477_v15 = vld [vmem:[#allocation10 + $0xa8] sm:$0xff] }
 0x580   :  { %1967 = vmatpush3.msra.mxu0 %v2892_v17  ;;  %v2478_v17 = vld [vmem:[#allocation10 + $0x28] sm:$0xff] }
 0x581   :  { %1988 = vmatprep.subr.mxu0 %v3288_v26 }
 0x608   :  { %v1241_v55 = vpop.f32.mrf.mxu1 }
 0x609   :  { %v1245_v56 = vadd.f32 %v1241_v55, %v229_v53 }
 0x60a   :  { %v2328_v57 = vpop.f32.mrf.mxu1 }
 0x60b   :  { %2431 = vtanh.f32 %v1245_v56 }
 0x618   :  { %v2432_v59 = vpop.eup %2431 }
 0x619   :  { %2362 = vmatmul.mubr.f32.vlgmr.msra.gmra.mxu1 %v2432_v59 }
 0x61a   :  { %2396 = vmatprep.mubr.msk.f32.mxu1 %vm2626_vm0, %v3400_v19  ;;  %2365 = vmatpush3.msra.mxu1 %v1483_v60 }
 0x61b   :  { %2366 = vmatprep.subr.mxu1 %v3400_v19 }
 0x61c   :  { %2367 = vmatpush3.msra.mxu1 %v1482_v21 }
 0x61d   :  { %2368 = vmatprep.subr.mxu1 %v3400_v19 }
 0x61e   :  { %2369 = vmatpush3.msra.mxu1 %v1481_v25 }
 0x61f   :  { %2370 = vmatprep.subr.mxu1 %v3400_v19 }
 0x620   :  { %2371 = vmatpush3.msra.mxu1 %v1480_v27 }
 0x621   :  { %v1916_v61 = vpop.f32.mrf.mxu0  ;;  %2372 = vmatprep.subr.mxu1 %v3400_v19 }
 0x622   :  { %2373 = vmatpush3.msra.mxu1 %v1479_v30 }
 0x623   :  { %v1917_v62 = vpop.f32.mrf.mxu0  ;;  %2374 = vmatprep.subr.mxu1 %v3400_v19 }
 0x624   :  { %v1918_v1 = vadd.f32 %v1917_v62, %v1916_v61  ;;  %2375 = vmatpush3.msra.mxu1 %v1478_v44 }
 0x625   :  { %2376 = vmatprep.subr.mxu1 %v3400_v19 }
 0x626   :  { %v1169_v2 = vadd.f32 %v1918_v1, %v2989_v29 }
 0x628   :  { %2433 = vtanh.f32 %v1169_v2 }
 0x635   :  { %v2434_v7 = vpop.eup %2433 }
 0x636   :  { %1311 = vmatprep.mubr.f32.mxu0 %v2434_v7 }
 0x637   :  { %1312 = vmatmul.mubr.f32.vlgmr.msra.gmra.mxu0 %v2432_v59 }
 0x638   :  { %1989 = vmatpush3.msra.mxu0 %v3321_v45  ;;  %v1477_v45 = vld [vmem:[#allocation12 + $0x48] sm:$0xff] }
 0x639   :  { %1990 = vmatprep.subr.mxu0 %v3324_v47  ;;  %2377 = vmatpush3.msra.mxu1 %v1477_v45  ;;  %v1475_v47 = vld [vmem:[#allocation12 + $0x38] sm:$0xff] }
 0x63a   :  { %1991 = vmatpush3.msra.mxu0 %v3328_v48  ;;  %2378 = vmatprep.subr.mxu1 %v3400_v19  ;;  %v1474_v48 = vld [vmem:[#allocation12 + $0x30] sm:$0xff] }
 0x63b   :  { %1992 = vmatprep.subr.mxu0 %v3331_v50  ;;  %2379 = vmatpush3.msra.mxu1 %v1476_v46  ;;  %v1472_v50 = vld [vmem:[#allocation12 + $0x20] sm:$0xff] }
 0x63c   :  { %1993 = vmatpush3.msra.mxu0 %v2461_v51  ;;  %2380 = vmatprep.subr.mxu1 %v3400_v19  ;;  %v1471_v51 = vld [vmem:[#allocation12 + $0x18] sm:$0xff] }
 0x63d   :  { %1994 = vmatprep.subr.mxu0 %v2463_v5  ;;  %2381 = vmatpush3.msra.mxu1 %v1475_v47  ;;  %v1469_v5 = vld [vmem:[#allocation12 + $0x8] sm:$0xff] }
 0x63e   :  { %1995 = vmatpush3.msra.mxu0 %v2464_v3  ;;  %2382 = vmatprep.subr.mxu1 %v3400_v19  ;;  %v1468_v3 = vld [vmem:[#allocation12] sm:$0xff] }
 0x63f   :  { %1996 = vmatprep.subr.mxu0 %v2465_v4  ;;  %2383 = vmatpush3.msra.mxu1 %v1474_v48 }
 0x640   :  { %1997 = vmatpush3.msra.mxu0 %v2466_v6  ;;  %2384 = vmatprep.subr.mxu1 %v3400_v19 }
 0x641   :  { %1998 = vmatprep.subr.mxu0 %v2467_v8  ;;  %2385 = vmatpush3.msra.mxu1 %v1473_v49 }
 0x642   :  { %1999 = vmatpush3.msra.mxu0 %v2468_v10  ;;  %2386 = vmatprep.subr.mxu1 %v3400_v19 }
 0x643   :  { %2000 = vmatprep.subr.mxu0 %v2469_v12  ;;  %2387 = vmatpush3.msra.mxu1 %v1472_v50 }
 0x644   :  { %2001 = vmatpush3.msra.mxu0 %v2470_v14  ;;  %2388 = vmatprep.subr.mxu1 %v3400_v19  ;;  %v1582_v14 = vld [vmem:[%s3394_s6] ss:$0 sm:$0xff] }
 0x645   :  { %2002 = vmatprep.subr.mxu0 %v2471_v16  ;;  %2389 = vmatpush3.msra.mxu1 %v1471_v51 }
 0x646   :  { %2003 = vmatpush3.msra.mxu0 %v2472_v18  ;;  %2390 = vmatprep.subr.mxu1 %v3400_v19 }
 0x647   :  { %2004 = vmatprep.subr.mxu0 %v2473_v20  ;;  %2391 = vmatpush3.msra.mxu1 %v1470_v32 }
 0x648   :  { %2005 = vmatpush3.msra.mxu0 %v2474_v9  ;;  %2392 = vmatprep.subr.mxu1 %v3400_v19 }
 0x649   :  { %2006 = vmatprep.subr.mxu0 %v2475_v11  ;;  %2393 = vmatpush3.msra.mxu1 %v1469_v5 }
 0x64a   :  { %2007 = vmatpush3.msra.mxu0 %v2476_v13  ;;  %2394 = vmatprep.subr.mxu1 %v3400_v19 }
 0x64b   :  { %2008 = vmatprep.subr.mxu0 %v2477_v15  ;;  %2395 = vmatpush3.msra.mxu1 %v1468_v3 }
 0x64c   :  { %2009 = vmatpush3.msra.mxu0 %v2478_v17 }
 0x64d   :  { %2010 = vmatprep.subr.mxu0 %v2479_v23 }
 0x64e   :  { %2011 = vmatpush3.msra.mxu0 %v2480_v63 }
 0x64f   :  { %2012 = vmatprep.subr.mxu0 %v2481_v22 }
 0x650   :  { %2013 = vmatpush3.msra.mxu0 %v2482_v24 }
 0x651   :  { %2014 = vmatprep.subr.mxu0 %v2483_v35 }
 0x652   :  { %2015 = vmatpush3.msra.mxu0 %v2484_v34 }
 0x653   :  { %2016 = vmatprep.subr.mxu0 %v2485_v58 }
 0x654   :  { %2017 = vmatpush3.msra.mxu0 %v2486_v52 }
 0x655   :  { %2018 = vmatprep.subr.mxu0 %v2487_v0 }
 0x656   :  { %2019 = vmatpush3.msra.mxu0 %v2488_v54 }
 0x6d9   :  { %v1386_v26 = vpop.f32.mrf.mxu1 }
 0x6da   :  { %v1390_v40 = vadd.f32 %v1386_v26, %v234_v37 }
 0x6db   :  { %v2363_v28 = vpop.f32.mrf.mxu1 }
 0x6f7   :  { %v1968_v31 = vpop.f32.mrf.mxu0 }
 0x6f9   :  { %v1969_v38 = vpop.f32.mrf.mxu0 }
 0x6fa   :  { %v1970_v39 = vadd.f32 %v1969_v38, %v1968_v31 }
 0x6fc   :  { %v1314_v41 = vadd.f32 %v1970_v39, %v2989_v29 }
 0x6fe   :  { %2435 = vtanh.f32 %v1314_v41 }
 0x6ff   :  { %2437 = vtanh.f32 %v1390_v40 }
 0x70b   :  { %v2436_v42 = vpop.eup %2435 }
 0x70c   :  { %v2438_v43 = vpop.eup %2437  ;;  %1456 = vmatprep.mubr.f32.mxu0 %v2436_v42 }
 0x70d   :  { %1457 = vmatmul.mubr.f32.vlgmr.msra.gmra.mxu0 %v2438_v43 }
 0x7cd   :  { %v2020_v4 = vpop.f32.mrf.mxu0 }
 0x7cf   :  { %v2021_v6 = vpop.f32.mrf.mxu0 }
 0x7d0   :  { %v2022_v8 = vadd.f32 %v2021_v6, %v2020_v4 }
 0x7d2   :  { %v1459_v10 = vadd.f32 %v2022_v8, %v2989_v29 }
 0x7d4   :  { %2439 = vtanh.f32 %v1459_v10 }
 0x7e1   :  { %v2440_v12 = vpop.eup %2439 }
 0x7e2   :  { %2397 = vmatmul.mubr.f32.vlgmr.msra.gmra.mxu1 %v2440_v12 }
 0x8a2   :  { %v1557_v16 = vpop.f32.mrf.mxu1 }
 0x8a3   :  { %v1558_v18 = vadd.f32 %v1582_v14, %v1557_v16 }
 0x8a4   :  { %v2398_v20 = vpop.f32.mrf.mxu1 }
 0x8a5   :  { %1561 = vst [vmem:[#allocation13] sm:$0xff] %v1558_v18 }
 0x8a6   :  { %2601 = shalt.err (!%p2598_p1)
}
 0x8a7   :  { %1571 = dma.vmem_to_hbm [thread:$0]  %s1569_s8, 128, %s3395_s7, [#allocation6]  }
 0x8a8   :  { %2616 = dma.done.wait [#allocation6], 128  }
 0x8a9   :  { %2617 = vsyncadd [#allocation6], 4294967168 }
 0x8aa   :  { %1575 = vsyncpa [#allocation5], 1 }
 0x8ab   :  { %1576 = vsyncpa [#allocation8], 1 }
 0x8ac   :  { %1577 = vsyncpa [#allocation11], 1 }
 0x8ad   :  { %1578 = vsyncpa [#allocation6], 1 }

// kernel: tpu_custom_call.1
= control target key start
LH: loop header
LB: loop body
LE: loop exit
PB: predicated region body
PF: predicated region fallthrough
CT: control target
= control target key end

     0   :  { %12 = vsyncpa [#allocation5], 0  ;;  %s3388_s0 = inlined_call_operand.hbm [shape: f32[8,8,128], index: 0, kind: input, shape index: {}]   ;;  %s3389_s1 = inlined_call_operand.hbm [shape: f32[128,128], index: 1, kind: input, shape index: {}]   ;;  %s3390_s2 = inlined_call_operand.hbm [shape: f32[128,128], index: 2, kind: input, shape index: {}]   ;;  %s3391_s3 = inlined_call_operand.hbm [shape: f32[1,256,128], index: 3, kind: input, shape index: {}]   ;;  %s3392_s4 = inlined_call_operand.vmem [shape: f32[2,1,128], index: 4, kind: input, shape index: {}]   ;;  %s3393_s5 = inlined_call_operand.hbm [shape: f32[128,128], index: 5, kind: input, shape index: {}]   ;;  %s3394_s6 = inlined_call_operand.vmem [shape: f32[1,128], index: 6, kind: input, shape index: {}]   ;;  %s3395_s7 = inlined_call_operand.hbm [shape: f32[8,128], index: 7, kind: output, shape index: {}]  }
   0x1   :  { %13 = vsyncpa [#allocation8], 0 }
   0x2   :  { %14 = vsyncpa [#allocation11], 0 }
   0x3   :  { %15 = vsyncpa [#allocation6], 0  ;;  %s2618_s24 = smov [#allocation7]   ;;  %s2619_s26 = smov [#allocation10]  }
   0x4   :  { %s33_s25 = sshll.u32 %s2618_s24, 4  ;;  %s57_s27 = sshll.u32 %s2619_s26, 4  ;;  %s34_s25 = int_to_ptr.vmem [resolvable:$true] %s33_s25  ;;  %s58_s27 = int_to_ptr.vmem [resolvable:$true] %s57_s27 }
   0x5   :  { %s2498_s28 = scalar_lea.vmem %s34_s25, 2048  ;;  %p2503_p1 = scmp.lt.s32.totalorder %s34_s25, %s34_s25 }
   0x6   :  { %p2499_p0 = scmp.ne.s32.totalorder %s34_s25, %s2498_s28  ;;  %p2504_p2 = scmp.lt.s32.totalorder %s2498_s28, %s2498_s28 }
   0x8   :  { %p2505_p3 = por %p2504_p2, %p2503_p1 }
   0xa   :  { %p2506_p4 = pnand %p2505_p3, %p2499_p0 }
   0xc   :  { %2509 = shalt.err (!%p2506_p4)
}
   0xd   :  { %s2620_s29 = smov 128   ;;  %s2621_s30 = smov 8  }
   0xe   :  { %39 = dma.hbm_to_vmem [thread:$0]  %s3389_s1, 2048, %s34_s25, [#allocation8], %s2620_s29, %s2620_s29, %s2621_s30  }
   0xf   :  { %s2518_s10 = scalar_lea.vmem %s58_s27, 4096  ;;  %p2523_p6 = scmp.lt.s32.totalorder %s58_s27, %s58_s27 }
  0x10   :  { %p2519_p5 = scmp.ne.s32.totalorder %s58_s27, %s2518_s10  ;;  %p2524_p7 = scmp.lt.s32.totalorder %s2518_s10, %s2518_s10 }
  0x12   :  { %p2525_p8 = por %p2524_p7, %p2523_p6 }
  0x14   :  { %p2526_p9 = pnand %p2525_p8, %p2519_p5 }
  0x16   :  { %2529 = shalt.err (!%p2526_p9)
}
  0x17   :  { %63 = dma.hbm_to_vmem [thread:$0]  %s3391_s3, 4096, %s58_s27, [#allocation11], %s2620_s29, %s2620_s29, %s2621_s30  }
  0x18   :  { %s2622_s13 = smov [#allocation4]   ;;  %s2623_s15 = smov [#allocation9]  }
  0x19   :  { %s21_s14 = sshll.u32 %s2622_s13, 4  ;;  %s45_s16 = sshll.u32 %s2623_s15, 4  ;;  %s22_s14 = int_to_ptr.vmem [resolvable:$true] %s21_s14  ;;  %s46_s16 = int_to_ptr.vmem [resolvable:$true] %s45_s16 }
  0x1a   :  { %s2538_s1 = scalar_lea.vmem %s22_s14, 1024  ;;  %p2543_p11 = scmp.lt.s32.totalorder %s22_s14, %s22_s14 }
  0x1b   :  { %p2539_p10 = scmp.ne.s32.totalorder %s22_s14, %s2538_s1  ;;  %p2544_p12 = scmp.lt.s32.totalorder %s2538_s1, %s2538_s1 }
  0x1d   :  { %p2545_p13 = por %p2544_p12, %p2543_p11 }
  0x1f   :  { %p2546_p0 = pnand %p2545_p13, %p2539_p10 }
  0x21   :  { %2549 = shalt.err (!%p2546_p0)
}
  0x22   :  { %27 = dma.hbm_to_vmem [thread:$0]  %s3388_s0, 1024, %s22_s14, [#allocation5], %s2620_s29, %s2620_s29, %s2621_s30  }
  0x23   :  { %s2558_s3 = scalar_lea.vmem %s46_s16, 2048  ;;  %p2563_p2 = scmp.lt.s32.totalorder %s46_s16, %s46_s16 }
  0x24   :  { %p2559_p1 = scmp.ne.s32.totalorder %s46_s16, %s2558_s3  ;;  %p2564_p3 = scmp.lt.s32.totalorder %s2558_s3, %s2558_s3 }
  0x26   :  { %p2565_p4 = por %p2564_p3, %p2563_p2 }
  0x28   :  { %p2566_p5 = pnand %p2565_p4, %p2559_p1 }
  0x2a   :  { %2569 = shalt.err (!%p2566_p5)
}
  0x2b   :  { %51 = dma.hbm_to_vmem [thread:$0]  %s3390_s2, 2048, %s46_s16, [#allocation8], %s2620_s29, %s2620_s29, %s2621_s30  }
  0x2c   :  { %s2624_s21 = smov [#allocation12]  }
  0x2d   :  { %s71_s22 = sshll.u32 %s2624_s21, 4  ;;  %s72_s22 = int_to_ptr.vmem [resolvable:$true] %s71_s22 }
  0x2e   :  { %s2578_s23 = scalar_lea.vmem %s72_s22, 2048  ;;  %p2583_p7 = scmp.lt.s32.totalorder %s72_s22, %s72_s22 }
  0x2f   :  { %p2579_p6 = scmp.ne.s32.totalorder %s72_s22, %s2578_s23  ;;  %p2584_p8 = scmp.lt.s32.totalorder %s2578_s23, %s2578_s23 }
  0x31   :  { %p2585_p9 = por %p2584_p8, %p2583_p7 }
  0x33   :  { %p2586_p10 = pnand %p2585_p9, %p2579_p6 }
  0x35   :  { %2589 = shalt.err (!%p2586_p10)
}
  0x36   :  { %77 = dma.hbm_to_vmem [thread:$0]  %s3393_s5, 2048, %s72_s22, [#allocation11], %s2620_s29, %s2620_s29, %s2621_s30  }
  0x37   :  { %2610 = dma.done.wait [#allocation5], 1024  }
  0x38   :  { %2611 = vsyncadd [#allocation5], 4294966272 }
  0x39   :  { %2612 = dma.done.wait [#allocation8], 4096  }
  0x3a   :  { %2613 = vsyncadd [#allocation8], 4294963200 }
  0x3b   :  { %2614 = dma.done.wait [#allocation11], 6144  }
  0x3c   :  { %2615 = vsyncadd [#allocation11], 4294961152  ;;  %v3396_v0 = vmov 0.0   ;;  %vm2626_vm0 = vmmov 0   ;;  %v124_v1 = vld [vmem:[#allocation7 + $0x78] sm:$0xff]  ;;  %v123_v2 = vld [vmem:[#allocation7 + $0x70] sm:$0xff] }
  0x3d   :  { %2084 = vmatprep.subr.mxu1 %v3396_v0  ;;  %2116 = vmatprep.mubr.msk.f32.mxu1 %vm2626_vm0, %v3396_v0  ;;  %v2701_v3 = vld [vmem:[#allocation9 + $0x78] sm:$0xff]  ;;  %v2704_v4 = vld [vmem:[#allocation9 + $0x70] sm:$0xff]  ;;  %v122_v5 = vld [vmem:[#allocation7 + $0x68] sm:$0xff]  ;;  %s2627_s30 = smov [#allocation13]  }
  0x3e   :  { %2040 = vmatprep.subr.mxu0 %v124_v1  ;;  %2085 = vmatpush3.msra.mxu1 %v2701_v3  ;;  %v2707_v6 = vld [vmem:[#allocation9 + $0x68] sm:$0xff]  ;;  %v121_v7 = vld [vmem:[#allocation7 + $0x60] sm:$0xff]  ;;  %v120_v9 = vld [vmem:[#allocation7 + $0x58] sm:$0xff]  ;;  %s1568_s8 = sshll.u32 %s2627_s30, 4  ;;  %s1569_s8 = int_to_ptr.vmem [resolvable:$true] %s1568_s8 }
  0x3f   :  { %2041 = vmatpush3.msra.mxu0 %v124_v1  ;;  %2086 = vmatprep.subr.mxu1 %v3396_v0  ;;  %v2711_v8 = vld [vmem:[#allocation9 + $0x60] sm:$0xff]  ;;  %v2715_v10 = vld [vmem:[#allocation9 + $0x58] sm:$0xff]  ;;  %v119_v11 = vld [vmem:[#allocation7 + $0x50] sm:$0xff]  ;;  %s2590_s9 = scalar_lea.vmem %s1569_s8, 128  ;;  %p2595_p12 = scmp.lt.s32.totalorder %s1569_s8, %s1569_s8 }
  0x40   :  { %2042 = vmatprep.subr.mxu0 %v123_v2  ;;  %2087 = vmatpush3.msra.mxu1 %v2704_v4  ;;  %v2719_v12 = vld [vmem:[#allocation9 + $0x50] sm:$0xff]  ;;  %v118_v13 = vld [vmem:[#allocation7 + $0x48] sm:$0xff]  ;;  %v117_v15 = vld [vmem:[#allocation7 + $0x40] sm:$0xff]  ;;  %p2591_p11 = scmp.ne.s32.totalorder %s1569_s8, %s2590_s9  ;;  %p2596_p13 = scmp.lt.s32.totalorder %s2590_s9, %s2590_s9 }
  0x41   :  { %2043 = vmatpush3.msra.mxu0 %v123_v2  ;;  %2088 = vmatprep.subr.mxu1 %v3396_v0  ;;  %v2723_v14 = vld [vmem:[#allocation9 + $0x48] sm:$0xff]  ;;  %v2727_v16 = vld [vmem:[#allocation9 + $0x40] sm:$0xff]  ;;  %v116_v17 = vld [vmem:[#allocation7 + $0x38] sm:$0xff] }
  0x42   :  { %2044 = vmatprep.subr.mxu0 %v122_v5  ;;  %2089 = vmatpush3.msra.mxu1 %v2707_v6  ;;  %v2731_v18 = vld [vmem:[#allocation9 + $0x38] sm:$0xff]  ;;  %v115_v19 = vld [vmem:[#allocation7 + $0x30] sm:$0xff]  ;;  %v114_v21 = vld [vmem:[#allocation7 + $0x28] sm:$0xff]  ;;  %p2597_p0 = por %p2596_p13, %p2595_p12 }
  0x43   :  { %2045 = vmatpush3.msra.mxu0 %v122_v5  ;;  %2090 = vmatprep.subr.mxu1 %v3396_v0  ;;  %v2735_v20 = vld [vmem:[#allocation9 + $0x30] sm:$0xff]  ;;  %v2739_v22 = vld [vmem:[#allocation9 + $0x28] sm:$0xff]  ;;  %v113_v23 = vld [vmem:[#allocation7 + $0x20] sm:$0xff] }
  0x44   :  { %2046 = vmatprep.subr.mxu0 %v121_v7  ;;  %2091 = vmatpush3.msra.mxu1 %v2711_v8  ;;  %v2743_v24 = vld [vmem:[#allocation9 + $0x20] sm:$0xff]  ;;  %v112_v25 = vld [vmem:[#allocation7 + $0x18] sm:$0xff]  ;;  %v111_v27 = vld [vmem:[#allocation7 + $0x10] sm:$0xff]  ;;  %p2598_p1 = pnand %p2597_p0, %p2591_p11 }
  0x45   :  { %2047 = vmatpush3.msra.mxu0 %v121_v7  ;;  %2092 = vmatprep.subr.mxu1 %v3396_v0  ;;  %v2747_v26 = vld [vmem:[#allocation9 + $0x18] sm:$0xff]  ;;  %v2751_v28 = vld [vmem:[#allocation9 + $0x10] sm:$0xff]  ;;  %v110_v29 = vld [vmem:[#allocation7 + $0x8] sm:$0xff] }
  0x46   :  { %2048 = vmatprep.subr.mxu0 %v120_v9  ;;  %2093 = vmatpush3.msra.mxu1 %v2715_v10  ;;  %v101_v30 = vld [vmem:[#allocation4] sm:$0xff]  ;;  %v2756_v31 = vld [vmem:[#allocation9 + $0x8] sm:$0xff]  ;;  %v2763_v35 = vld [vmem:[#allocation10 + $0xf8] sm:$0xff] }
  0x47   :  { %2049 = vmatpush3.msra.mxu0 %v120_v9  ;;  %2094 = vmatprep.subr.mxu1 %v3396_v0  ;;  %v109_v32 = vld [vmem:[#allocation7] sm:$0xff]  ;;  %v102_v34 = vld [vmem:[#allocation4 + $0x8] sm:$0xff]  ;;  %v2766_v36 = vld [vmem:[#allocation10 + $0x78] sm:$0xff] }
  0x48   :  { %2050 = vmatprep.subr.mxu0 %v119_v11  ;;  %2095 = vmatpush3.msra.mxu1 %v2719_v12  ;;  %v2759_v33 = vld [vmem:[#allocation9] sm:$0xff]  ;;  %v2769_v37 = vld [vmem:[#allocation10 + $0xf0] sm:$0xff]  ;;  %v2777_v39 = vld [vmem:[#allocation10 + $0xe8] sm:$0xff] }
  0x49   :  { %2051 = vmatpush3.msra.mxu0 %v119_v11  ;;  %2096 = vmatprep.subr.mxu1 %v3396_v0  ;;  %v2773_v38 = vld [vmem:[#allocation10 + $0x70] sm:$0xff]  ;;  %v2781_v40 = vld [vmem:[#allocation10 + $0x68] sm:$0xff]  ;;  %v2785_v41 = vld [vmem:[#allocation10 + $0xe0] sm:$0xff] }
  0x4a   :  { %2052 = vmatprep.subr.mxu0 %v118_v13  ;;  %2097 = vmatpush3.msra.mxu1 %v2723_v14  ;;  %v2789_v42 = vld [vmem:[#allocation10 + $0x60] sm:$0xff]  ;;  %v2793_v43 = vld [vmem:[#allocation10 + $0xd8] sm:$0xff]  ;;  %v2801_v45 = vld [vmem:[#allocation10 + $0xd0] sm:$0xff] }
  0x4b   :  { %2053 = vmatpush3.msra.mxu0 %v118_v13  ;;  %2098 = vmatprep.subr.mxu1 %v3396_v0  ;;  %v2797_v44 = vld [vmem:[#allocation10 + $0x58] sm:$0xff]  ;;  %v2833_v46 = vld [vmem:[#allocation10 + $0x50] sm:$0xff]  ;;  %v2836_v47 = vld [vmem:[#allocation10 + $0xc8] sm:$0xff] }
  0x4c   :  { %2054 = vmatprep.subr.mxu0 %v117_v15  ;;  %2099 = vmatpush3.msra.mxu1 %v2727_v16  ;;  %v2839_v48 = vld [vmem:[#allocation10 + $0x48] sm:$0xff]  ;;  %v2842_v49 = vld [vmem:[#allocation10 + $0xc0] sm:$0xff]  ;;  %v2848_v51 = vld [vmem:[#allocation10 + $0xb8] sm:$0xff] }
  0x4d   :  { %2055 = vmatpush3.msra.mxu0 %v117_v15  ;;  %2100 = vmatprep.subr.mxu1 %v3396_v0  ;;  %v2845_v50 = vld [vmem:[#allocation10 + $0x40] sm:$0xff]  ;;  %v103_v52 = vld [vmem:[#allocation4 + $0x10] sm:$0xff]  ;;  %v2851_v53 = vld [vmem:[#allocation10 + $0x38] sm:$0xff] }
  0x4e   :  { %2056 = vmatprep.subr.mxu0 %v116_v17  ;;  %2101 = vmatpush3.msra.mxu1 %v2731_v18  ;;  %v104_v54 = vld [vmem:[#allocation4 + $0x18] sm:$0xff]  ;;  %v2854_v55 = vld [vmem:[#allocation10 + $0xb0] sm:$0xff]  ;;  %v2859_v57 = vld [vmem:[#allocation10 + $0xa8] sm:$0xff] }
  0x4f   :  { %2057 = vmatpush3.msra.mxu0 %v116_v17  ;;  %2102 = vmatprep.subr.mxu1 %v3396_v0  ;;  %v2857_v56 = vld [vmem:[#allocation10 + $0x30] sm:$0xff]  ;;  %v105_v58 = vld [vmem:[#allocation4 + $0x20] sm:$0xff]  ;;  %v2862_v59 = vld [vmem:[#allocation10 + $0x28] sm:$0xff] }
  0x50   :  { %2058 = vmatprep.subr.mxu0 %v115_v19  ;;  %2103 = vmatpush3.msra.mxu1 %v2735_v20  ;;  %v106_v60 = vld [vmem:[#allocation4 + $0x28] sm:$0xff]  ;;  %v2864_v61 = vld [vmem:[#allocation10 + $0xa0] sm:$0xff]  ;;  %v107_v63 = vld [vmem:[#allocation4 + $0x30] sm:$0xff] }
  0x51   :  { %2059 = vmatpush3.msra.mxu0 %v115_v19  ;;  %2104 = vmatprep.subr.mxu1 %v3396_v0  ;;  %v2867_v62 = vld [vmem:[#allocation10 + $0x20] sm:$0xff]  ;;  %v2870_v1 = vld [vmem:[#allocation10 + $0x98] sm:$0xff]  ;;  %v2876_v7 = vld [vmem:[#allocation10 + $0x90] sm:$0xff] }
  0x52   :  { %2060 = vmatprep.subr.mxu0 %v114_v21  ;;  %2105 = vmatpush3.msra.mxu1 %v2739_v22  ;;  %v2873_v2 = vld [vmem:[#allocation10 + $0x18] sm:$0xff]  ;;  %v2879_v9 = vld [vmem:[#allocation10 + $0x10] sm:$0xff]  ;;  %v2882_v11 = vld [vmem:[#allocation10 + $0x88] sm:$0xff] }
  0x53   :  { %2061 = vmatpush3.msra.mxu0 %v114_v21  ;;  %2106 = vmatprep.subr.mxu1 %v3396_v0  ;;  %v108_v5 = vld [vmem:[#allocation4 + $0x38] sm:$0xff]  ;;  %v2885_v13 = vld [vmem:[#allocation10 + $0x8] sm:$0xff]  ;;  %v2888_v15 = vld [vmem:[#allocation10 + $0x80] sm:$0xff] }
  0x54   :  { %2062 = vmatprep.subr.mxu0 %v113_v23  ;;  %2107 = vmatpush3.msra.mxu1 %v2743_v24  ;;  %v2892_v17 = vld [vmem:[#allocation10] sm:$0xff] }
  0x55   :  { %2063 = vmatpush3.msra.mxu0 %v113_v23  ;;  %2108 = vmatprep.subr.mxu1 %v3396_v0  ;;  %v2903_v23 = vld [vmem:[%s3392_s4] ss:$0 sm:$0xff] }
  0x56   :  { %2064 = vmatprep.subr.mxu0 %v112_v25  ;;  %2109 = vmatpush3.msra.mxu1 %v2747_v26 }
  0x57   :  { %2065 = vmatpush3.msra.mxu0 %v112_v25  ;;  %2110 = vmatprep.subr.mxu1 %v3396_v0 }
  0x58   :  { %2066 = vmatprep.subr.mxu0 %v111_v27  ;;  %2111 = vmatpush3.msra.mxu1 %v2751_v28 }
  0x59   :  { %2067 = vmatpush3.msra.mxu0 %v111_v27  ;;  %2112 = vmatprep.subr.mxu1 %v3396_v0 }
  0x5a   :  { %2068 = vmatprep.subr.mxu0 %v110_v29  ;;  %2072 = vmatprep.mubr.f32.mxu0 %v101_v30 }
  0x5b   :  { %2069 = vmatpush3.msra.mxu0 %v110_v29  ;;  %2113 = vmatpush3.msra.mxu1 %v2756_v31 }
  0x5c   :  { %2070 = vmatprep.subr.mxu0 %v109_v32  ;;  %2114 = vmatprep.subr.mxu1 %v3396_v0 }
  0x5d   :  { %2071 = vmatpush3.msra.mxu0 %v109_v32  ;;  %2115 = vmatpush3.msra.mxu1 %v2759_v33 }
  0x5e   :  { %2073 = vmatmul.mubr.f32.vlgmr.msra.gmra.mxu0 %v102_v34  ;;  %2117 = vmatmul.mubr.f32.vlgmr.msra.gmra.mxu1 %v3396_v0 }
  0x5f   :  { %1624 = vmatprep.subr.mxu0 %v2763_v35  ;;  %2119 = vmatprep.subr.mxu1 %v3396_v0 }
  0x60   :  { %1625 = vmatpush3.msra.mxu0 %v2766_v36  ;;  %2120 = vmatpush3.msra.mxu1 %v2701_v3 }
  0x61   :  { %1626 = vmatprep.subr.mxu0 %v2769_v37  ;;  %2121 = vmatprep.subr.mxu1 %v3396_v0 }
  0x62   :  { %1627 = vmatpush3.msra.mxu0 %v2773_v38  ;;  %2122 = vmatpush3.msra.mxu1 %v2704_v4 }
  0x63   :  { %1628 = vmatprep.subr.mxu0 %v2777_v39  ;;  %2123 = vmatprep.subr.mxu1 %v3396_v0 }
  0x64   :  { %1629 = vmatpush3.msra.mxu0 %v2781_v40  ;;  %2124 = vmatpush3.msra.mxu1 %v2707_v6 }
  0x65   :  { %1630 = vmatprep.subr.mxu0 %v2785_v41  ;;  %2125 = vmatprep.subr.mxu1 %v3396_v0 }
  0x66   :  { %1631 = vmatpush3.msra.mxu0 %v2789_v42  ;;  %2126 = vmatpush3.msra.mxu1 %v2711_v8 }
  0x67   :  { %1632 = vmatprep.subr.mxu0 %v2793_v43  ;;  %2127 = vmatprep.subr.mxu1 %v3396_v0 }
  0x68   :  { %1633 = vmatpush3.msra.mxu0 %v2797_v44  ;;  %2128 = vmatpush3.msra.mxu1 %v2715_v10 }
  0x69   :  { %1634 = vmatprep.subr.mxu0 %v2801_v45  ;;  %2129 = vmatprep.subr.mxu1 %v3396_v0 }
  0x6a   :  { %2130 = vmatpush3.msra.mxu1 %v2719_v12  ;;  %2151 = vmatprep.mubr.msk.f32.mxu1 %vm2626_vm0, %v3396_v0 }
  0x6b   :  { %2131 = vmatprep.subr.mxu1 %v3396_v0  ;;  %1635 = vmatpush3.msra.mxu0 %v2833_v46 }
  0x6c   :  { %2132 = vmatpush3.msra.mxu1 %v2723_v14  ;;  %1636 = vmatprep.subr.mxu0 %v2836_v47 }
  0x6d   :  { %2133 = vmatprep.subr.mxu1 %v3396_v0  ;;  %1637 = vmatpush3.msra.mxu0 %v2839_v48 }
  0x6e   :  { %2134 = vmatpush3.msra.mxu1 %v2727_v16  ;;  %1638 = vmatprep.subr.mxu0 %v2842_v49 }
  0x6f   :  { %2135 = vmatprep.subr.mxu1 %v3396_v0  ;;  %1639 = vmatpush3.msra.mxu0 %v2845_v50 }
  0x70   :  { %2136 = vmatpush3.msra.mxu1 %v2731_v18  ;;  %1640 = vmatprep.subr.mxu0 %v2848_v51 }
  0x71   :  { %2137 = vmatprep.subr.mxu1 %v3396_v0  ;;  %2075 = vmatprep.mubr.f32.mxu0 %v103_v52 }
  0x72   :  { %2138 = vmatpush3.msra.mxu1 %v2735_v20  ;;  %1641 = vmatpush3.msra.mxu0 %v2851_v53 }
  0x73   :  { %2139 = vmatprep.subr.mxu1 %v3396_v0  ;;  %2076 = vmatmul.mubr.f32.gmra.mxu0 %v104_v54 }
  0x74   :  { %2140 = vmatpush3.msra.mxu1 %v2739_v22  ;;  %1642 = vmatprep.subr.mxu0 %v2854_v55 }
  0x75   :  { %2141 = vmatprep.subr.mxu1 %v3396_v0  ;;  %1643 = vmatpush3.msra.mxu0 %v2857_v56 }
  0x76   :  { %2142 = vmatpush3.msra.mxu1 %v2743_v24  ;;  %2078 = vmatprep.mubr.f32.mxu0 %v105_v58 }
  0x77   :  { %2143 = vmatprep.subr.mxu1 %v3396_v0  ;;  %1644 = vmatprep.subr.mxu0 %v2859_v57 }
  0x78   :  { %2144 = vmatpush3.msra.mxu1 %v2747_v26  ;;  %1645 = vmatpush3.msra.mxu0 %v2862_v59 }
  0x79   :  { %2145 = vmatprep.subr.mxu1 %v3396_v0  ;;  %2079 = vmatmul.mubr.f32.gmra.mxu0 %v106_v60 }
  0x7a   :  { %2146 = vmatpush3.msra.mxu1 %v2751_v28  ;;  %1646 = vmatprep.subr.mxu0 %v2864_v61 }
  0x7b   :  { %2147 = vmatprep.subr.mxu1 %v3396_v0  ;;  %1647 = vmatpush3.msra.mxu0 %v2867_v62 }
  0x7c   :  { %2148 = vmatpush3.msra.mxu1 %v2756_v31  ;;  %2081 = vmatprep.mubr.f32.mxu0 %v107_v63 }
  0x7d   :  { %2149 = vmatprep.subr.mxu1 %v3396_v0  ;;  %1648 = vmatprep.subr.mxu0 %v2870_v1 }
  0x7e   :  { %2150 = vmatpush3.msra.mxu1 %v2759_v33  ;;  %1649 = vmatpush3.msra.mxu0 %v2873_v2 }
  0x7f   :  { %2154 = vmatprep.subr.mxu1 %v3396_v0  ;;  %2082 = vmatmul.mubr.f32.gmra.mxu0 %v108_v5 }
  0x80   :  { %1650 = vmatprep.subr.mxu0 %v2876_v7  ;;  %441 = vmatprep.mubr.f32.mxu0 %v3396_v0 }
  0x81   :  { %1651 = vmatpush3.msra.mxu0 %v2879_v9 }
  0x82   :  { %1652 = vmatprep.subr.mxu0 %v2882_v11 }
  0x83   :  { %1653 = vmatpush3.msra.mxu0 %v2885_v13 }
  0x84   :  { %1654 = vmatprep.subr.mxu0 %v2888_v15 }
  0x85   :  { %1655 = vmatpush3.msra.mxu0 %v2892_v17 }
  0x86   :  { %1676 = vmatprep.subr.mxu0 %v2763_v35 }
 0x11e   :  { %v2898_v19 = vpop.f32.mrf.mxu0  ;;  %v365_v21 = vpop.f32.mrf.mxu1 }
 0x11f   :  { %v204_v5 = vadd.f32 %v2898_v19, %v2903_v23  ;;  %v3400_v19 = vmov 0.0  }
 0x120   :  { %v198_v25 = vpop.f32.mrf.mxu0  ;;  %v2118_v27 = vpop.f32.mrf.mxu1 }
 0x121   :  { %v199_v29 = vadd.f32 %v2903_v23, %v198_v25 }
 0x123   :  { %v369_v30 = vadd.f32 %v365_v21, %v199_v29  ;;  %v2989_v29 = vld [vmem:[%s3392_s4 + $0x1] ss:$0 sm:$0xff] }
 0x125   :  { %2409 = vtanh.f32 %v369_v30 }
 0x132   :  { %v2410_v32 = vpop.eup %2409 }
 0x133   :  { %442 = vmatmul.mubr.f32.vlgmr.msra.gmra.mxu0 %v2410_v32  ;;  %2152 = vmatmul.mubr.f32.vlgmr.msra.gmra.mxu1 %v2410_v32  ;;  %v2972_v34 = vpop.f32.mrf.mxu0 }
 0x134   :  { %2155 = vmatpush3.msra.mxu1 %v2701_v3  ;;  %1677 = vmatpush3.msra.mxu0 %v2766_v36 }
 0x135   :  { %2156 = vmatprep.subr.mxu1 %v3396_v0  ;;  %1678 = vmatprep.subr.mxu0 %v2769_v37  ;;  %v2974_v52 = vpop.f32.mrf.mxu0 }
 0x136   :  { %2157 = vmatpush3.msra.mxu1 %v2704_v4  ;;  %1679 = vmatpush3.msra.mxu0 %v2773_v38 }
 0x137   :  { %2158 = vmatprep.subr.mxu1 %v3396_v0  ;;  %1680 = vmatprep.subr.mxu0 %v2777_v39 }
 0x138   :  { %2159 = vmatpush3.msra.mxu1 %v2707_v6  ;;  %1681 = vmatpush3.msra.mxu0 %v2781_v40 }
 0x139   :  { %2160 = vmatprep.subr.mxu1 %v3396_v0  ;;  %1682 = vmatprep.subr.mxu0 %v2785_v41  ;;  %v2976_v54 = vpop.f32.mrf.mxu0 }
 0x13a   :  { %2161 = vmatpush3.msra.mxu1 %v2711_v8  ;;  %1683 = vmatpush3.msra.mxu0 %v2789_v42  ;;  %3398 = vst [vmem:[#allocation18_spill] sm:$0xff] %v2976_v54 }
 0x13b   :  { %2162 = vmatprep.subr.mxu1 %v3396_v0  ;;  %1684 = vmatprep.subr.mxu0 %v2793_v43  ;;  %v2978_v58 = vpop.f32.mrf.mxu0 }
 0x13c   :  { %2163 = vmatpush3.msra.mxu1 %v2715_v10  ;;  %1685 = vmatpush3.msra.mxu0 %v2797_v44 }
 0x13d   :  { %2164 = vmatprep.subr.mxu1 %v3396_v0  ;;  %1686 = vmatprep.subr.mxu0 %v2801_v45 }
 0x13e   :  { %2165 = vmatpush3.msra.mxu1 %v2719_v12  ;;  %1687 = vmatpush3.msra.mxu0 %v2833_v46 }
 0x13f   :  { %2166 = vmatprep.subr.mxu1 %v3396_v0  ;;  %1688 = vmatprep.subr.mxu0 %v2836_v47  ;;  %v2980_v60 = vpop.f32.mrf.mxu0 }
 0x140   :  { %2167 = vmatpush3.msra.mxu1 %v2723_v14  ;;  %1689 = vmatpush3.msra.mxu0 %v2839_v48  ;;  %3399 = vst [vmem:[#allocation19_spill] sm:$0xff] %v2980_v60 }
 0x141   :  { %2168 = vmatprep.subr.mxu1 %v3396_v0  ;;  %1690 = vmatprep.subr.mxu0 %v2842_v49  ;;  %v2982_v63 = vpop.f32.mrf.mxu0 }
 0x142   :  { %2169 = vmatpush3.msra.mxu1 %v2727_v16  ;;  %1691 = vmatpush3.msra.mxu0 %v2845_v50 }
 0x143   :  { %2170 = vmatprep.subr.mxu1 %v3396_v0  ;;  %1692 = vmatprep.subr.mxu0 %v2848_v51 }
 0x144   :  { %2171 = vmatpush3.msra.mxu1 %v2731_v18  ;;  %1693 = vmatpush3.msra.mxu0 %v2851_v53 }
 0x145   :  { %2172 = vmatprep.subr.mxu1 %v3396_v0  ;;  %1694 = vmatprep.subr.mxu0 %v2854_v55 }
 0x146   :  { %2173 = vmatpush3.msra.mxu1 %v2735_v20  ;;  %1695 = vmatpush3.msra.mxu0 %v2857_v56 }
 0x147   :  { %2174 = vmatprep.subr.mxu1 %v3396_v0  ;;  %1696 = vmatprep.subr.mxu0 %v2859_v57 }
 0x148   :  { %2175 = vmatpush3.msra.mxu1 %v2739_v22  ;;  %1697 = vmatpush3.msra.mxu0 %v2862_v59 }
 0x149   :  { %2176 = vmatprep.subr.mxu1 %v3396_v0  ;;  %1698 = vmatprep.subr.mxu0 %v2864_v61 }
 0x14a   :  { %2177 = vmatpush3.msra.mxu1 %v2743_v24  ;;  %1699 = vmatpush3.msra.mxu0 %v2867_v62 }
 0x14b   :  { %2178 = vmatprep.subr.mxu1 %v3396_v0  ;;  %1700 = vmatprep.subr.mxu0 %v2870_v1 }
 0x14c   :  { %2179 = vmatpush3.msra.mxu1 %v2747_v26  ;;  %1701 = vmatpush3.msra.mxu0 %v2873_v2 }
 0x14d   :  { %2180 = vmatprep.subr.mxu1 %v3396_v0  ;;  %1702 = vmatprep.subr.mxu0 %v2876_v7 }
 0x14e   :  { %2181 = vmatpush3.msra.mxu1 %v2751_v28  ;;  %2186 = vmatprep.mubr.msk.f32.mxu1 %vm2626_vm0, %v3396_v0 }
 0x14f   :  { %2182 = vmatprep.subr.mxu1 %v3396_v0  ;;  %1703 = vmatpush3.msra.mxu0 %v2879_v9 }
 0x150   :  { %2183 = vmatpush3.msra.mxu1 %v2756_v31  ;;  %1704 = vmatprep.subr.mxu0 %v2882_v11 }
 0x151   :  { %2184 = vmatprep.subr.mxu1 %v3396_v0  ;;  %1705 = vmatpush3.msra.mxu0 %v2885_v13 }
 0x152   :  { %2185 = vmatpush3.msra.mxu1 %v2759_v33  ;;  %1706 = vmatprep.subr.mxu0 %v2888_v15 }
 0x153   :  { %1707 = vmatpush3.msra.mxu0 %v2892_v17  ;;  %2189 = vmatprep.subr.mxu1 %v3396_v0 }
 0x154   :  { %1728 = vmatprep.subr.mxu0 %v2763_v35 }
 0x1f3   :  { %v1656_v21 = vpop.f32.mrf.mxu0  ;;  %v516_v25 = vpop.f32.mrf.mxu1 }
 0x1f4   :  { %v520_v27 = vadd.f32 %v516_v25, %v204_v5 }
 0x1f5   :  { %v1657_v30 = vpop.f32.mrf.mxu0  ;;  %v2153_v32 = vpop.f32.mrf.mxu1 }
 0x1f6   :  { %2411 = vtanh.f32 %v520_v27  ;;  %v1658_v0 = vadd.f32 %v1657_v30, %v1656_v21 }
 0x1f8   :  { %v444_v54 = vadd.f32 %v1658_v0, %v2989_v29  ;;  %v209_v0 = vadd.f32 %v2903_v23, %v2974_v52 }
 0x1fa   :  { %2413 = vtanh.f32 %v444_v54 }
 0x203   :  { %v2412_v60 = vpop.eup %2411 }
 0x204   :  { %2187 = vmatmul.mubr.f32.vlgmr.msra.gmra.mxu1 %v2412_v60 }
 0x205   :  { %2190 = vmatpush3.msra.mxu1 %v2701_v3  ;;  %2221 = vmatprep.mubr.msk.f32.mxu1 %vm2626_vm0, %v3400_v19 }
 0x206   :  { %2191 = vmatprep.subr.mxu1 %v3400_v19 }
 0x207   :  { %v2414_v5 = vpop.eup %2413  ;;  %2192 = vmatpush3.msra.mxu1 %v2704_v4 }
 0x208   :  { %586 = vmatprep.mubr.f32.mxu0 %v2414_v5  ;;  %2193 = vmatprep.subr.mxu1 %v3400_v19 }
 0x209   :  { %587 = vmatmul.mubr.f32.vlgmr.msra.gmra.mxu0 %v2412_v60  ;;  %2194 = vmatpush3.msra.mxu1 %v2707_v6 }
 0x20a   :  { %2195 = vmatprep.subr.mxu1 %v3400_v19  ;;  %1729 = vmatpush3.msra.mxu0 %v2766_v36 }
 0x20b   :  { %2196 = vmatpush3.msra.mxu1 %v2711_v8  ;;  %1730 = vmatprep.subr.mxu0 %v2769_v37 }
 0x20c   :  { %2197 = vmatprep.subr.mxu1 %v3400_v19  ;;  %1731 = vmatpush3.msra.mxu0 %v2773_v38 }
 0x20d   :  { %2198 = vmatpush3.msra.mxu1 %v2715_v10  ;;  %1732 = vmatprep.subr.mxu0 %v2777_v39 }
 0x20e   :  { %2199 = vmatprep.subr.mxu1 %v3400_v19  ;;  %1733 = vmatpush3.msra.mxu0 %v2781_v40 }
 0x20f   :  { %2200 = vmatpush3.msra.mxu1 %v2719_v12  ;;  %1734 = vmatprep.subr.mxu0 %v2785_v41 }
 0x210   :  { %2201 = vmatprep.subr.mxu1 %v3400_v19  ;;  %1735 = vmatpush3.msra.mxu0 %v2789_v42 }
 0x211   :  { %2202 = vmatpush3.msra.mxu1 %v2723_v14  ;;  %1736 = vmatprep.subr.mxu0 %v2793_v43 }
 0x212   :  { %2203 = vmatprep.subr.mxu1 %v3400_v19  ;;  %1737 = vmatpush3.msra.mxu0 %v2797_v44 }
 0x213   :  { %2204 = vmatpush3.msra.mxu1 %v2727_v16  ;;  %1738 = vmatprep.subr.mxu0 %v2801_v45 }
 0x214   :  { %2205 = vmatprep.subr.mxu1 %v3400_v19  ;;  %1739 = vmatpush3.msra.mxu0 %v2833_v46 }
 0x215   :  { %2206 = vmatpush3.msra.mxu1 %v2731_v18  ;;  %1740 = vmatprep.subr.mxu0 %v2836_v47 }
 0x216   :  { %2207 = vmatprep.subr.mxu1 %v3400_v19  ;;  %1741 = vmatpush3.msra.mxu0 %v2839_v48 }
 0x217   :  { %2208 = vmatpush3.msra.mxu1 %v2735_v20  ;;  %1742 = vmatprep.subr.mxu0 %v2842_v49 }
 0x218   :  { %2209 = vmatprep.subr.mxu1 %v3400_v19  ;;  %1743 = vmatpush3.msra.mxu0 %v2845_v50 }
 0x219   :  { %2210 = vmatpush3.msra.mxu1 %v2739_v22  ;;  %1744 = vmatprep.subr.mxu0 %v2848_v51 }
 0x21a   :  { %2211 = vmatprep.subr.mxu1 %v3400_v19  ;;  %1745 = vmatpush3.msra.mxu0 %v2851_v53 }
 0x21b   :  { %2212 = vmatpush3.msra.mxu1 %v2743_v24  ;;  %1746 = vmatprep.subr.mxu0 %v2854_v55 }
 0x21c   :  { %2213 = vmatprep.subr.mxu1 %v3400_v19  ;;  %1747 = vmatpush3.msra.mxu0 %v2857_v56 }
 0x21d   :  { %2214 = vmatpush3.msra.mxu1 %v2747_v26  ;;  %1748 = vmatprep.subr.mxu0 %v2859_v57 }
 0x21e   :  { %2215 = vmatprep.subr.mxu1 %v3400_v19  ;;  %1749 = vmatpush3.msra.mxu0 %v2862_v59 }
 0x21f   :  { %2216 = vmatpush3.msra.mxu1 %v2751_v28  ;;  %1750 = vmatprep.subr.mxu0 %v2864_v61 }
 0x220   :  { %2217 = vmatprep.subr.mxu1 %v3400_v19  ;;  %1751 = vmatpush3.msra.mxu0 %v2867_v62 }
 0x221   :  { %2218 = vmatpush3.msra.mxu1 %v2756_v31  ;;  %1752 = vmatprep.subr.mxu0 %v2870_v1 }
 0x222   :  { %2219 = vmatprep.subr.mxu1 %v3400_v19  ;;  %1753 = vmatpush3.msra.mxu0 %v2873_v2 }
 0x223   :  { %2220 = vmatpush3.msra.mxu1 %v2759_v33  ;;  %1754 = vmatprep.subr.mxu0 %v2876_v7 }
 0x224   :  { %1755 = vmatpush3.msra.mxu0 %v2879_v9  ;;  %2224 = vmatprep.subr.mxu1 %v3400_v19 }
 0x225   :  { %1756 = vmatprep.subr.mxu0 %v2882_v11 }
 0x226   :  { %1757 = vmatpush3.msra.mxu0 %v2885_v13 }
 0x227   :  { %1758 = vmatprep.subr.mxu0 %v2888_v15 }
 0x228   :  { %1759 = vmatpush3.msra.mxu0 %v2892_v17 }
 0x229   :  { %1780 = vmatprep.subr.mxu0 %v2763_v35 }
 0x2c4   :  { %v661_v54 = vpop.f32.mrf.mxu1 }
 0x2c5   :  { %v665_v60 = vadd.f32 %v661_v54, %v209_v0  ;;  %v214_v0 = vadd.f32 %v2972_v34, %v2903_v23  ;;  %v3213_v34 = vld [vmem:[#allocation9 + $0x60] sm:$0xff] }
 0x2c6   :  { %v2188_v21 = vpop.f32.mrf.mxu1 }
 0x2c7   :  { %2415 = vtanh.f32 %v665_v60 }
 0x2c9   :  { %v1708_v25 = vpop.f32.mrf.mxu0 }
 0x2cb   :  { %v1709_v27 = vpop.f32.mrf.mxu0 }
 0x2cc   :  { %v1710_v30 = vadd.f32 %v1709_v27, %v1708_v25 }
 0x2ce   :  { %v589_v32 = vadd.f32 %v1710_v30, %v2989_v29 }
 0x2d0   :  { %2417 = vtanh.f32 %v589_v32 }
 0x2d4   :  { %v2416_v5 = vpop.eup %2415 }
 0x2d5   :  { %2222 = vmatmul.mubr.f32.vlgmr.msra.gmra.mxu1 %v2416_v5 }
 0x2d6   :  { %2225 = vmatpush3.msra.mxu1 %v2701_v3  ;;  %2256 = vmatprep.mubr.msk.f32.mxu1 %vm2626_vm0, %v3400_v19 }
 0x2d7   :  { %2226 = vmatprep.subr.mxu1 %v3400_v19 }
 0x2d8   :  { %2227 = vmatpush3.msra.mxu1 %v2704_v4 }
 0x2d9   :  { %2228 = vmatprep.subr.mxu1 %v3400_v19 }
 0x2da   :  { %2229 = vmatpush3.msra.mxu1 %v2707_v6 }
 0x2db   :  { %2230 = vmatprep.subr.mxu1 %v3400_v19 }
 0x2dc   :  { %2231 = vmatpush3.msra.mxu1 %v2711_v8 }
 0x2dd   :  { %v2418_v52 = vpop.eup %2417  ;;  %2232 = vmatprep.subr.mxu1 %v3400_v19 }
 0x2de   :  { %731 = vmatprep.mubr.f32.mxu0 %v2418_v52  ;;  %2233 = vmatpush3.msra.mxu1 %v2715_v10  ;;  %v3221_v52 = vld [vmem:[#allocation9 + $0x50] sm:$0xff] }
 0x2df   :  { %732 = vmatmul.mubr.f32.vlgmr.msra.gmra.mxu0 %v2416_v5  ;;  %2234 = vmatprep.subr.mxu1 %v3400_v19 }
 0x2e0   :  { %2235 = vmatpush3.msra.mxu1 %v2719_v12  ;;  %1781 = vmatpush3.msra.mxu0 %v2766_v36 }
 0x2e1   :  { %2236 = vmatprep.subr.mxu1 %v3400_v19  ;;  %1782 = vmatprep.subr.mxu0 %v2769_v37 }
 0x2e2   :  { %2237 = vmatpush3.msra.mxu1 %v2723_v14  ;;  %1783 = vmatpush3.msra.mxu0 %v2773_v38 }
 0x2e3   :  { %2238 = vmatprep.subr.mxu1 %v3400_v19  ;;  %1784 = vmatprep.subr.mxu0 %v2777_v39 }
 0x2e4   :  { %2239 = vmatpush3.msra.mxu1 %v2727_v16  ;;  %1785 = vmatpush3.msra.mxu0 %v2781_v40 }
 0x2e5   :  { %2240 = vmatprep.subr.mxu1 %v3400_v19  ;;  %1786 = vmatprep.subr.mxu0 %v2785_v41 }
 0x2e6   :  { %2241 = vmatpush3.msra.mxu1 %v2731_v18  ;;  %1787 = vmatpush3.msra.mxu0 %v2789_v42 }
 0x2e7   :  { %2242 = vmatprep.subr.mxu1 %v3400_v19  ;;  %1788 = vmatprep.subr.mxu0 %v2793_v43 }
 0x2e8   :  { %2243 = vmatpush3.msra.mxu1 %v2735_v20  ;;  %1789 = vmatpush3.msra.mxu0 %v2797_v44 }
 0x2e9   :  { %2244 = vmatprep.subr.mxu1 %v3400_v19  ;;  %1790 = vmatprep.subr.mxu0 %v2801_v45 }
 0x2ea   :  { %2245 = vmatpush3.msra.mxu1 %v2739_v22  ;;  %1791 = vmatpush3.msra.mxu0 %v2833_v46 }
 0x2eb   :  { %2246 = vmatprep.subr.mxu1 %v3400_v19  ;;  %1792 = vmatprep.subr.mxu0 %v2836_v47 }
 0x2ec   :  { %2247 = vmatpush3.msra.mxu1 %v2743_v24  ;;  %1793 = vmatpush3.msra.mxu0 %v2839_v48 }
 0x2ed   :  { %2248 = vmatprep.subr.mxu1 %v3400_v19  ;;  %1794 = vmatprep.subr.mxu0 %v2842_v49 }
 0x2ee   :  { %2249 = vmatpush3.msra.mxu1 %v2747_v26  ;;  %1795 = vmatpush3.msra.mxu0 %v2845_v50 }
 0x2ef   :  { %2250 = vmatprep.subr.mxu1 %v3400_v19  ;;  %1796 = vmatprep.subr.mxu0 %v2848_v51 }
 0x2f0   :  { %2251 = vmatpush3.msra.mxu1 %v2751_v28  ;;  %1797 = vmatpush3.msra.mxu0 %v2851_v53 }
 0x2f1   :  { %2252 = vmatprep.subr.mxu1 %v3400_v19  ;;  %1798 = vmatprep.subr.mxu0 %v2854_v55 }
 0x2f2   :  { %2253 = vmatpush3.msra.mxu1 %v2756_v31  ;;  %1799 = vmatpush3.msra.mxu0 %v2857_v56 }
 0x2f3   :  { %2254 = vmatprep.subr.mxu1 %v3400_v19  ;;  %1800 = vmatprep.subr.mxu0 %v2859_v57 }
 0x2f4   :  { %2255 = vmatpush3.msra.mxu1 %v2759_v33  ;;  %1801 = vmatpush3.msra.mxu0 %v2862_v59 }
 0x2f5   :  { %1802 = vmatprep.subr.mxu0 %v2864_v61  ;;  %2259 = vmatprep.subr.mxu1 %v3400_v19 }
 0x2f6   :  { %1803 = vmatpush3.msra.mxu0 %v2867_v62 }
 0x2f7   :  { %1804 = vmatprep.subr.mxu0 %v2870_v1 }
 0x2f8   :  { %1805 = vmatpush3.msra.mxu0 %v2873_v2 }
 0x2f9   :  { %1806 = vmatprep.subr.mxu0 %v2876_v7 }
 0x2fa   :  { %1807 = vmatpush3.msra.mxu0 %v2879_v9 }
 0x2fb   :  { %1808 = vmatprep.subr.mxu0 %v2882_v11 }
 0x2fc   :  { %1809 = vmatpush3.msra.mxu0 %v2885_v13 }
 0x2fd   :  { %1810 = vmatprep.subr.mxu0 %v2888_v15 }
 0x2fe   :  { %1811 = vmatpush3.msra.mxu0 %v2892_v17 }
 0x2ff   :  { %1832 = vmatprep.subr.mxu0 %v2763_v35 }
 0x395   :  { %v806_v54 = vpop.f32.mrf.mxu1 }
 0x396   :  { %v810_v60 = vadd.f32 %v806_v54, %v214_v0  ;;  %v3225_v0 = vld [vmem:[#allocation9 + $0x48] sm:$0xff]  ;;  %v3229_v54 = vld [vmem:[#allocation9 + $0x40] sm:$0xff] }
 0x397   :  { %v2223_v21 = vpop.f32.mrf.mxu1 }
 0x398   :  { %2419 = vtanh.f32 %v810_v60  ;;  %v3233_v60 = vld [vmem:[#allocation9 + $0x38] sm:$0xff] }
 0x39f   :  { %v1760_v25 = vpop.f32.mrf.mxu0 }
 0x3a1   :  { %v1761_v27 = vpop.f32.mrf.mxu0 }
 0x3a2   :  { %v1762_v30 = vadd.f32 %v1761_v27, %v1760_v25  ;;  %v3237_v25 = vld [vmem:[#allocation9 + $0x30] sm:$0xff]  ;;  %v3241_v27 = vld [vmem:[#allocation9 + $0x28] sm:$0xff] }
 0x3a4   :  { %v734_v32 = vadd.f32 %v1762_v30, %v2989_v29  ;;  %v3247_v30 = vld [vmem:[#allocation9 + $0x20] sm:$0xff] }
 0x3a5   :  { %v2420_v5 = vpop.eup %2419 }
 0x3a6   :  { %2421 = vtanh.f32 %v734_v32  ;;  %2257 = vmatmul.mubr.f32.vlgmr.msra.gmra.mxu1 %v2420_v5  ;;  %v2462_v32 = vld [vmem:[#allocation9] sm:$0xff] }
 0x3a7   :  { %2260 = vmatpush3.msra.mxu1 %v2701_v3  ;;  %2291 = vmatprep.mubr.msk.f32.mxu1 %vm2626_vm0, %v3400_v19 }
 0x3a8   :  { %2261 = vmatprep.subr.mxu1 %v3400_v19 }
 0x3a9   :  { %2262 = vmatpush3.msra.mxu1 %v2704_v4  ;;  %v219_v4 = vadd.f32 %v2903_v23, %v2978_v58  ;;  %v3217_v58 = vld [vmem:[#allocation9 + $0x58] sm:$0xff] }
 0x3aa   :  { %2263 = vmatprep.subr.mxu1 %v3400_v19 }
 0x3ab   :  { %2264 = vmatpush3.msra.mxu1 %v2707_v6 }
 0x3ac   :  { %2265 = vmatprep.subr.mxu1 %v3400_v19 }
 0x3ad   :  { %2266 = vmatpush3.msra.mxu1 %v2711_v8 }
 0x3ae   :  { %2267 = vmatprep.subr.mxu1 %v3400_v19 }
 0x3af   :  { %2268 = vmatpush3.msra.mxu1 %v2715_v10 }
 0x3b0   :  { %2269 = vmatprep.subr.mxu1 %v3400_v19 }
 0x3b1   :  { %2270 = vmatpush3.msra.mxu1 %v2719_v12 }
 0x3b2   :  { %2271 = vmatprep.subr.mxu1 %v3400_v19 }
 0x3b3   :  { %v2422_v3 = vpop.eup %2421  ;;  %2272 = vmatpush3.msra.mxu1 %v2723_v14 }
 0x3b4   :  { %876 = vmatprep.mubr.f32.mxu0 %v2422_v3  ;;  %2273 = vmatprep.subr.mxu1 %v3400_v19  ;;  %v2464_v3 = vld [vmem:[#allocation10 + $0x60] sm:$0xff] }
 0x3b5   :  { %877 = vmatmul.mubr.f32.vlgmr.msra.gmra.mxu0 %v2420_v5  ;;  %2274 = vmatpush3.msra.mxu1 %v2727_v16  ;;  %v2463_v5 = vld [vmem:[#allocation10 + $0xe0] sm:$0xff] }
 0x3b6   :  { %2275 = vmatprep.subr.mxu1 %v3400_v19  ;;  %1833 = vmatpush3.msra.mxu0 %v2766_v36 }
 0x3b7   :  { %2276 = vmatpush3.msra.mxu1 %v2731_v18  ;;  %1834 = vmatprep.subr.mxu0 %v2769_v37 }
 0x3b8   :  { %2277 = vmatprep.subr.mxu1 %v3400_v19  ;;  %1835 = vmatpush3.msra.mxu0 %v2773_v38 }
 0x3b9   :  { %2278 = vmatpush3.msra.mxu1 %v2735_v20  ;;  %1836 = vmatprep.subr.mxu0 %v2777_v39  ;;  %v3198_v20 = vld [vmem:[#allocation9 + $0x78] sm:$0xff] }
 0x3ba   :  { %2279 = vmatprep.subr.mxu1 %v3400_v19  ;;  %1837 = vmatpush3.msra.mxu0 %v2781_v40 }
 0x3bb   :  { %2280 = vmatpush3.msra.mxu1 %v2739_v22  ;;  %1838 = vmatprep.subr.mxu0 %v2785_v41 }
 0x3bc   :  { %2281 = vmatprep.subr.mxu1 %v3400_v19  ;;  %1839 = vmatpush3.msra.mxu0 %v2789_v42 }
 0x3bd   :  { %2282 = vmatpush3.msra.mxu1 %v2743_v24  ;;  %1840 = vmatprep.subr.mxu0 %v2793_v43  ;;  %v3205_v24 = vld [vmem:[#allocation9 + $0x70] sm:$0xff] }
 0x3be   :  { %2283 = vmatprep.subr.mxu1 %v3400_v19  ;;  %1841 = vmatpush3.msra.mxu0 %v2797_v44 }
 0x3bf   :  { %2284 = vmatpush3.msra.mxu1 %v2747_v26  ;;  %1842 = vmatprep.subr.mxu0 %v2801_v45 }
 0x3c0   :  { %2285 = vmatprep.subr.mxu1 %v3400_v19  ;;  %1843 = vmatpush3.msra.mxu0 %v2833_v46 }
 0x3c1   :  { %2286 = vmatpush3.msra.mxu1 %v2751_v28  ;;  %1844 = vmatprep.subr.mxu0 %v2836_v47 }
 0x3c2   :  { %2287 = vmatprep.subr.mxu1 %v3400_v19  ;;  %1845 = vmatpush3.msra.mxu0 %v2839_v48 }
 0x3c3   :  { %2288 = vmatpush3.msra.mxu1 %v2756_v31  ;;  %1846 = vmatprep.subr.mxu0 %v2842_v49 }
 0x3c4   :  { %2289 = vmatprep.subr.mxu1 %v3400_v19  ;;  %1847 = vmatpush3.msra.mxu0 %v2845_v50 }
 0x3c5   :  { %2290 = vmatpush3.msra.mxu1 %v2759_v33  ;;  %1848 = vmatprep.subr.mxu0 %v2848_v51 }
 0x3c6   :  { %1849 = vmatpush3.msra.mxu0 %v2851_v53  ;;  %2294 = vmatprep.subr.mxu1 %v3400_v19 }
 0x3c7   :  { %1850 = vmatprep.subr.mxu0 %v2854_v55 }
 0x3c8   :  { %1851 = vmatpush3.msra.mxu0 %v2857_v56 }
 0x3c9   :  { %1852 = vmatprep.subr.mxu0 %v2859_v57 }
 0x3ca   :  { %1853 = vmatpush3.msra.mxu0 %v2862_v59 }
 0x3cb   :  { %1854 = vmatprep.subr.mxu0 %v2864_v61 }
 0x3cc   :  { %1855 = vmatpush3.msra.mxu0 %v2867_v62 }
 0x3cd   :  { %1856 = vmatprep.subr.mxu0 %v2870_v1 }
 0x3ce   :  { %1857 = vmatpush3.msra.mxu0 %v2873_v2 }
 0x3cf   :  { %1858 = vmatprep.subr.mxu0 %v2876_v7 }
 0x3d0   :  { %1859 = vmatpush3.msra.mxu0 %v2879_v9 }
 0x3d1   :  { %1860 = vmatprep.subr.mxu0 %v2882_v11 }
 0x3d2   :  { %1861 = vmatpush3.msra.mxu0 %v2885_v13 }
 0x3d3   :  { %1862 = vmatprep.subr.mxu0 %v2888_v15 }
 0x3d4   :  { %1863 = vmatpush3.msra.mxu0 %v2892_v17 }
 0x3d5   :  { %1884 = vmatprep.subr.mxu0 %v2763_v35  ;;  %v3209_v35 = vld [vmem:[#allocation9 + $0x68] sm:$0xff] }
 0x466   :  { %v951_v6 = vpop.f32.mrf.mxu1 }
 0x467   :  { %v955_v8 = vadd.f32 %v951_v6, %v219_v4  ;;  %v2465_v4 = vld [vmem:[#allocation10 + $0xd8] sm:$0xff] }
 0x468   :  { %v2258_v10 = vpop.f32.mrf.mxu1  ;;  %v2466_v6 = vld [vmem:[#allocation10 + $0x58] sm:$0xff] }
 0x469   :  { %2423 = vtanh.f32 %v955_v8  ;;  %v2467_v8 = vld [vmem:[#allocation10 + $0xd0] sm:$0xff] }
 0x46a   :  { %v2468_v10 = vld [vmem:[#allocation10 + $0x50] sm:$0xff] }
 0x475   :  { %v1812_v12 = vpop.f32.mrf.mxu0 }
 0x476   :  { %v2424_v14 = vpop.eup %2423 }
 0x477   :  { %v1813_v16 = vpop.f32.mrf.mxu0  ;;  %2292 = vmatmul.mubr.f32.vlgmr.msra.gmra.mxu1 %v2424_v14 }
 0x478   :  { %v1814_v18 = vadd.f32 %v1813_v16, %v1812_v12  ;;  %2295 = vmatpush3.msra.mxu1 %v3198_v20  ;;  %2326 = vmatprep.mubr.msk.f32.mxu1 %vm2626_vm0, %v3400_v19  ;;  %v2469_v12 = vld [vmem:[#allocation10 + $0xc8] sm:$0xff]  ;;  %v2471_v16 = vld [vmem:[#allocation10 + $0xc0] sm:$0xff] }
 0x479   :  { %2296 = vmatprep.subr.mxu1 %v3400_v19 }
 0x47a   :  { %v879_v22 = vadd.f32 %v1814_v18, %v2989_v29  ;;  %2297 = vmatpush3.msra.mxu1 %v3205_v24  ;;  %v2472_v18 = vld [vmem:[#allocation10 + $0x40] sm:$0xff] }
 0x47b   :  { %2298 = vmatprep.subr.mxu1 %v3400_v19 }
 0x47c   :  { %2425 = vtanh.f32 %v879_v22  ;;  %2299 = vmatpush3.msra.mxu1 %v3209_v35  ;;  %v2481_v22 = vld [vmem:[#allocation10 + $0x98] sm:$0xff] }
 0x47d   :  { %2300 = vmatprep.subr.mxu1 %v3400_v19 }
 0x47e   :  { %2301 = vmatpush3.msra.mxu1 %v3213_v34 }
 0x47f   :  { %2302 = vmatprep.subr.mxu1 %v3400_v19 }
 0x480   :  { %2303 = vmatpush3.msra.mxu1 %v3217_v58 }
 0x481   :  { %2304 = vmatprep.subr.mxu1 %v3400_v19 }
 0x482   :  { %2305 = vmatpush3.msra.mxu1 %v3221_v52 }
 0x483   :  { %2306 = vmatprep.subr.mxu1 %v3400_v19 }
 0x484   :  { %2307 = vmatpush3.msra.mxu1 %v3225_v0 }
 0x485   :  { %2308 = vmatprep.subr.mxu1 %v3400_v19 }
 0x486   :  { %2309 = vmatpush3.msra.mxu1 %v3229_v54 }
 0x487   :  { %2310 = vmatprep.subr.mxu1 %v3400_v19 }
 0x488   :  { %2311 = vmatpush3.msra.mxu1 %v3233_v60 }
 0x489   :  { %v2426_v21 = vpop.eup %2425  ;;  %2312 = vmatprep.subr.mxu1 %v3400_v19 }
 0x48a   :  { %1021 = vmatprep.mubr.f32.mxu0 %v2426_v21  ;;  %2313 = vmatpush3.msra.mxu1 %v3237_v25  ;;  %v1482_v21 = vld [vmem:[#allocation12 + $0x70] sm:$0xff] }
 0x48b   :  { %1022 = vmatmul.mubr.f32.vlgmr.msra.gmra.mxu0 %v2424_v14  ;;  %2314 = vmatprep.subr.mxu1 %v3400_v19  ;;  %v2470_v14 = vld [vmem:[#allocation10 + $0x48] sm:$0xff] }
 0x48c   :  { %2315 = vmatpush3.msra.mxu1 %v3241_v27  ;;  %1885 = vmatpush3.msra.mxu0 %v2766_v36 }
 0x48d   :  { %2316 = vmatprep.subr.mxu1 %v3400_v19  ;;  %1886 = vmatprep.subr.mxu0 %v2769_v37 }
 0x48e   :  { %2317 = vmatpush3.msra.mxu1 %v3247_v30  ;;  %1887 = vmatpush3.msra.mxu0 %v2773_v38 }
 0x48f   :  { %2318 = vmatprep.subr.mxu1 %v3400_v19  ;;  %1888 = vmatprep.subr.mxu0 %v2777_v39 }
 0x490   :  { %2319 = vmatpush3.msra.mxu1 %v2747_v26  ;;  %1889 = vmatpush3.msra.mxu0 %v2781_v40  ;;  %v3288_v26 = vld [vmem:[#allocation10 + $0xf8] sm:$0xff] }
 0x491   :  { %2320 = vmatprep.subr.mxu1 %v3400_v19  ;;  %1890 = vmatprep.subr.mxu0 %v2785_v41 }
 0x492   :  { %2321 = vmatpush3.msra.mxu1 %v2751_v28  ;;  %1891 = vmatpush3.msra.mxu0 %v2789_v42  ;;  %v3401_v28 = vld [vmem:[#allocation18_spill] sm:$0xff] }
 0x493   :  { %2322 = vmatprep.subr.mxu1 %v3400_v19  ;;  %1892 = vmatprep.subr.mxu0 %v2793_v43 }
 0x494   :  { %2323 = vmatpush3.msra.mxu1 %v2756_v31  ;;  %1893 = vmatpush3.msra.mxu0 %v2797_v44  ;;  %v224_v31 = vadd.f32 %v3401_v28, %v2903_v23  ;;  %v2454_v44 = vld [vmem:[#allocation9 + $0x18] sm:$0xff] }
 0x495   :  { %2324 = vmatprep.subr.mxu1 %v3400_v19  ;;  %1894 = vmatprep.subr.mxu0 %v2801_v45  ;;  %v3321_v45 = vld [vmem:[#allocation10 + $0x78] sm:$0xff] }
 0x496   :  { %2325 = vmatpush3.msra.mxu1 %v2759_v33  ;;  %1895 = vmatpush3.msra.mxu0 %v2833_v46  ;;  %v2456_v46 = vld [vmem:[#allocation9 + $0x10] sm:$0xff] }
 0x497   :  { %1896 = vmatprep.subr.mxu0 %v2836_v47  ;;  %2329 = vmatprep.subr.mxu1 %v3400_v19  ;;  %v3324_v47 = vld [vmem:[#allocation10 + $0xf0] sm:$0xff] }
 0x498   :  { %1897 = vmatpush3.msra.mxu0 %v2839_v48  ;;  %v3328_v48 = vld [vmem:[#allocation10 + $0x70] sm:$0xff] }
 0x499   :  { %1898 = vmatprep.subr.mxu0 %v2842_v49  ;;  %v2459_v49 = vld [vmem:[#allocation9 + $0x8] sm:$0xff] }
 0x49a   :  { %1899 = vmatpush3.msra.mxu0 %v2845_v50  ;;  %v3331_v50 = vld [vmem:[#allocation10 + $0xe8] sm:$0xff] }
 0x49b   :  { %1900 = vmatprep.subr.mxu0 %v2848_v51  ;;  %v2461_v51 = vld [vmem:[#allocation10 + $0x68] sm:$0xff] }
 0x49c   :  { %1901 = vmatpush3.msra.mxu0 %v2851_v53 }
 0x49d   :  { %1902 = vmatprep.subr.mxu0 %v2854_v55 }
 0x49e   :  { %1903 = vmatpush3.msra.mxu0 %v2857_v56 }
 0x49f   :  { %1904 = vmatprep.subr.mxu0 %v2859_v57 }
 0x4a0   :  { %1905 = vmatpush3.msra.mxu0 %v2862_v59 }
 0x4a1   :  { %1906 = vmatprep.subr.mxu0 %v2864_v61 }
 0x4a2   :  { %1907 = vmatpush3.msra.mxu0 %v2867_v62 }
 0x4a3   :  { %1908 = vmatprep.subr.mxu0 %v2870_v1 }
 0x4a4   :  { %1909 = vmatpush3.msra.mxu0 %v2873_v2 }
 0x4a5   :  { %1910 = vmatprep.subr.mxu0 %v2876_v7 }
 0x4a6   :  { %1911 = vmatpush3.msra.mxu0 %v2879_v9 }
 0x4a7   :  { %1912 = vmatprep.subr.mxu0 %v2882_v11 }
 0x4a8   :  { %1913 = vmatpush3.msra.mxu0 %v2885_v13 }
 0x4a9   :  { %1914 = vmatprep.subr.mxu0 %v2888_v15 }
 0x4aa   :  { %1915 = vmatpush3.msra.mxu0 %v2892_v17 }
 0x4ab   :  { %1936 = vmatprep.subr.mxu0 %v3288_v26 }
 0x537   :  { %v1096_v33 = vpop.f32.mrf.mxu1 }
 0x538   :  { %v1100_v36 = vadd.f32 %v1096_v33, %v224_v31  ;;  %v2489_v33 = vld [vmem:[%s3392_s4] ss:$0 sm:$0xff] }
 0x539   :  { %v2293_v37 = vpop.f32.mrf.mxu1 }
 0x53a   :  { %2427 = vtanh.f32 %v1100_v36  ;;  %v3402_v36 = vld [vmem:[#allocation19_spill] sm:$0xff] }
 0x53b   :  { %v234_v37 = vadd.f32 %v2489_v33, %v3402_v36 }
 0x547   :  { %v2428_v38 = vpop.eup %2427 }
 0x548   :  { %2327 = vmatmul.mubr.f32.vlgmr.msra.gmra.mxu1 %v2428_v38 }
 0x549   :  { %2330 = vmatpush3.msra.mxu1 %v3198_v20  ;;  %2361 = vmatprep.mubr.msk.f32.mxu1 %vm2626_vm0, %v3400_v19  ;;  %v2473_v20 = vld [vmem:[#allocation10 + $0xb8] sm:$0xff] }
 0x54a   :  { %2331 = vmatprep.subr.mxu1 %v3400_v19 }
 0x54b   :  { %v1864_v39 = vpop.f32.mrf.mxu0  ;;  %2332 = vmatpush3.msra.mxu1 %v3205_v24  ;;  %v2482_v24 = vld [vmem:[#allocation10 + $0x18] sm:$0xff] }
 0x54c   :  { %2333 = vmatprep.subr.mxu1 %v3400_v19 }
 0x54d   :  { %v1865_v40 = vpop.f32.mrf.mxu0  ;;  %2334 = vmatpush3.msra.mxu1 %v3209_v35  ;;  %v2483_v35 = vld [vmem:[#allocation10 + $0x90] sm:$0xff] }
 0x54e   :  { %v1866_v41 = vadd.f32 %v1865_v40, %v1864_v39  ;;  %2335 = vmatprep.subr.mxu1 %v3400_v19 }
 0x54f   :  { %2336 = vmatpush3.msra.mxu1 %v3213_v34  ;;  %v2484_v34 = vld [vmem:[#allocation10 + $0x10] sm:$0xff] }
 0x550   :  { %v1024_v42 = vadd.f32 %v1866_v41, %v2989_v29  ;;  %2337 = vmatprep.subr.mxu1 %v3400_v19 }
 0x551   :  { %2338 = vmatpush3.msra.mxu1 %v3217_v58  ;;  %v2485_v58 = vld [vmem:[#allocation10 + $0x88] sm:$0xff] }
 0x552   :  { %2429 = vtanh.f32 %v1024_v42  ;;  %2339 = vmatprep.subr.mxu1 %v3400_v19 }
 0x553   :  { %2340 = vmatpush3.msra.mxu1 %v3221_v52  ;;  %v2486_v52 = vld [vmem:[#allocation10 + $0x8] sm:$0xff] }
 0x554   :  { %2341 = vmatprep.subr.mxu1 %v3400_v19 }
 0x555   :  { %2342 = vmatpush3.msra.mxu1 %v3225_v0  ;;  %v2487_v0 = vld [vmem:[#allocation10 + $0x80] sm:$0xff] }
 0x556   :  { %2343 = vmatprep.subr.mxu1 %v3400_v19 }
 0x557   :  { %2344 = vmatpush3.msra.mxu1 %v3229_v54  ;;  %v2488_v54 = vld [vmem:[#allocation10] sm:$0xff] }
 0x558   :  { %2345 = vmatprep.subr.mxu1 %v3400_v19 }
 0x559   :  { %2346 = vmatpush3.msra.mxu1 %v3233_v60  ;;  %v1483_v60 = vld [vmem:[#allocation12 + $0x78] sm:$0xff] }
 0x55a   :  { %2347 = vmatprep.subr.mxu1 %v3400_v19 }
 0x55b   :  { %2348 = vmatpush3.msra.mxu1 %v3237_v25  ;;  %v1481_v25 = vld [vmem:[#allocation12 + $0x68] sm:$0xff] }
 0x55c   :  { %2349 = vmatprep.subr.mxu1 %v3400_v19 }
 0x55d   :  { %2350 = vmatpush3.msra.mxu1 %v3241_v27  ;;  %v1480_v27 = vld [vmem:[#allocation12 + $0x60] sm:$0xff] }
 0x55e   :  { %2351 = vmatprep.subr.mxu1 %v3400_v19 }
 0x55f   :  { %v2430_v43 = vpop.eup %2429  ;;  %2352 = vmatpush3.msra.mxu1 %v3247_v30  ;;  %v1479_v30 = vld [vmem:[#allocation12 + $0x58] sm:$0xff] }
 0x560   :  { %1166 = vmatprep.mubr.f32.mxu0 %v2430_v43  ;;  %2353 = vmatprep.subr.mxu1 %v3400_v19 }
 0x561   :  { %1167 = vmatmul.mubr.f32.vlgmr.msra.gmra.mxu0 %v2428_v38  ;;  %2354 = vmatpush3.msra.mxu1 %v2454_v44  ;;  %v1478_v44 = vld [vmem:[#allocation12 + $0x50] sm:$0xff] }
 0x562   :  { %2355 = vmatprep.subr.mxu1 %v3400_v19  ;;  %1937 = vmatpush3.msra.mxu0 %v3321_v45 }
 0x563   :  { %2356 = vmatpush3.msra.mxu1 %v2456_v46  ;;  %1938 = vmatprep.subr.mxu0 %v3324_v47  ;;  %v1476_v46 = vld [vmem:[#allocation12 + $0x40] sm:$0xff] }
 0x564   :  { %2357 = vmatprep.subr.mxu1 %v3400_v19  ;;  %1939 = vmatpush3.msra.mxu0 %v3328_v48 }
 0x565   :  { %2358 = vmatpush3.msra.mxu1 %v2459_v49  ;;  %1940 = vmatprep.subr.mxu0 %v3331_v50  ;;  %v1473_v49 = vld [vmem:[#allocation12 + $0x28] sm:$0xff] }
 0x566   :  { %2359 = vmatprep.subr.mxu1 %v3400_v19  ;;  %1941 = vmatpush3.msra.mxu0 %v2461_v51 }
 0x567   :  { %2360 = vmatpush3.msra.mxu1 %v2462_v32  ;;  %1942 = vmatprep.subr.mxu0 %v2463_v5  ;;  %v1470_v32 = vld [vmem:[#allocation12 + $0x10] sm:$0xff] }
 0x568   :  { %1943 = vmatpush3.msra.mxu0 %v2464_v3  ;;  %2364 = vmatprep.subr.mxu1 %v3400_v19 }
 0x569   :  { %1944 = vmatprep.subr.mxu0 %v2465_v4 }
 0x56a   :  { %1945 = vmatpush3.msra.mxu0 %v2466_v6 }
 0x56b   :  { %1946 = vmatprep.subr.mxu0 %v2467_v8 }
 0x56c   :  { %1947 = vmatpush3.msra.mxu0 %v2468_v10 }
 0x56d   :  { %1948 = vmatprep.subr.mxu0 %v2469_v12 }
 0x56e   :  { %1949 = vmatpush3.msra.mxu0 %v2470_v14 }
 0x56f   :  { %1950 = vmatprep.subr.mxu0 %v2471_v16 }
 0x570   :  { %1951 = vmatpush3.msra.mxu0 %v2472_v18 }
 0x571   :  { %1952 = vmatprep.subr.mxu0 %v2473_v20 }
 0x572   :  { %1953 = vmatpush3.msra.mxu0 %v2851_v53  ;;  %v229_v53 = vadd.f32 %v2903_v23, %v2982_v63  ;;  %v2479_v23 = vld [vmem:[#allocation10 + $0xa0] sm:$0xff] }
 0x573   :  { %1954 = vmatprep.subr.mxu0 %v2854_v55  ;;  %v2480_v63 = vld [vmem:[#allocation10 + $0x20] sm:$0xff] }
 0x574   :  { %1955 = vmatpush3.msra.mxu0 %v2857_v56 }
 0x575   :  { %1956 = vmatprep.subr.mxu0 %v2859_v57 }
 0x576   :  { %1957 = vmatpush3.msra.mxu0 %v2862_v59 }
 0x577   :  { %1958 = vmatprep.subr.mxu0 %v2864_v61 }
 0x578   :  { %1959 = vmatpush3.msra.mxu0 %v2867_v62 }
 0x579   :  { %1960 = vmatprep.subr.mxu0 %v2870_v1 }
 0x57a   :  { %1961 = vmatpush3.msra.mxu0 %v2873_v2 }
 0x57b   :  { %1962 = vmatprep.subr.mxu0 %v2876_v7 }
 0x57c   :  { %1963 = vmatpush3.msra.mxu0 %v2879_v9  ;;  %v2474_v9 = vld [vmem:[#allocation10 + $0x38] sm:$0xff] }
 0x57d   :  { %1964 = vmatprep.subr.mxu0 %v2882_v11  ;;  %v2475_v11 = vld [vmem:[#allocation10 + $0xb0] sm:$0xff] }
 0x57e   :  { %1965 = vmatpush3.msra.mxu0 %v2885_v13  ;;  %v2476_v13 = vld [vmem:[#allocation10 + $0x30] sm:$0xff] }
 0x57f   :  { %1966 = vmatprep.subr.mxu0 %v2888_v15  ;;  %v2477_v15 = vld [vmem:[#allocation10 + $0xa8] sm:$0xff] }
 0x580   :  { %1967 = vmatpush3.msra.mxu0 %v2892_v17  ;;  %v2478_v17 = vld [vmem:[#allocation10 + $0x28] sm:$0xff] }
 0x581   :  { %1988 = vmatprep.subr.mxu0 %v3288_v26 }
 0x608   :  { %v1241_v55 = vpop.f32.mrf.mxu1 }
 0x609   :  { %v1245_v56 = vadd.f32 %v1241_v55, %v229_v53 }
 0x60a   :  { %v2328_v57 = vpop.f32.mrf.mxu1 }
 0x60b   :  { %2431 = vtanh.f32 %v1245_v56 }
 0x618   :  { %v2432_v59 = vpop.eup %2431 }
 0x619   :  { %2362 = vmatmul.mubr.f32.vlgmr.msra.gmra.mxu1 %v2432_v59 }
 0x61a   :  { %2396 = vmatprep.mubr.msk.f32.mxu1 %vm2626_vm0, %v3400_v19  ;;  %2365 = vmatpush3.msra.mxu1 %v1483_v60 }
 0x61b   :  { %2366 = vmatprep.subr.mxu1 %v3400_v19 }
 0x61c   :  { %2367 = vmatpush3.msra.mxu1 %v1482_v21 }
 0x61d   :  { %2368 = vmatprep.subr.mxu1 %v3400_v19 }
 0x61e   :  { %2369 = vmatpush3.msra.mxu1 %v1481_v25 }
 0x61f   :  { %2370 = vmatprep.subr.mxu1 %v3400_v19 }
 0x620   :  { %2371 = vmatpush3.msra.mxu1 %v1480_v27 }
 0x621   :  { %v1916_v61 = vpop.f32.mrf.mxu0  ;;  %2372 = vmatprep.subr.mxu1 %v3400_v19 }
 0x622   :  { %2373 = vmatpush3.msra.mxu1 %v1479_v30 }
 0x623   :  { %v1917_v62 = vpop.f32.mrf.mxu0  ;;  %2374 = vmatprep.subr.mxu1 %v3400_v19 }
 0x624   :  { %v1918_v1 = vadd.f32 %v1917_v62, %v1916_v61  ;;  %2375 = vmatpush3.msra.mxu1 %v1478_v44 }
 0x625   :  { %2376 = vmatprep.subr.mxu1 %v3400_v19 }
 0x626   :  { %v1169_v2 = vadd.f32 %v1918_v1, %v2989_v29 }
 0x628   :  { %2433 = vtanh.f32 %v1169_v2 }
 0x635   :  { %v2434_v7 = vpop.eup %2433 }
 0x636   :  { %1311 = vmatprep.mubr.f32.mxu0 %v2434_v7 }
 0x637   :  { %1312 = vmatmul.mubr.f32.vlgmr.msra.gmra.mxu0 %v2432_v59 }
 0x638   :  { %1989 = vmatpush3.msra.mxu0 %v3321_v45  ;;  %v1477_v45 = vld [vmem:[#allocation12 + $0x48] sm:$0xff] }
 0x639   :  { %1990 = vmatprep.subr.mxu0 %v3324_v47  ;;  %2377 = vmatpush3.msra.mxu1 %v1477_v45  ;;  %v1475_v47 = vld [vmem:[#allocation12 + $0x38] sm:$0xff] }
 0x63a   :  { %1991 = vmatpush3.msra.mxu0 %v3328_v48  ;;  %2378 = vmatprep.subr.mxu1 %v3400_v19  ;;  %v1474_v48 = vld [vmem:[#allocation12 + $0x30] sm:$0xff] }
 0x63b   :  { %1992 = vmatprep.subr.mxu0 %v3331_v50  ;;  %2379 = vmatpush3.msra.mxu1 %v1476_v46  ;;  %v1472_v50 = vld [vmem:[#allocation12 + $0x20] sm:$0xff] }
 0x63c   :  { %1993 = vmatpush3.msra.mxu0 %v2461_v51  ;;  %2380 = vmatprep.subr.mxu1 %v3400_v19  ;;  %v1471_v51 = vld [vmem:[#allocation12 + $0x18] sm:$0xff] }
 0x63d   :  { %1994 = vmatprep.subr.mxu0 %v2463_v5  ;;  %2381 = vmatpush3.msra.mxu1 %v1475_v47  ;;  %v1469_v5 = vld [vmem:[#allocation12 + $0x8] sm:$0xff] }
 0x63e   :  { %1995 = vmatpush3.msra.mxu0 %v2464_v3  ;;  %2382 = vmatprep.subr.mxu1 %v3400_v19  ;;  %v1468_v3 = vld [vmem:[#allocation12] sm:$0xff] }
 0x63f   :  { %1996 = vmatprep.subr.mxu0 %v2465_v4  ;;  %2383 = vmatpush3.msra.mxu1 %v1474_v48 }
 0x640   :  { %1997 = vmatpush3.msra.mxu0 %v2466_v6  ;;  %2384 = vmatprep.subr.mxu1 %v3400_v19 }
 0x641   :  { %1998 = vmatprep.subr.mxu0 %v2467_v8  ;;  %2385 = vmatpush3.msra.mxu1 %v1473_v49 }
 0x642   :  { %1999 = vmatpush3.msra.mxu0 %v2468_v10  ;;  %2386 = vmatprep.subr.mxu1 %v3400_v19 }
 0x643   :  { %2000 = vmatprep.subr.mxu0 %v2469_v12  ;;  %2387 = vmatpush3.msra.mxu1 %v1472_v50 }
 0x644   :  { %2001 = vmatpush3.msra.mxu0 %v2470_v14  ;;  %2388 = vmatprep.subr.mxu1 %v3400_v19  ;;  %v1582_v14 = vld [vmem:[%s3394_s6] ss:$0 sm:$0xff] }
 0x645   :  { %2002 = vmatprep.subr.mxu0 %v2471_v16  ;;  %2389 = vmatpush3.msra.mxu1 %v1471_v51 }
 0x646   :  { %2003 = vmatpush3.msra.mxu0 %v2472_v18  ;;  %2390 = vmatprep.subr.mxu1 %v3400_v19 }
 0x647   :  { %2004 = vmatprep.subr.mxu0 %v2473_v20  ;;  %2391 = vmatpush3.msra.mxu1 %v1470_v32 }
 0x648   :  { %2005 = vmatpush3.msra.mxu0 %v2474_v9  ;;  %2392 = vmatprep.subr.mxu1 %v3400_v19 }
 0x649   :  { %2006 = vmatprep.subr.mxu0 %v2475_v11  ;;  %2393 = vmatpush3.msra.mxu1 %v1469_v5 }
 0x64a   :  { %2007 = vmatpush3.msra.mxu0 %v2476_v13  ;;  %2394 = vmatprep.subr.mxu1 %v3400_v19 }
 0x64b   :  { %2008 = vmatprep.subr.mxu0 %v2477_v15  ;;  %2395 = vmatpush3.msra.mxu1 %v1468_v3 }
 0x64c   :  { %2009 = vmatpush3.msra.mxu0 %v2478_v17 }
 0x64d   :  { %2010 = vmatprep.subr.mxu0 %v2479_v23 }
 0x64e   :  { %2011 = vmatpush3.msra.mxu0 %v2480_v63 }
 0x64f   :  { %2012 = vmatprep.subr.mxu0 %v2481_v22 }
 0x650   :  { %2013 = vmatpush3.msra.mxu0 %v2482_v24 }
 0x651   :  { %2014 = vmatprep.subr.mxu0 %v2483_v35 }
 0x652   :  { %2015 = vmatpush3.msra.mxu0 %v2484_v34 }
 0x653   :  { %2016 = vmatprep.subr.mxu0 %v2485_v58 }
 0x654   :  { %2017 = vmatpush3.msra.mxu0 %v2486_v52 }
 0x655   :  { %2018 = vmatprep.subr.mxu0 %v2487_v0 }
 0x656   :  { %2019 = vmatpush3.msra.mxu0 %v2488_v54 }
 0x6d9   :  { %v1386_v26 = vpop.f32.mrf.mxu1 }
 0x6da   :  { %v1390_v40 = vadd.f32 %v1386_v26, %v234_v37 }
 0x6db   :  { %v2363_v28 = vpop.f32.mrf.mxu1 }
 0x6f7   :  { %v1968_v31 = vpop.f32.mrf.mxu0 }
 0x6f9   :  { %v1969_v38 = vpop.f32.mrf.mxu0 }
 0x6fa   :  { %v1970_v39 = vadd.f32 %v1969_v38, %v1968_v31 }
 0x6fc   :  { %v1314_v41 = vadd.f32 %v1970_v39, %v2989_v29 }
 0x6fe   :  { %2435 = vtanh.f32 %v1314_v41 }
 0x6ff   :  { %2437 = vtanh.f32 %v1390_v40 }
 0x70b   :  { %v2436_v42 = vpop.eup %2435 }
 0x70c   :  { %v2438_v43 = vpop.eup %2437  ;;  %1456 = vmatprep.mubr.f32.mxu0 %v2436_v42 }
 0x70d   :  { %1457 = vmatmul.mubr.f32.vlgmr.msra.gmra.mxu0 %v2438_v43 }
 0x7cd   :  { %v2020_v4 = vpop.f32.mrf.mxu0 }
 0x7cf   :  { %v2021_v6 = vpop.f32.mrf.mxu0 }
 0x7d0   :  { %v2022_v8 = vadd.f32 %v2021_v6, %v2020_v4 }
 0x7d2   :  { %v1459_v10 = vadd.f32 %v2022_v8, %v2989_v29 }
 0x7d4   :  { %2439 = vtanh.f32 %v1459_v10 }
 0x7e1   :  { %v2440_v12 = vpop.eup %2439 }
 0x7e2   :  { %2397 = vmatmul.mubr.f32.vlgmr.msra.gmra.mxu1 %v2440_v12 }
 0x8a2   :  { %v1557_v16 = vpop.f32.mrf.mxu1 }
 0x8a3   :  { %v1558_v18 = vadd.f32 %v1582_v14, %v1557_v16 }
 0x8a4   :  { %v2398_v20 = vpop.f32.mrf.mxu1 }
 0x8a5   :  { %1561 = vst [vmem:[#allocation13] sm:$0xff] %v1558_v18 }
 0x8a6   :  { %2601 = shalt.err (!%p2598_p1)
}
 0x8a7   :  { %1571 = dma.vmem_to_hbm [thread:$0]  %s1569_s8, 128, %s3395_s7, [#allocation6]  }
 0x8a8   :  { %2616 = dma.done.wait [#allocation6], 128  }
 0x8a9   :  { %2617 = vsyncadd [#allocation6], 4294967168 }
 0x8aa   :  { %1575 = vsyncpa [#allocation5], 1 }
 0x8ab   :  { %1576 = vsyncpa [#allocation8], 1 }
 0x8ac   :  { %1577 = vsyncpa [#allocation11], 1 }
 0x8ad   :  { %1578 = vsyncpa [#allocation6], 1 }

</bundles_post_ra>
